<compile_context>
chip_gen: v7x
topology: tpu7x:2x2x1
jax: 0.10.0
libtpu: 0.0.40
codegen_flags: <defaults>
</compile_context>

<pallas_src>
import functools

import numpy as np
import jax
import jax.numpy as jnp
from jax.experimental import pallas as pl
from jax.experimental.pallas import tpu as pltpu

# logical sizes
C1, C2, H1, NCLS = 10, 20, 50, 10
# padded sizes
C1P, C2P, H1P, OP = 16, 32, 64, 128
PW1P, PW2 = 16, 4            # pooled conv1 width padded 12->16; pooled conv2 width 4
IW1 = 32                     # conv1 input width padded 28->32
K1 = 5 * IW1                 # 160   conv1 contraction dim
L1 = PW1P * C1P              # 256   lanes of pooled conv1 map (pw*C1P + c)
K2 = 5 * L1                  # 1280  conv2 contraction dim
L2 = PW2 * C2P               # 128   lanes of pooled conv2 map (pw*C2P + c)


# ---------------------------------------------------------------------------
# Fused whole-network kernel (BT images per grid step)
# ---------------------------------------------------------------------------
def _fused_net_kernel(x_ref, w1_ref, b1_ref, w2_ref, b2_ref,
                      fw1_ref, fb1_ref, fw2_ref, fb2_ref, o_ref, *, bt):
    f32 = jnp.float32
    BT = bt

    # Input block: [1, 4, 7*BT, IW1] bf16.  Plane q holds input rows with
    # (row % 4) == q, rows ordered (t, image) with the image index innermost.
    xq = [x_ref[0, q] for q in range(4)]                       # 4 x [7*BT, IW1]

    # ---- conv1 (row-Toeplitz matmul) + 2x2 maxpool + ReLU -------------------
    # LHS rows ordered (dy, pooled-row parity, pooled-row//2, image): every
    # slice below is a contiguous block at a multiple-of-BT sublane offset.
    groups = []
    for dy in range(2):                 # row offset inside the 2x2 pool window
        for pp in range(2):             # parity of the pooled output row
            parts = []
            for kh in range(5):
                s = 2 * pp + dy + kh                            # 0..7
                parts.append(xq[s % 4][(s // 4) * BT:(s // 4 + 6) * BT, :])
            groups.append(jnp.concatenate(parts, axis=1))       # [6*BT, K1]
    lhs1 = jnp.concatenate(groups, axis=0)                      # [24*BT, K1]
    y1 = jnp.dot(lhs1, w1_ref[...], preferred_element_type=f32)  # [24*BT, 2*L1]
    y1 = jnp.maximum(y1[:, :L1], y1[:, L1:])        # pool over column parity (dx)
    a1 = jnp.maximum(y1[:12 * BT, :], y1[12 * BT:, :])          # pool over dy
    a1 = jnp.maximum(a1 + b1_ref[...], 0.0)         # bias + ReLU, [12*BT, L1]
    a1 = a1.astype(jnp.bfloat16)
    # a1 row (pp*6 + u)*BT + b  ==  pooled conv1 row 2*u + pp of image b.

    # ---- conv2 + dropout2d(eval=identity) + 2x2 maxpool + ReLU --------------
    # LHS rows ordered (dy2, pooled conv2 row, image); each kh piece is ONE
    # contiguous [4*BT, L1] slice of a1 (lane offsets are multiples of 128).
    groups = []
    for dy in range(2):
        parts = []
        for kh in range(5):
            s = dy + kh                                         # 0..5
            r0 = ((s % 2) * 6 + s // 2) * BT
            parts.append(a1[r0:r0 + 4 * BT, :])                 # [4*BT, L1]
        groups.append(jnp.concatenate(parts, axis=1))           # [4*BT, K2]
    lhs2 = jnp.concatenate(groups, axis=0)                      # [8*BT, K2]
    y2 = jnp.dot(lhs2, w2_ref[...], preferred_element_type=f32)  # [8*BT, 2*L2]
    y2 = jnp.maximum(y2[:, :L2], y2[:, L2:])                    # pool over dx
    a2 = jnp.maximum(y2[:4 * BT, :], y2[4 * BT:, :])            # pool over dy
    a2 = jnp.maximum(a2 + b2_ref[...], 0.0)                     # [4*BT, L2]
    # a2 row h*BT + b  ==  pooled conv2 row h of image b.

    # ---- fc1 + ReLU + dropout(eval=identity) + fc2 --------------------------
    # Fold the 4 pooled conv2 rows into lanes (aligned 128-lane concat) and do
    # fc1 as ONE [BT, 512] x [512, 64] matmul; torch's NCHW flatten permutation
    # is baked into fw1's row layout at parameter-prep time.
    flat = jnp.concatenate([a2[h * BT:(h + 1) * BT, :] for h in range(4)],
                           axis=1)                              # [BT, 4*L2]
    hid = jnp.dot(flat.astype(jnp.bfloat16), fw1_ref[...],
                  preferred_element_type=f32)
    hid = jnp.maximum(hid + fb1_ref[...], 0.0)                  # [BT, H1P]
    out = jnp.dot(hid.astype(jnp.bfloat16), fw2_ref[...],
                  preferred_element_type=f32)                   # [BT, OP]
    o_ref[...] = out + fb2_ref[...]         # one lane-dense row per image


# ---------------------------------------------------------------------------
# One-time parameter re-layout (pure layout plumbing, done at load time)
# ---------------------------------------------------------------------------
def prepare_params(params):
    w1, b1, w2, b2, fw1, fb1, fw2, fb2 = [np.asarray(p, np.float32) for p in params]

    # conv1 Toeplitz: W1m[kh*IW1 + iw, dx*L1 + pw*C1P + c] = w1[c,0,kh,kw],
    # iw = 2*pw + dx + kw   (pooled columns pw >= 12 are zero-padding).
    w1m = np.zeros((K1, 2 * L1), np.float32)
    for kh in range(5):
        for kw in range(5):
            for dx in range(2):
                for pw in range(12):
                    iw = 2 * pw + dx + kw
                    col = dx * L1 + pw * C1P
                    w1m[kh * IW1 + iw, col:col + C1] = w1[:, 0, kh, kw]
    b1row = np.zeros((1, L1), np.float32)
    for pw in range(PW1P):
        b1row[0, pw * C1P:pw * C1P + C1] = b1

    # conv2 Toeplitz: W2m[kh*L1 + pw1*C1P + ci, dx*L2 + pw*C2P + co] = w2[co,ci,kh,kw],
    # pw1 = 2*pw + dx + kw.
    w2m = np.zeros((K2, 2 * L2), np.float32)
    for kh in range(5):
        for kw in range(5):
            for dx in range(2):
                for pw in range(PW2):
                    pw1 = 2 * pw + dx + kw
                    row0 = kh * L1 + pw1 * C1P
                    col0 = dx * L2 + pw * C2P
                    w2m[row0:row0 + C1, col0:col0 + C2] = w2[:, :, kh, kw].T
    b2row = np.zeros((1, L2), np.float32)
    for pw in range(PW2):
        b2row[0, pw * C2P:pw * C2P + C2] = b2

    # fc1 as one [4*L2, H1P] matrix; rows permuted from torch's NCHW flatten
    # order (c2*16 + h*4 + w) to our lane order (h*L2 + w*C2P + c2).
    fw1p = np.zeros((4 * L2, H1P), np.float32)
    for h in range(4):
        for w in range(4):
            for c in range(C2):
                fw1p[h * L2 + w * C2P + c, :H1] = fw1[c * 16 + h * 4 + w, :]
    fb1row = np.zeros((1, H1P), np.float32)
    fb1row[0, :H1] = fb1
    fw2p = np.zeros((H1P, OP), np.float32)
    fw2p[:H1, :NCLS] = fw2
    fb2row = np.zeros((1, OP), np.float32)
    fb2row[0, :NCLS] = fb2

    bf = jnp.bfloat16
    return (jnp.asarray(w1m, bf), jnp.asarray(b1row), jnp.asarray(w2m, bf),
            jnp.asarray(b2row), jnp.asarray(fw1p, bf), jnp.asarray(fb1row),
            jnp.asarray(fw2p, bf), jnp.asarray(fb2row))


# ---------------------------------------------------------------------------
# Forward pass: one fused pallas_call, batch-tiled grid
# ---------------------------------------------------------------------------
@jax.jit
def net_forward(x_nchw, prep):
    w1m, b1row, w2m, b2row, fw1p, fb1row, fw2p, fb2row = prep
    n = x_nchw.shape[0]
    # Images per grid step (multiple of 16 so bf16 row blocks stay tile-aligned).
    # Larger BT (up to 128, with vmem_limit raised) amortises step overhead more
    # and keeps grid length >= 2 on v7x for realistic batch sizes.
    bt = 64 if n >= 64 else (32 if n >= 32 else 16)
    npad = pl.cdiv(n, bt) * bt
    g = npad // bt

    # Host-side prep (single fused XLA copy -- the bf16 cast materialises once
    # anyway): pad batch & width, split rows by (row % 4), image index innermost.
    xw = jnp.pad(x_nchw[:, 0].astype(jnp.bfloat16),
                 ((0, npad - n), (0, 0), (0, IW1 - 28)))        # [npad, 28, IW1]
    xw = xw.reshape(g, bt, 7, 4, IW1).transpose(0, 3, 2, 1, 4)  # [g, 4, 7, bt, IW1]
    xw = xw.reshape(g, 4, 7 * bt, IW1)

    kernel = functools.partial(_fused_net_kernel, bt=bt)
    out = pl.pallas_call(
        kernel,
        out_shape=jax.ShapeDtypeStruct((npad, OP), jnp.float32),
        grid=(g,),
        in_specs=[
            pl.BlockSpec((1, 4, 7 * bt, IW1), lambda i: (i, 0, 0, 0)),
            pl.BlockSpec(w1m.shape, lambda i: (0, 0)),     # resident weights
            pl.BlockSpec(b1row.shape, lambda i: (0, 0)),
            pl.BlockSpec(w2m.shape, lambda i: (0, 0)),
            pl.BlockSpec(b2row.shape, lambda i: (0, 0)),
            pl.BlockSpec(fw1p.shape, lambda i: (0, 0)),
            pl.BlockSpec(fb1row.shape, lambda i: (0, 0)),
            pl.BlockSpec(fw2p.shape, lambda i: (0, 0)),
            pl.BlockSpec(fb2row.shape, lambda i: (0, 0)),
        ],
        out_specs=pl.BlockSpec((bt, OP), lambda i: (i, 0)),
        compiler_params=pltpu.CompilerParams(
            dimension_semantics=("parallel",),
            vmem_limit_bytes=32 * 1024 * 1024,
        ),
    )(xw, w1m, b1row, w2m, b2row, fw1p, fb1row, fw2p, fb2row)
    return out[:n, :NCLS]


# ---------------------------------------------------------------------------
# Pure-JAX reference (independent formulation) for a correctness check
# ---------------------------------------------------------------------------
def net_reference(x_nchw, params):
    w1, b1, w2, b2, fw1, fb1, fw2, fb2 = params
    dn = ('NCHW', 'OIHW', 'NCHW')
    c1 = jax.lax.conv_general_dilated(x_nchw, w1, (1, 1), 'VALID',
                                      dimension_numbers=dn) + b1[None, :, None, None]
    p1 = jax.lax.reduce_window(c1, -jnp.inf, jax.lax.max,
                               (1, 1, 2, 2), (1, 1, 2, 2), 'VALID')
    a1 = jnp.maximum(p1, 0.0)
    c2 = jax.lax.conv_general_dilated(a1, w2, (1, 1), 'VALID',
                                      dimension_numbers=dn) + b2[None, :, None, None]
    p2 = jax.lax.reduce_window(c2, -jnp.inf, jax.lax.max,
                               (1, 1, 2, 2), (1, 1, 2, 2), 'VALID')
    a2 = jnp.maximum(p2, 0.0)
    flat = a2.reshape(a2.shape[0], -1)
    h = jnp.maximum(flat @ fw1 + fb1, 0.0)
    return h @ fw2 + fb2


# ---------------------------------------------------------------------------
if __name__ == "__main__":
    key = jax.random.PRNGKey(0)
    ks = jax.random.split(key, 9)

    # deterministic synthetic parameters (shapes from Net.__init__)
    w1 = jax.random.normal(ks[0], (10, 1, 5, 5), jnp.float32) * 0.2    # conv1 OIHW
    b1 = jax.random.normal(ks[1], (10,), jnp.float32) * 0.1
    w2 = jax.random.normal(ks[2], (20, 10, 5, 5), jnp.float32) * 0.05  # conv2 OIHW
    b2 = jax.random.normal(ks[3], (20,), jnp.float32) * 0.1
    fw1 = jax.random.normal(ks[4], (320, 50), jnp.float32) * 0.05      # fc1 (in, out)
    fb1 = jax.random.normal(ks[5], (50,), jnp.float32) * 0.1
    fw2 = jax.random.normal(ks[6], (50, 10), jnp.float32) * 0.1        # fc2 (in, out)
    fb2 = jax.random.normal(ks[7], (10,), jnp.float32) * 0.1
    params = (w1, b1, w2, b2, fw1, fb1, fw2, fb2)

    # input: batch=2, 1x28x28 (forward's view(-1, 320) implies 28x28 input)
    x = jax.random.normal(ks[8], (2, 1, 28, 28), jnp.float32)

    prep = prepare_params(params)                  # one-time parameter re-layout
    out = jax.block_until_ready(net_forward(x, prep))
    ref = jax.block_until_ready(net_reference(x, params))

    assert out.shape == (2, 10)
    # bf16 weights/activations (f32 accumulation): allow a few % of slack.
    err = float(jnp.max(jnp.abs(out - ref)))
    assert err < 8e-2, f"max abs err {err}: {out} vs {ref}"

    print("KERNEL_OK")
</pallas_src>

<mosaic_0001>
module attributes {stable_mosaic.version = 11 : i64} {
  func.func @_fused_net_kernel(%arg0: i32, %arg1: memref<1x4x112x32xbf16, #tpu.memory_space<vmem>>, %arg2: memref<160x512xbf16, #tpu.memory_space<vmem>>, %arg3: memref<1x256xf32, #tpu.memory_space<vmem>>, %arg4: memref<1280x256xbf16, #tpu.memory_space<vmem>>, %arg5: memref<1x128xf32, #tpu.memory_space<vmem>>, %arg6: memref<512x64xbf16, #tpu.memory_space<vmem>>, %arg7: memref<1x64xf32, #tpu.memory_space<vmem>>, %arg8: memref<64x128xbf16, #tpu.memory_space<vmem>>, %arg9: memref<1x128xf32, #tpu.memory_space<vmem>>, %arg10: memref<16x128xf32, #tpu.memory_space<vmem>>) attributes {dimension_semantics = [#tpu.dimension_semantics<parallel>], iteration_bounds = array<i64: 1>, scalar_prefetch = 0 : i64, scratch_operands = 0 : i64, tpu.core_type = #tpu.core_type<tc>, window_params = [{transform_indices = @transform_0, window_bounds = array<i64: 1, 4, 112, 32>}, {pipeline_mode = #tpu.pipeline_mode<synchronous>, transform_indices = @transform_1, window_bounds = array<i64: 160, 512>}, {pipeline_mode = #tpu.pipeline_mode<synchronous>, transform_indices = @transform_2, window_bounds = array<i64: 1, 256>}, {pipeline_mode = #tpu.pipeline_mode<synchronous>, transform_indices = @transform_3, window_bounds = array<i64: 1280, 256>}, {pipeline_mode = #tpu.pipeline_mode<synchronous>, transform_indices = @transform_4, window_bounds = array<i64: 1, 128>}, {pipeline_mode = #tpu.pipeline_mode<synchronous>, transform_indices = @transform_5, window_bounds = array<i64: 512, 64>}, {pipeline_mode = #tpu.pipeline_mode<synchronous>, transform_indices = @transform_6, window_bounds = array<i64: 1, 64>}, {pipeline_mode = #tpu.pipeline_mode<synchronous>, transform_indices = @transform_7, window_bounds = array<i64: 64, 128>}, {pipeline_mode = #tpu.pipeline_mode<synchronous>, transform_indices = @transform_8, window_bounds = array<i64: 1, 128>}, {transform_indices = @transform_9, window_bounds = array<i64: 16, 128>}]} {
    %c0 = arith.constant 0 : index
    %c0_0 = arith.constant 0 : index
    %c0_1 = arith.constant 0 : index
    %c0_2 = arith.constant 0 : index
    %0 = vector.load %arg1[%c0, %c0_0, %c0_1, %c0_2] : memref<1x4x112x32xbf16, #tpu.memory_space<vmem>>, vector<1x1x112x32xbf16>
    %1 = vector.shape_cast %0 : vector<1x1x112x32xbf16> to vector<112x32xbf16>
    %c0_3 = arith.constant 0 : index
    %c1 = arith.constant 1 : index
    %c0_4 = arith.constant 0 : index
    %c0_5 = arith.constant 0 : index
    %2 = vector.load %arg1[%c0_3, %c1, %c0_4, %c0_5] : memref<1x4x112x32xbf16, #tpu.memory_space<vmem>>, vector<1x1x112x32xbf16>
    %3 = vector.shape_cast %2 : vector<1x1x112x32xbf16> to vector<112x32xbf16>
    %c0_6 = arith.constant 0 : index
    %c2 = arith.constant 2 : index
    %c0_7 = arith.constant 0 : index
    %c0_8 = arith.constant 0 : index
    %4 = vector.load %arg1[%c0_6, %c2, %c0_7, %c0_8] : memref<1x4x112x32xbf16, #tpu.memory_space<vmem>>, vector<1x1x112x32xbf16>
    %5 = vector.shape_cast %4 : vector<1x1x112x32xbf16> to vector<112x32xbf16>
    %c0_9 = arith.constant 0 : index
    %c3 = arith.constant 3 : index
    %c0_10 = arith.constant 0 : index
    %c0_11 = arith.constant 0 : index
    %6 = vector.load %arg1[%c0_9, %c3, %c0_10, %c0_11] : memref<1x4x112x32xbf16, #tpu.memory_space<vmem>>, vector<1x1x112x32xbf16>
    %7 = vector.shape_cast %6 : vector<1x1x112x32xbf16> to vector<112x32xbf16>
    %8 = vector.extract_strided_slice %1 {offsets = [0, 0], sizes = [96, 32], strides = [1, 1]} : vector<112x32xbf16> to vector<96x32xbf16>
    %9 = vector.extract_strided_slice %3 {offsets = [0, 0], sizes = [96, 32], strides = [1, 1]} : vector<112x32xbf16> to vector<96x32xbf16>
    %10 = vector.extract_strided_slice %5 {offsets = [0, 0], sizes = [96, 32], strides = [1, 1]} : vector<112x32xbf16> to vector<96x32xbf16>
    %11 = vector.extract_strided_slice %7 {offsets = [0, 0], sizes = [96, 32], strides = [1, 1]} : vector<112x32xbf16> to vector<96x32xbf16>
    %12 = vector.extract_strided_slice %1 {offsets = [16, 0], sizes = [96, 32], strides = [1, 1]} : vector<112x32xbf16> to vector<96x32xbf16>
    %13 = tpu.concatenate %8, %9, %10, %11, %12 in 1 : vector<96x32xbf16>, vector<96x32xbf16>, vector<96x32xbf16>, vector<96x32xbf16>, vector<96x32xbf16> -> vector<96x160xbf16>
    %14 = vector.extract_strided_slice %5 {offsets = [0, 0], sizes = [96, 32], strides = [1, 1]} : vector<112x32xbf16> to vector<96x32xbf16>
    %15 = vector.extract_strided_slice %7 {offsets = [0, 0], sizes = [96, 32], strides = [1, 1]} : vector<112x32xbf16> to vector<96x32xbf16>
    %16 = vector.extract_strided_slice %1 {offsets = [16, 0], sizes = [96, 32], strides = [1, 1]} : vector<112x32xbf16> to vector<96x32xbf16>
    %17 = vector.extract_strided_slice %3 {offsets = [16, 0], sizes = [96, 32], strides = [1, 1]} : vector<112x32xbf16> to vector<96x32xbf16>
    %18 = vector.extract_strided_slice %5 {offsets = [16, 0], sizes = [96, 32], strides = [1, 1]} : vector<112x32xbf16> to vector<96x32xbf16>
    %19 = tpu.concatenate %14, %15, %16, %17, %18 in 1 : vector<96x32xbf16>, vector<96x32xbf16>, vector<96x32xbf16>, vector<96x32xbf16>, vector<96x32xbf16> -> vector<96x160xbf16>
    %20 = vector.extract_strided_slice %3 {offsets = [0, 0], sizes = [96, 32], strides = [1, 1]} : vector<112x32xbf16> to vector<96x32xbf16>
    %21 = vector.extract_strided_slice %5 {offsets = [0, 0], sizes = [96, 32], strides = [1, 1]} : vector<112x32xbf16> to vector<96x32xbf16>
    %22 = vector.extract_strided_slice %7 {offsets = [0, 0], sizes = [96, 32], strides = [1, 1]} : vector<112x32xbf16> to vector<96x32xbf16>
    %23 = vector.extract_strided_slice %1 {offsets = [16, 0], sizes = [96, 32], strides = [1, 1]} : vector<112x32xbf16> to vector<96x32xbf16>
    %24 = vector.extract_strided_slice %3 {offsets = [16, 0], sizes = [96, 32], strides = [1, 1]} : vector<112x32xbf16> to vector<96x32xbf16>
    %25 = tpu.concatenate %20, %21, %22, %23, %24 in 1 : vector<96x32xbf16>, vector<96x32xbf16>, vector<96x32xbf16>, vector<96x32xbf16>, vector<96x32xbf16> -> vector<96x160xbf16>
    %26 = vector.extract_strided_slice %7 {offsets = [0, 0], sizes = [96, 32], strides = [1, 1]} : vector<112x32xbf16> to vector<96x32xbf16>
    %27 = vector.extract_strided_slice %1 {offsets = [16, 0], sizes = [96, 32], strides = [1, 1]} : vector<112x32xbf16> to vector<96x32xbf16>
    %28 = vector.extract_strided_slice %3 {offsets = [16, 0], sizes = [96, 32], strides = [1, 1]} : vector<112x32xbf16> to vector<96x32xbf16>
    %29 = vector.extract_strided_slice %5 {offsets = [16, 0], sizes = [96, 32], strides = [1, 1]} : vector<112x32xbf16> to vector<96x32xbf16>
    %30 = vector.extract_strided_slice %7 {offsets = [16, 0], sizes = [96, 32], strides = [1, 1]} : vector<112x32xbf16> to vector<96x32xbf16>
    %31 = tpu.concatenate %26, %27, %28, %29, %30 in 1 : vector<96x32xbf16>, vector<96x32xbf16>, vector<96x32xbf16>, vector<96x32xbf16>, vector<96x32xbf16> -> vector<96x160xbf16>
    %32 = tpu.concatenate %13, %19, %25, %31 in 0 : vector<96x160xbf16>, vector<96x160xbf16>, vector<96x160xbf16>, vector<96x160xbf16> -> vector<384x160xbf16>
    %c0_12 = arith.constant 0 : index
    %c0_13 = arith.constant 0 : index
    %33 = vector.load %arg2[%c0_12, %c0_13] : memref<160x512xbf16, #tpu.memory_space<vmem>>, vector<160x512xbf16>
    %cst = arith.constant dense<0.000000e+00> : vector<384x512xf32>
    %34 = tpu.matmul %32, %33, %cst {dimension_numbers = #tpu.dot_dimension_numbers<[1], [0], [0], [1], [0, 0, 1, 1], [], []>} : vector<384x160xbf16>, vector<160x512xbf16>, vector<384x512xf32> -> vector<384x512xf32>
    %35 = vector.extract_strided_slice %34 {offsets = [0, 0], sizes = [384, 256], strides = [1, 1]} : vector<384x512xf32> to vector<384x256xf32>
    %36 = vector.extract_strided_slice %34 {offsets = [0, 256], sizes = [384, 256], strides = [1, 1]} : vector<384x512xf32> to vector<384x256xf32>
    %37 = arith.maximumf %35, %36 : vector<384x256xf32>
    %38 = vector.extract_strided_slice %37 {offsets = [0, 0], sizes = [192, 256], strides = [1, 1]} : vector<384x256xf32> to vector<192x256xf32>
    %39 = vector.extract_strided_slice %37 {offsets = [192, 0], sizes = [192, 256], strides = [1, 1]} : vector<384x256xf32> to vector<192x256xf32>
    %40 = arith.maximumf %38, %39 : vector<192x256xf32>
    %c0_14 = arith.constant 0 : index
    %c0_15 = arith.constant 0 : index
    %41 = vector.load %arg3[%c0_14, %c0_15] : memref<1x256xf32, #tpu.memory_space<vmem>>, vector<1x256xf32>
    %42 = vector.broadcast %41 : vector<1x256xf32> to vector<192x256xf32>
    %43 = arith.addf %40, %42 : vector<192x256xf32>
    %cst_16 = arith.constant 0.000000e+00 : f32
    %44 = vector.broadcast %cst_16 : f32 to vector<192x256xf32>
    %45 = arith.maximumf %43, %44 : vector<192x256xf32>
    %46 = arith.truncf %45 : vector<192x256xf32> to vector<192x256xbf16>
    %47 = vector.extract_strided_slice %46 {offsets = [0, 0], sizes = [64, 256], strides = [1, 1]} : vector<192x256xbf16> to vector<64x256xbf16>
    %48 = vector.extract_strided_slice %46 {offsets = [96, 0], sizes = [64, 256], strides = [1, 1]} : vector<192x256xbf16> to vector<64x256xbf16>
    %49 = vector.extract_strided_slice %46 {offsets = [16, 0], sizes = [64, 256], strides = [1, 1]} : vector<192x256xbf16> to vector<64x256xbf16>
    %50 = vector.extract_strided_slice %46 {offsets = [112, 0], sizes = [64, 256], strides = [1, 1]} : vector<192x256xbf16> to vector<64x256xbf16>
    %51 = vector.extract_strided_slice %46 {offsets = [32, 0], sizes = [64, 256], strides = [1, 1]} : vector<192x256xbf16> to vector<64x256xbf16>
    %52 = tpu.concatenate %47, %48, %49, %50, %51 in 1 : vector<64x256xbf16>, vector<64x256xbf16>, vector<64x256xbf16>, vector<64x256xbf16>, vector<64x256xbf16> -> vector<64x1280xbf16>
    %53 = vector.extract_strided_slice %46 {offsets = [96, 0], sizes = [64, 256], strides = [1, 1]} : vector<192x256xbf16> to vector<64x256xbf16>
    %54 = vector.extract_strided_slice %46 {offsets = [16, 0], sizes = [64, 256], strides = [1, 1]} : vector<192x256xbf16> to vector<64x256xbf16>
    %55 = vector.extract_strided_slice %46 {offsets = [112, 0], sizes = [64, 256], strides = [1, 1]} : vector<192x256xbf16> to vector<64x256xbf16>
    %56 = vector.extract_strided_slice %46 {offsets = [32, 0], sizes = [64, 256], strides = [1, 1]} : vector<192x256xbf16> to vector<64x256xbf16>
    %57 = vector.extract_strided_slice %46 {offsets = [128, 0], sizes = [64, 256], strides = [1, 1]} : vector<192x256xbf16> to vector<64x256xbf16>
    %58 = tpu.concatenate %53, %54, %55, %56, %57 in 1 : vector<64x256xbf16>, vector<64x256xbf16>, vector<64x256xbf16>, vector<64x256xbf16>, vector<64x256xbf16> -> vector<64x1280xbf16>
    %59 = tpu.concatenate %52, %58 in 0 : vector<64x1280xbf16>, vector<64x1280xbf16> -> vector<128x1280xbf16>
    %c0_17 = arith.constant 0 : index
    %c0_18 = arith.constant 0 : index
    %60 = vector.load %arg4[%c0_17, %c0_18] : memref<1280x256xbf16, #tpu.memory_space<vmem>>, vector<1280x256xbf16>
    %cst_19 = arith.constant dense<0.000000e+00> : vector<128x256xf32>
    %61 = tpu.matmul %59, %60, %cst_19 {dimension_numbers = #tpu.dot_dimension_numbers<[1], [0], [0], [1], [0, 0, 1, 1], [], []>} : vector<128x1280xbf16>, vector<1280x256xbf16>, vector<128x256xf32> -> vector<128x256xf32>
    %62 = vector.extract_strided_slice %61 {offsets = [0, 0], sizes = [128, 128], strides = [1, 1]} : vector<128x256xf32> to vector<128x128xf32>
    %63 = vector.extract_strided_slice %61 {offsets = [0, 128], sizes = [128, 128], strides = [1, 1]} : vector<128x256xf32> to vector<128x128xf32>
    %64 = arith.maximumf %62, %63 : vector<128x128xf32>
    %65 = vector.extract_strided_slice %64 {offsets = [0, 0], sizes = [64, 128], strides = [1, 1]} : vector<128x128xf32> to vector<64x128xf32>
    %66 = vector.extract_strided_slice %64 {offsets = [64, 0], sizes = [64, 128], strides = [1, 1]} : vector<128x128xf32> to vector<64x128xf32>
    %67 = arith.maximumf %65, %66 : vector<64x128xf32>
    %c0_20 = arith.constant 0 : index
    %c0_21 = arith.constant 0 : index
    %68 = vector.load %arg5[%c0_20, %c0_21] : memref<1x128xf32, #tpu.memory_space<vmem>>, vector<1x128xf32>
    %69 = vector.broadcast %68 : vector<1x128xf32> to vector<64x128xf32>
    %70 = arith.addf %67, %69 : vector<64x128xf32>
    %cst_22 = arith.constant 0.000000e+00 : f32
    %71 = vector.broadcast %cst_22 : f32 to vector<64x128xf32>
    %72 = arith.maximumf %70, %71 : vector<64x128xf32>
    %73 = vector.extract_strided_slice %72 {offsets = [0, 0], sizes = [16, 128], strides = [1, 1]} : vector<64x128xf32> to vector<16x128xf32>
    %74 = vector.extract_strided_slice %72 {offsets = [16, 0], sizes = [16, 128], strides = [1, 1]} : vector<64x128xf32> to vector<16x128xf32>
    %75 = vector.extract_strided_slice %72 {offsets = [32, 0], sizes = [16, 128], strides = [1, 1]} : vector<64x128xf32> to vector<16x128xf32>
    %76 = vector.extract_strided_slice %72 {offsets = [48, 0], sizes = [16, 128], strides = [1, 1]} : vector<64x128xf32> to vector<16x128xf32>
    %77 = tpu.concatenate %73, %74, %75, %76 in 1 : vector<16x128xf32>, vector<16x128xf32>, vector<16x128xf32>, vector<16x128xf32> -> vector<16x512xf32>
    %78 = arith.truncf %77 : vector<16x512xf32> to vector<16x512xbf16>
    %c0_23 = arith.constant 0 : index
    %c0_24 = arith.constant 0 : index
    %79 = vector.load %arg6[%c0_23, %c0_24] : memref<512x64xbf16, #tpu.memory_space<vmem>>, vector<512x64xbf16>
    %cst_25 = arith.constant dense<0.000000e+00> : vector<16x64xf32>
    %80 = tpu.matmul %78, %79, %cst_25 {dimension_numbers = #tpu.dot_dimension_numbers<[1], [0], [0], [1], [0, 0, 1, 1], [], []>} : vector<16x512xbf16>, vector<512x64xbf16>, vector<16x64xf32> -> vector<16x64xf32>
    %c0_26 = arith.constant 0 : index
    %c0_27 = arith.constant 0 : index
    %81 = vector.load %arg7[%c0_26, %c0_27] : memref<1x64xf32, #tpu.memory_space<vmem>>, vector<1x64xf32>
    %82 = vector.broadcast %81 : vector<1x64xf32> to vector<16x64xf32>
    %83 = arith.addf %80, %82 : vector<16x64xf32>
    %cst_28 = arith.constant 0.000000e+00 : f32
    %84 = vector.broadcast %cst_28 : f32 to vector<16x64xf32>
    %85 = arith.maximumf %83, %84 : vector<16x64xf32>
    %86 = arith.truncf %85 : vector<16x64xf32> to vector<16x64xbf16>
    %c0_29 = arith.constant 0 : index
    %c0_30 = arith.constant 0 : index
    %87 = vector.load %arg8[%c0_29, %c0_30] : memref<64x128xbf16, #tpu.memory_space<vmem>>, vector<64x128xbf16>
    %cst_31 = arith.constant dense<0.000000e+00> : vector<16x128xf32>
    %88 = tpu.matmul %86, %87, %cst_31 {dimension_numbers = #tpu.dot_dimension_numbers<[1], [0], [0], [1], [0, 0, 1, 1], [], []>} : vector<16x64xbf16>, vector<64x128xbf16>, vector<16x128xf32> -> vector<16x128xf32>
    %c0_32 = arith.constant 0 : index
    %c0_33 = arith.constant 0 : index
    %89 = vector.load %arg9[%c0_32, %c0_33] : memref<1x128xf32, #tpu.memory_space<vmem>>, vector<1x128xf32>
    %90 = vector.broadcast %89 : vector<1x128xf32> to vector<16x128xf32>
    %91 = arith.addf %88, %90 : vector<16x128xf32>
    %c0_34 = arith.constant 0 : index
    %c0_35 = arith.constant 0 : index
    %92 = vector.load %arg10[%c0_34, %c0_35] : memref<16x128xf32, #tpu.memory_space<vmem>>, vector<16x128xf32>
    tpu.vector_store %arg10[%c0_34, %c0_35], %91 {strides = array<i32>} : memref<16x128xf32, #tpu.memory_space<vmem>>, vector<16x128xf32>,
    return
  }
  func.func @transform_0(%arg0: i32) -> (i32, i32, i32, i32) {
    %c0_i32 = arith.constant 0 : i32
    %c0_i32_0 = arith.constant 0 : i32
    %c0_i32_1 = arith.constant 0 : i32
    %c0_i32_2 = arith.constant 0 : i32
    return %arg0, %c0_i32, %c0_i32_0, %c0_i32_1 : i32, i32, i32, i32
  }
  func.func @transform_1(%arg0: i32) -> (i32, i32) {
    %c0_i32 = arith.constant 0 : i32
    %c0_i32_0 = arith.constant 0 : i32
    %c0_i32_1 = arith.constant 0 : i32
    return %c0_i32, %c0_i32_0 : i32, i32
  }
  func.func @transform_2(%arg0: i32) -> (i32, i32) {
    %c0_i32 = arith.constant 0 : i32
    %c0_i32_0 = arith.constant 0 : i32
    %c0_i32_1 = arith.constant 0 : i32
    return %c0_i32, %c0_i32_0 : i32, i32
  }
  func.func @transform_3(%arg0: i32) -> (i32, i32) {
    %c0_i32 = arith.constant 0 : i32
    %c0_i32_0 = arith.constant 0 : i32
    %c0_i32_1 = arith.constant 0 : i32
    return %c0_i32, %c0_i32_0 : i32, i32
  }
  func.func @transform_4(%arg0: i32) -> (i32, i32) {
    %c0_i32 = arith.constant 0 : i32
    %c0_i32_0 = arith.constant 0 : i32
    %c0_i32_1 = arith.constant 0 : i32
    return %c0_i32, %c0_i32_0 : i32, i32
  }
  func.func @transform_5(%arg0: i32) -> (i32, i32) {
    %c0_i32 = arith.constant 0 : i32
    %c0_i32_0 = arith.constant 0 : i32
    %c0_i32_1 = arith.constant 0 : i32
    return %c0_i32, %c0_i32_0 : i32, i32
  }
  func.func @transform_6(%arg0: i32) -> (i32, i32) {
    %c0_i32 = arith.constant 0 : i32
    %c0_i32_0 = arith.constant 0 : i32
    %c0_i32_1 = arith.constant 0 : i32
    return %c0_i32, %c0_i32_0 : i32, i32
  }
  func.func @transform_7(%arg0: i32) -> (i32, i32) {
    %c0_i32 = arith.constant 0 : i32
    %c0_i32_0 = arith.constant 0 : i32
    %c0_i32_1 = arith.constant 0 : i32
    return %c0_i32, %c0_i32_0 : i32, i32
  }
  func.func @transform_8(%arg0: i32) -> (i32, i32) {
    %c0_i32 = arith.constant 0 : i32
    %c0_i32_0 = arith.constant 0 : i32
    %c0_i32_1 = arith.constant 0 : i32
    return %c0_i32, %c0_i32_0 : i32, i32
  }
  func.func @transform_9(%arg0: i32) -> (i32, i32) {
    %c0_i32 = arith.constant 0 : i32
    %c0_i32_0 = arith.constant 0 : i32
    return %arg0, %c0_i32 : i32, i32
  }
}

</mosaic_0001>

<bundles_post_ra>
// kernel: net_forward.1
= control target key start
LH: loop header
LB: loop body
LE: loop exit
PB: predicated region body
PF: predicated region fallthrough
CT: control target
= control target key end

     0   :  { %14 = vsyncpa [#allocation3], 0  ;;  %s6781_s0 = inlined_call_operand.vmem [shape: bf16[1,4,112,32], index: 0, kind: input, shape index: {}]   ;;  %s6782_s1 = inlined_call_operand.hbm [shape: bf16[160,512], index: 1, kind: input, shape index: {}]   ;;  %s6783_s2 = inlined_call_operand.vmem [shape: f32[1,256], index: 2, kind: input, shape index: {}]   ;;  %s6784_s3 = inlined_call_operand.vmem [shape: bf16[1280,256], index: 3, kind: input, shape index: {}]   ;;  %s6785_s4 = inlined_call_operand.vmem [shape: f32[1,128], index: 4, kind: input, shape index: {}]   ;;  %s6786_s5 = inlined_call_operand.vmem [shape: bf16[512,64], index: 5, kind: input, shape index: {}]   ;;  %s6787_s6 = inlined_call_operand.vmem [shape: f32[1,64], index: 6, kind: input, shape index: {}]   ;;  %s6788_s7 = inlined_call_operand.hbm [shape: bf16[64,128], index: 7, kind: input, shape index: {}]   ;;  %s6789_s8 = inlined_call_operand.vmem [shape: f32[1,128], index: 8, kind: input, shape index: {}]   ;;  %s6790_s9 = inlined_call_operand.vmem [shape: f32[16,128], index: 9, kind: output, shape index: {}]  }
   0x1   :  { %15 = vsyncpa [#allocation5], 0  ;;  %s4740_s30 = smov [#allocation2]   ;;  %s4692_s13 = scalar_lea.hbm %s6782_s1, 5120 }
   0x2   :  { %s23_s10 = sshll.u32 %s4740_s30, 4  ;;  %p4693_p0 = scmp.ne.s32.totalorder %s6782_s1, %s4692_s13  ;;  %s24_s10 = int_to_ptr.vmem [resolvable:$true] %s23_s10 }
   0x3   :  { %p4696_p1 = scmp.lt.u32.totalorder %s4692_s13, %s6782_s1 }
   0x5   :  { %p4698_p2 = pnand %p4696_p1, %p4693_p0 }
   0x7   :  { %4701 = shalt.err (!%p4698_p2)
}
   0x8   :  { %s4702_s18 = scalar_lea.vmem %s24_s10, 5120  ;;  %p4707_p4 = scmp.lt.s32.totalorder %s24_s10, %s24_s10 }
   0x9   :  { %p4703_p3 = scmp.ne.s32.totalorder %s24_s10, %s4702_s18  ;;  %p4708_p5 = scmp.lt.s32.totalorder %s4702_s18, %s4702_s18 }
   0xb   :  { %p4709_p6 = por %p4708_p5, %p4707_p4 }
   0xd   :  { %p4710_p7 = pnand %p4709_p6, %p4703_p3 }
   0xf   :  { %4713 = shalt.err (!%p4710_p7)
}
  0x10   :  { %s4741_s19 = smov 256   ;;  %s4742_s20 = smov 16  }
  0x11   :  { %29 = dma.hbm_to_vmem [thread:$0]  %s6782_s1, 5120, %s24_s10, [#allocation3], %s4741_s19, %s4741_s19, %s4742_s20  }
  0x12   :  { %s4743_s23 = smov [#allocation4]   ;;  %s4714_s27 = scalar_lea.hbm %s6788_s7, 512 }
  0x13   :  { %s45_s24 = sshll.u32 %s4743_s23, 4  ;;  %p4715_p8 = scmp.ne.s32.totalorder %s6788_s7, %s4714_s27  ;;  %s46_s24 = int_to_ptr.vmem [resolvable:$true] %s45_s24 }
  0x14   :  { %p4718_p9 = scmp.lt.u32.totalorder %s4714_s27, %s6788_s7 }
  0x16   :  { %p4720_p10 = pnand %p4718_p9, %p4715_p8 }
  0x18   :  { %4723 = shalt.err (!%p4720_p10)
}
  0x19   :  { %s4724_s12 = scalar_lea.vmem %s46_s24, 512  ;;  %p4729_p12 = scmp.lt.s32.totalorder %s46_s24, %s46_s24 }
  0x1a   :  { %p4725_p11 = scmp.ne.s32.totalorder %s46_s24, %s4724_s12  ;;  %p4730_p13 = scmp.lt.s32.totalorder %s4724_s12, %s4724_s12 }
  0x1c   :  { %p4731_p0 = por %p4730_p13, %p4729_p12 }
  0x1e   :  { %p4732_p1 = pnand %p4731_p0, %p4725_p11 }
  0x20   :  { %4735 = shalt.err (!%p4732_p1)
}
  0x21   :  { %s4744_s1 = smov 64   ;;  %s4745_s10 = smov 4  }
  0x22   :  { %51 = dma.hbm_to_vmem [thread:$0]  %s6788_s7, 512, %s46_s24, [#allocation5], %s4744_s1, %s4744_s1, %s4745_s10  }
  0x23   :  { %4736 = dma.done.wait [#allocation3], 5120  }
  0x24   :  { %4737 = vsyncadd [#allocation3], 4294962176 }
  0x25   :  { %4738 = dma.done.wait [#allocation5], 512  }
  0x26   :  { %4739 = vsyncadd [#allocation5], 4294966784  ;;  %v4829_v0 = vld [vmem:[%s6781_s0 + $0xb8] sm:$0xff]   ;;  %v4834_v1 = vld [vmem:[%s6781_s0 + $0x50] sm:$0xff]   ;;  %s4746_s19 = smov 32   ;;  %s4747_s21 = smov 96  }
  0x27   :  { %336 = vrot.lane.b32.xlu0 %v4829_v0, %s4746_s19  ;;  %v4841_v2 = vld [vmem:[%s6781_s0 + $0x18] sm:$0xff]   ;;  %365 = vrot.lane.b32.xlu1 %v4834_v1, %s4747_s21  ;;  %v4848_v3 = vld [vmem:[%s6781_s0 + $0xc0] sm:$0xff]   ;;  %vm281_vm0 = vcmask 261120   ;;  %vm300_vm1 = vcmask 523264   ;;  %vm313_vm2 = vcmask 785408   ;;  %vm4749_vm3 = vmmov 0  }
  0x28   :  { %v4855_v4 = vld [vmem:[%s6781_s0 + $0x20] sm:$0xff]   ;;  %v4862_v5 = vld [vmem:[%s6781_s0 + $0x58] sm:$0xff]   ;;  %v4869_v6 = vld [vmem:[%s6781_s0 + $0xc8] sm:$0xff]  }
  0x29   :  { %v4876_v7 = vld [vmem:[%s6781_s0 + $0x28] sm:$0xff]   ;;  %v4881_v8 = vld [vmem:[%s6781_s0 + $0x60] sm:$0xff]   ;;  %v4895_v10 = vld [vmem:[%s6781_s0 + $0xd0] sm:$0xff]  }
  0x2a   :  { %v4888_v9 = vld [vmem:[%s6781_s0 + $0x8] sm:$0xff]   ;;  %v4902_v11 = vld [vmem:[%s6781_s0 + $0x30] sm:$0xff]   ;;  %v4941_v21 = vld [vmem:[%s6781_s0 + $0x78] sm:$0xff]  }
  0x2b   :  { %348 = vrot.lane.b32.xlu0 %v4841_v2, %s4744_s1  ;;  %338 = vrot.lane.b32.xlu1 %v4848_v3, %s4746_s19  ;;  %v4909_v12 = vld [vmem:[%s6781_s0 + $0x68] sm:$0xff]   ;;  %v4921_v14 = vld [vmem:[%s6781_s0 + $0x70] sm:$0xff]  }
  0x2c   :  { %3838 = vmatprep.mubr.msk.bf16.mxu0 %vm281_vm0, %v4888_v9  ;;  %v4916_v13 = vld [vmem:[%s6781_s0 + $0x88] sm:$0xff]   ;;  %v4327_v16 = vld [vmem:[#allocation2 + $0x4] ss:$16 sps:$4 sm:$0xff]   ;;  %v4329_v17 = vld [vmem:[#allocation2] ss:$16 sps:$4 sm:$0xff]  }
  0x2d   :  { %v4926_v15 = vld [vmem:[%s6781_s0 + $0xa8] sm:$0xff]   ;;  %3846 = vmatprep.mubr.msk.bf16.mxu1 %vm281_vm0, %v4916_v13  ;;  %4147 = vmatprep.subr.bf16.mxu1 %v4327_v16  ;;  %v4331_v18 = vld [vmem:[#allocation2 + $0x24] ss:$16 sps:$4 sm:$0xff]   ;;  %v4333_v19 = vld [vmem:[#allocation2 + $0x20] ss:$16 sps:$4 sm:$0xff]  }
  0x2e   :  { %891 = vmatprep.subr.bf16.mxu0 %v4327_v16  ;;  %4157 = vmatpush1.bf16.msra.mxu1 %v4329_v17  ;;  %v4334_v20 = vld [vmem:[#allocation2 + $0x44] ss:$16 sps:$4 sm:$0xff]   ;;  %v4336_v22 = vld [vmem:[#allocation2 + $0x40] ss:$16 sps:$4 sm:$0xff]   ;;  %v4990_v38 = vld [vmem:[%s6781_s0 + $0x98] sm:$0xff]  }
  0x2f   :  { %350 = vrot.lane.b32.xlu0 %v4855_v4, %s4744_s1  ;;  %367 = vrot.lane.b32.xlu1 %v4862_v5, %s4747_s21  ;;  %v4948_v23 = vld [vmem:[%s6781_s0 + $0xb0] sm:$0xff]   ;;  %v4962_v27 = vld [vmem:[%s6781_s0 + $0x80] sm:$0xff]   ;;  %v4361_v42 = vld [vmem:[#allocation2 + $0xc] ss:$16 sps:$4 sm:$0xff]  }
  0x30   :  { %892 = vmatpush1.bf16.msra.mxu0 %v4329_v17  ;;  %4148 = vmatprep.subr.bf16.mxu1 %v4331_v18  ;;  %v4338_v24 = vld [vmem:[#allocation2 + $0x64] ss:$16 sps:$4 sm:$0xff]   ;;  %v4340_v26 = vld [vmem:[#allocation2 + $0x60] ss:$16 sps:$4 sm:$0xff]   ;;  %v5012_v44 = vld [vmem:[%s6781_s0 + $0x48] sm:$0xff]  }
  0x31   :  { %893 = vmatprep.subr.bf16.mxu0 %v4331_v18  ;;  %v4955_v25 = vld [vmem:[%s6781_s0 + $0x10] sm:$0xff]   ;;  %v4999_v43 = vld [vmem:[%s6781_s0 + $0x40] sm:$0xff]   ;;  %v5050_v46 = vld [vmem:[%s6781_s0 + $0x38] sm:$0xff]  }
  0x32   :  { %4158 = vmatpush1.bf16.msra.mxu1 %v4333_v19  ;;  %v4341_v28 = vld [vmem:[#allocation2 + $0x84] ss:$16 sps:$4 sm:$0xff]   ;;  %v4343_v29 = vld [vmem:[#allocation2 + $0x80] ss:$16 sps:$4 sm:$0xff]   ;;  %v4359_v49 = vld [vmem:[#allocation2 + $0x8] ss:$16 sps:$4 sm:$0xff]  }
  0x33   :  { %340 = vrot.lane.b32.xlu0 %v4869_v6, %s4746_s19  ;;  %352 = vrot.lane.b32.xlu1 %v4876_v7, %s4744_s1  ;;  %v4344_v30 = vld [vmem:[#allocation2 + $0xa4] ss:$16 sps:$4 sm:$0xff]   ;;  %v4346_v31 = vld [vmem:[#allocation2 + $0xa0] ss:$16 sps:$4 sm:$0xff]   ;;  %v4366_v50 = vld [vmem:[#allocation2 + $0x2c] ss:$16 sps:$4 sm:$0xff]  }
  0x34   :  { %894 = vmatpush1.bf16.msra.mxu0 %v4333_v19  ;;  %4149 = vmatprep.subr.bf16.mxu1 %v4334_v20  ;;  %v4347_v32 = vld [vmem:[#allocation2 + $0xc4] ss:$16 sps:$4 sm:$0xff]   ;;  %v4349_v34 = vld [vmem:[#allocation2 + $0xc0] ss:$16 sps:$4 sm:$0xff]   ;;  %v4364_v56 = vld [vmem:[#allocation2 + $0x28] ss:$16 sps:$4 sm:$0xff]  }
  0x35   :  { %895 = vmatprep.subr.bf16.mxu0 %v4334_v20  ;;  %v4977_v33 = vld [vmem:[%s6781_s0 + $0x90] sm:$0xff]   ;;  %v5045_v45 = vld [vmem:[%s6781_s0 + $0xa0] sm:$0xff]   ;;  %v4369_v57 = vld [vmem:[#allocation2 + $0x4c] ss:$16 sps:$4 sm:$0xff]  }
  0x36   :  { %4159 = vmatpush1.bf16.msra.mxu1 %v4336_v22  ;;  %v4350_v35 = vld [vmem:[#allocation2 + $0xe4] ss:$16 sps:$4 sm:$0xff]   ;;  %v4352_v36 = vld [vmem:[#allocation2 + $0xe0] ss:$16 sps:$4 sm:$0xff]   ;;  %v4367_v61 = vld [vmem:[#allocation2 + $0x48] ss:$16 sps:$4 sm:$0xff]  }
  0x37   :  { %369 = vrot.lane.b32.xlu0 %v4881_v8, %s4747_s21  ;;  %342 = vrot.lane.b32.xlu1 %v4895_v10, %s4746_s19  ;;  %v4353_v37 = vld [vmem:[#allocation2 + $0x104] ss:$16 sps:$4 sm:$0xff]   ;;  %v4355_v39 = vld [vmem:[#allocation2 + $0x100] ss:$16 sps:$4 sm:$0xff]   ;;  %v4372_v63 = vld [vmem:[#allocation2 + $0x6c] ss:$16 sps:$4 sm:$0xff]  }
  0x38   :  { %896 = vmatpush1.bf16.msra.mxu0 %v4336_v22  ;;  %4150 = vmatprep.subr.bf16.mxu1 %v4338_v24  ;;  %v4356_v40 = vld [vmem:[#allocation2 + $0x124] ss:$16 sps:$4 sm:$0xff]   ;;  %v4358_v41 = vld [vmem:[#allocation2 + $0x120] ss:$16 sps:$4 sm:$0xff]   ;;  %v4376_v16 = vld [vmem:[#allocation2 + $0xa8] ss:$16 sps:$4 sm:$0xff]  }
  0x39   :  { %897 = vmatprep.subr.bf16.mxu0 %v4338_v24  ;;  %v4381_v18 = vld [vmem:[#allocation2 + $0xcc] ss:$16 sps:$4 sm:$0xff]  }
  0x3a   :  { %4160 = vmatpush1.bf16.msra.mxu1 %v4340_v26 }
  0x3b   :  { %354 = vrot.lane.b32.xlu0 %v4902_v11, %s4744_s1  ;;  %371 = vrot.lane.b32.xlu1 %v4909_v12, %s4747_s21 }
  0x3c   :  { %898 = vmatpush1.bf16.msra.mxu0 %v4340_v26  ;;  %4151 = vmatprep.subr.bf16.mxu1 %v4341_v28 }
  0x3d   :  { %899 = vmatprep.subr.bf16.mxu0 %v4341_v28 }
  0x3e   :  { %4161 = vmatpush1.bf16.msra.mxu1 %v4343_v29 }
  0x3f   :  { %426 = vrot.lane.b32.xlu0 %v4921_v14, %s4746_s19  ;;  %438 = vrot.lane.b32.xlu1 %v4926_v15, %s4744_s1 }
  0x40   :  { %900 = vmatpush1.bf16.msra.mxu0 %v4343_v29  ;;  %4152 = vmatprep.subr.bf16.mxu1 %v4344_v30  ;;  %v4387_v29 = vld [vmem:[#allocation2 + $0x10c] ss:$16 sps:$4 sm:$0xff]  }
  0x41   :  { %901 = vmatprep.subr.bf16.mxu0 %v4344_v30 }
  0x42   :  { %4162 = vmatpush1.bf16.msra.mxu1 %v4346_v31 }
  0x43   :  { %450 = vrot.lane.b32.xlu0 %v4888_v9, %s4747_s21  ;;  %428 = vrot.lane.b32.xlu1 %v4941_v21, %s4746_s19 }
  0x44   :  { %902 = vmatpush1.bf16.msra.mxu0 %v4346_v31  ;;  %4153 = vmatprep.subr.bf16.mxu1 %v4347_v32 }
  0x45   :  { %903 = vmatprep.subr.bf16.mxu0 %v4347_v32  ;;  %v4385_v32 = vld [vmem:[#allocation2 + $0x108] ss:$16 sps:$4 sm:$0xff]  }
  0x46   :  { %4163 = vmatpush1.bf16.msra.mxu1 %v4349_v34 }
  0x47   :  { %440 = vrot.lane.b32.xlu0 %v4948_v23, %s4744_s1  ;;  %452 = vrot.lane.b32.xlu1 %v4955_v25, %s4747_s21 }
  0x48   :  { %904 = vmatpush1.bf16.msra.mxu0 %v4349_v34  ;;  %4154 = vmatprep.subr.bf16.mxu1 %v4350_v35  ;;  %v4390_v34 = vld [vmem:[#allocation2 + $0x12c] ss:$16 sps:$4 sm:$0xff]  }
  0x49   :  { %905 = vmatprep.subr.bf16.mxu0 %v4350_v35 }
  0x4a   :  { %4164 = vmatpush1.bf16.msra.mxu1 %v4352_v36 }
  0x4b   :  { %430 = vrot.lane.b32.xlu0 %v4962_v27, %s4746_s19  ;;  %442 = vrot.lane.b32.xlu1 %v4829_v0, %s4744_s1 }
  0x4c   :  { %906 = vmatpush1.bf16.msra.mxu0 %v4352_v36  ;;  %4155 = vmatprep.subr.bf16.mxu1 %v4353_v37 }
  0x4d   :  { %907 = vmatprep.subr.bf16.mxu0 %v4353_v37 }
  0x4e   :  { %4165 = vmatpush1.bf16.msra.mxu1 %v4355_v39 }
  0x4f   :  { %454 = vrot.lane.b32.xlu0 %v4841_v2, %s4747_s21  ;;  %432 = vrot.lane.b32.xlu1 %v4916_v13, %s4746_s19 }
  0x50   :  { %908 = vmatpush1.bf16.msra.mxu0 %v4355_v39  ;;  %4156 = vmatprep.subr.bf16.mxu1 %v4356_v40 }
  0x51   :  { %909 = vmatprep.subr.bf16.mxu0 %v4356_v40 }
  0x52   :  { %4166 = vmatpush1.bf16.msra.mxu1 %v4358_v41 }
  0x53   :  { %444 = vrot.lane.b32.xlu0 %v4848_v3, %s4744_s1  ;;  %456 = vrot.lane.b32.xlu1 %v4855_v4, %s4747_s21 }
  0x54   :  { %910 = vmatpush1.bf16.msra.mxu0 %v4358_v41  ;;  %1164 = vmatprep.subr.bf16.mxu1 %v4361_v42 }
  0x57   :  { %434 = vrot.lane.b32.xlu0 %v4977_v33, %s4746_s19  ;;  %446 = vrot.lane.b32.xlu1 %v4869_v6, %s4744_s1 }
  0x5b   :  { %458 = vrot.lane.b32.xlu0 %v4876_v7, %s4747_s21  ;;  %436 = vrot.lane.b32.xlu1 %v4990_v38, %s4746_s19 }
  0x5f   :  { %448 = vrot.lane.b32.xlu0 %v4895_v10, %s4744_s1  ;;  %460 = vrot.lane.b32.xlu1 %v4902_v11, %s4747_s21 }
  0x63   :  { %510 = vrot.lane.b32.xlu0 %v4888_v9, %s4746_s19  ;;  %522 = vrot.lane.b32.xlu1 %v4999_v43, %s4744_s1 }
  0x67   :  { %534 = vrot.lane.b32.xlu0 %v4941_v21, %s4747_s21  ;;  %512 = vrot.lane.b32.xlu1 %v4955_v25, %s4746_s19 }
  0x6b   :  { %524 = vrot.lane.b32.xlu0 %v5012_v44, %s4744_s1  ;;  %536 = vrot.lane.b32.xlu1 %v4962_v27, %s4747_s21 }
  0x6f   :  { %514 = vrot.lane.b32.xlu0 %v4841_v2, %s4746_s19  ;;  %526 = vrot.lane.b32.xlu1 %v4834_v1, %s4744_s1 }
  0x73   :  { %538 = vrot.lane.b32.xlu0 %v4916_v13, %s4747_s21  ;;  %516 = vrot.lane.b32.xlu1 %v4855_v4, %s4746_s19 }
  0x77   :  { %528 = vrot.lane.b32.xlu0 %v4862_v5, %s4744_s1  ;;  %540 = vrot.lane.b32.xlu1 %v4977_v33, %s4747_s21 }
  0x7b   :  { %518 = vrot.lane.b32.xlu0 %v4876_v7, %s4746_s19  ;;  %530 = vrot.lane.b32.xlu1 %v4881_v8, %s4744_s1  ;;  %v4375_v7 = vld [vmem:[#allocation2 + $0x8c] ss:$16 sps:$4 sm:$0xff]  }
  0x7f   :  { %542 = vrot.lane.b32.xlu0 %v4990_v38, %s4747_s21  ;;  %520 = vrot.lane.b32.xlu1 %v4902_v11, %s4746_s19  ;;  %v4373_v11 = vld [vmem:[#allocation2 + $0x88] ss:$16 sps:$4 sm:$0xff]  }
  0x83   :  { %532 = vrot.lane.b32.xlu0 %v4909_v12, %s4744_s1  ;;  %544 = vrot.lane.b32.xlu1 %v5045_v45, %s4747_s21 }
  0x87   :  { %180 = vrot.lane.b32.xlu0 %v5050_v46, %s4746_s19  ;;  %222 = vrot.lane.b32.xlu1 %v4921_v14, %s4744_s1 }
  0x8b   :  { %264 = vrot.lane.b32.xlu0 %v4926_v15, %s4747_s21  ;;  %182 = vrot.lane.b32.xlu1 %v4999_v43, %s4746_s19 }
  0x8f   :  { %224 = vrot.lane.b32.xlu0 %v4941_v21, %s4744_s1  ;;  %266 = vrot.lane.b32.xlu1 %v4948_v23, %s4747_s21  ;;  %v4379_v21 = vld [vmem:[#allocation2 + $0xc8] ss:$16 sps:$4 sm:$0xff]  }
  0x93   :  { %184 = vrot.lane.b32.xlu0 %v5012_v44, %s4746_s19  ;;  %226 = vrot.lane.b32.xlu1 %v4962_v27, %s4744_s1 }
  0x97   :  { %268 = vrot.lane.b32.xlu0 %v4829_v0, %s4747_s21  ;;  %186 = vrot.lane.b32.xlu1 %v4834_v1, %s4746_s19 }
  0x99   :  { %v337_v47 = vpop.permute.xlu0 %336  ;;  %v366_v48 = vpop.permute.xlu1 %365 }
  0x9a   :  { %v386_v51 = vsel %vm281_vm0, %v4962_v27, %v337_v47  ;;  %v4382_v27 = vld [vmem:[#allocation2 + $0xe8] ss:$16 sps:$4 sm:$0xff]   ;;  %v5161_v47 = vld [vmem:[%s6781_s0 + $0x50] sm:$0xff]  }
  0x9b   :  { %228 = vrot.lane.b32.xlu0 %v4916_v13, %s4744_s1  ;;  %270 = vrot.lane.b32.xlu1 %v4848_v3, %s4747_s21 }
  0x9d   :  { %v349_v52 = vpop.permute.xlu0 %348  ;;  %v339_v54 = vpop.permute.xlu1 %338 }
  0x9e   :  { %v401_v53 = vsel %vm300_vm1, %v386_v51, %v349_v52  ;;  %v389_v58 = vsel %vm281_vm0, %v4916_v13, %v339_v54  ;;  %v4378_v13 = vld [vmem:[#allocation2 + $0xac] ss:$16 sps:$4 sm:$0xff]  }
  0x9f   :  { %v5084_v55 = vsel %vm313_vm2, %v401_v53, %v366_v48  ;;  %188 = vrot.lane.b32.xlu0 %v4862_v5, %s4746_s19  ;;  %230 = vrot.lane.b32.xlu1 %v4977_v33, %s4744_s1  ;;  %v4370_v5 = vld [vmem:[#allocation2 + $0x68] ss:$16 sps:$4 sm:$0xff]  }
  0xa0   :  { %1004 = vmatmul.mubr.bf16.vlgmr.msra.gmra.mrb[0].mxu1 %v5084_v55 }
  0xa1   :  { %1165 = vmatpush1.bf16.msra.mxu1 %v4359_v49  ;;  %v351_v59 = vpop.permute.xlu0 %350  ;;  %3847 = vmatprep.mubr.msk.bf16.mxu1 %vm281_vm0, %v4977_v33  ;;  %v368_v60 = vpop.permute.xlu1 %367 }
  0xa2   :  { %1166 = vmatprep.subr.bf16.mxu1 %v4366_v50  ;;  %v403_v62 = vsel %vm300_vm1, %v389_v58, %v351_v59 }
  0xa3   :  { %272 = vrot.lane.b32.xlu0 %v4869_v6, %s4747_s21  ;;  %190 = vrot.lane.b32.xlu1 %v4881_v8, %s4746_s19  ;;  %v5101_v2 = vsel %vm313_vm2, %v403_v62, %v368_v60 }
  0xa5   :  { %v341_v0 = vpop.permute.xlu0 %340  ;;  %1167 = vmatpush1.bf16.msra.mxu1 %v4364_v56  ;;  %v353_v1 = vpop.permute.xlu1 %352  ;;  %v5175_v56 = vld [vmem:[%s6781_s0 + $0x58] sm:$0xff]  }
  0xa6   :  { %1168 = vmatprep.subr.bf16.mxu1 %v4369_v57  ;;  %v392_v3 = vsel %vm281_vm0, %v4977_v33, %v341_v0  ;;  %v5189_v0 = vld [vmem:[%s6781_s0 + $0x60] sm:$0xff]  }
  0xa7   :  { %232 = vrot.lane.b32.xlu0 %v4990_v38, %s4744_s1  ;;  %274 = vrot.lane.b32.xlu1 %v4895_v10, %s4747_s21  ;;  %v405_v8 = vsel %vm300_vm1, %v392_v3, %v353_v1 }
  0xa8   :  { %1014 = vmatmul.mubr.bf16.gmra.mrb[4].mxu1 %v5101_v2 }
  0xa9   :  { %v370_v4 = vpop.permute.xlu0 %369  ;;  %3848 = vmatprep.mubr.msk.bf16.mxu1 %vm281_vm0, %v4990_v38  ;;  %1169 = vmatpush1.bf16.msra.mxu1 %v4367_v61  ;;  %v343_v6 = vpop.permute.xlu1 %342 }
  0xaa   :  { %1170 = vmatprep.subr.bf16.mxu1 %v4372_v63  ;;  %v5118_v14 = vsel %vm313_vm2, %v405_v8, %v370_v4 }
  0xab   :  { %332 = vrot.lane.b32.xlu0 %v4926_v15, %s4746_s19  ;;  %344 = vrot.lane.b32.xlu1 %v4888_v9, %s4744_s1  ;;  %v395_v9 = vsel %vm281_vm0, %v4990_v38, %v343_v6  ;;  %v4388_v38 = vld [vmem:[#allocation2 + $0x128] ss:$16 sps:$4 sm:$0xff]  }
  0xad   :  { %v355_v10 = vpop.permute.xlu0 %354  ;;  %1171 = vmatpush1.bf16.msra.mxu1 %v4370_v5  ;;  %v372_v12 = vpop.permute.xlu1 %371 }
  0xae   :  { %1172 = vmatprep.subr.bf16.mxu1 %v4375_v7  ;;  %v407_v19 = vsel %vm300_vm1, %v395_v9, %v355_v10  ;;  %v5203_v10 = vld [vmem:[%s6781_s0 + $0x68] sm:$0xff]  }
  0xaf   :  { %361 = vrot.lane.b32.xlu0 %v4999_v43, %s4747_s21  ;;  %334 = vrot.lane.b32.xlu1 %v4948_v23, %s4746_s19  ;;  %v4384_v23 = vld [vmem:[#allocation2 + $0xec] ss:$16 sps:$4 sm:$0xff]   ;;  %v5135_v24 = vsel %vm313_vm2, %v407_v19, %v372_v12  ;;  %v5219_v19 = vld [vmem:[%s6781_s0 + $0xb0] sm:$0xff]  }
  0xb0   :  { %1024 = vmatmul.mubr.bf16.gmra.mrb[8].mxu1 %v5118_v14 }
  0xb1   :  { %3849 = vmatprep.mubr.msk.bf16.mxu1 %vm281_vm0, %v5045_v45  ;;  %v427_v15 = vpop.permute.xlu0 %426  ;;  %1173 = vmatpush1.bf16.msra.mxu1 %v4373_v11  ;;  %v439_v17 = vpop.permute.xlu1 %438 }
  0xb2   :  { %1174 = vmatprep.subr.bf16.mxu1 %v4378_v13  ;;  %v464_v26 = vsel %vm281_vm0, %v5050_v46, %v427_v15 }
  0xb3   :  { %346 = vrot.lane.b32.xlu0 %v4955_v25, %s4744_s1  ;;  %363 = vrot.lane.b32.xlu1 %v5012_v44, %s4747_s21  ;;  %v481_v30 = vsel %vm300_vm1, %v464_v26, %v439_v17  ;;  %v4673_v17 = vld [vmem:[%s6781_s0 + $0xa8] sm:$0xff]  }
  0xb5   :  { %v451_v20 = vpop.permute.xlu0 %450  ;;  %1175 = vmatpush1.bf16.msra.mxu1 %v4376_v16  ;;  %v429_v22 = vpop.permute.xlu1 %428 }
  0xb6   :  { %1176 = vmatprep.subr.bf16.mxu1 %v4381_v18  ;;  %v5144_v35 = vsel %vm313_vm2, %v481_v30, %v451_v20  ;;  %v467_v36 = vsel %vm281_vm0, %v4999_v43, %v429_v22 }
  0xb8   :  { %1034 = vmatmul.mubr.bf16.gmra.mrb[12].mxu1 %v5135_v24 }
  0xb9   :  { %3850 = vmatprep.mubr.msk.bf16.mxu1 %vm281_vm0, %v4999_v43  ;;  %v441_v25 = vpop.permute.xlu0 %440  ;;  %1177 = vmatpush1.bf16.msra.mxu1 %v4379_v21  ;;  %v453_v28 = vpop.permute.xlu1 %452 }
  0xba   :  { %1178 = vmatprep.subr.bf16.mxu1 %v4384_v23  ;;  %v483_v40 = vsel %vm300_vm1, %v467_v36, %v441_v25 }
  0xbb   :  { %v5153_v46 = vsel %vm313_vm2, %v483_v40, %v453_v28  ;;  %v5233_v28 = vld [vmem:[%s6781_s0 + $0xb8] sm:$0xff]  }
  0xbd   :  { %v431_v31 = vpop.permute.xlu0 %430  ;;  %1179 = vmatpush1.bf16.msra.mxu1 %v4382_v27  ;;  %v443_v33 = vpop.permute.xlu1 %442 }
  0xbe   :  { %1180 = vmatprep.subr.bf16.mxu1 %v4387_v29  ;;  %v470_v43 = vsel %vm281_vm0, %v5012_v44, %v431_v31 }
  0xbf   :  { %v485_v50 = vsel %vm300_vm1, %v470_v43, %v443_v33 }
  0xc0   :  { %1044 = vmatmul.mubr.bf16.gmra.mrb[16].mxu1 %v5144_v35 }
  0xc1   :  { %3851 = vmatprep.mubr.msk.bf16.mxu1 %vm281_vm0, %v5012_v44  ;;  %v455_v37 = vpop.permute.xlu0 %454  ;;  %1181 = vmatpush1.bf16.msra.mxu1 %v4385_v32  ;;  %v433_v39 = vpop.permute.xlu1 %432 }
  0xc2   :  { %1182 = vmatprep.subr.bf16.mxu1 %v4390_v34  ;;  %v5167_v53 = vsel %vm313_vm2, %v485_v50, %v455_v37  ;;  %v473_v54 = vsel %vm281_vm0, %v5161_v47, %v433_v39  ;;  %v4391_v34 = vld [vmem:[%s6781_s0] sm:$0xff]  }
  0xc5   :  { %v445_v41 = vpop.permute.xlu0 %444  ;;  %1183 = vmatpush1.bf16.msra.mxu1 %v4388_v38  ;;  %v457_v42 = vpop.permute.xlu1 %456  ;;  %v5252_v38 = vld [vmem:[%s6781_s0 + $0xc0] sm:$0xff]  }
  0xc6   :  { %v487_v59 = vsel %vm300_vm1, %v473_v54, %v445_v41 }
  0xc7   :  { %v5181_v62 = vsel %vm313_vm2, %v487_v59, %v457_v42  ;;  %v5280_v59 = vld [vmem:[%s6781_s0 + $0xc8] sm:$0xff]  }
  0xc8   :  { %1054 = vmatmul.mubr.bf16.gmra.mrb[20].mxu1 %v5153_v46 }
  0xc9   :  { %3852 = vmatprep.mubr.msk.bf16.mxu1 %vm281_vm0, %v5161_v47  ;;  %v435_v48 = vpop.permute.xlu0 %434  ;;  %v447_v49 = vpop.permute.xlu1 %446 }
  0xca   :  { %v476_v63 = vsel %vm281_vm0, %v5175_v56, %v435_v48 }
  0xcb   :  { %v489_v4 = vsel %vm300_vm1, %v476_v63, %v447_v49 }
  0xcd   :  { %v459_v51 = vpop.permute.xlu0 %458  ;;  %v437_v52 = vpop.permute.xlu1 %436 }
  0xce   :  { %v5195_v7 = vsel %vm313_vm2, %v489_v4, %v459_v51  ;;  %v479_v8 = vsel %vm281_vm0, %v5189_v0, %v437_v52  ;;  %v4677_v52 = vld [vmem:[%s6781_s0 + $0x8] sm:$0xff]  }
  0xd0   :  { %1064 = vmatmul.mubr.bf16.gmra.mrb[24].mxu1 %v5167_v53 }
  0xd1   :  { %3853 = vmatprep.mubr.msk.bf16.mxu1 %vm281_vm0, %v5175_v56  ;;  %v449_v57 = vpop.permute.xlu0 %448  ;;  %v461_v58 = vpop.permute.xlu1 %460 }
  0xd2   :  { %v491_v13 = vsel %vm300_vm1, %v479_v8, %v449_v57  ;;  %v4678_v57 = vld [vmem:[%s6781_s0 + $0x10] sm:$0xff]  }
  0xd3   :  { %v5209_v16 = vsel %vm313_vm2, %v491_v13, %v461_v58  ;;  %v5301_v13 = vld [vmem:[%s6781_s0 + $0xd0] sm:$0xff]  }
  0xd5   :  { %v511_v60 = vpop.permute.xlu0 %510  ;;  %v523_v61 = vpop.permute.xlu1 %522 }
  0xd6   :  { %v553_v18 = vsel %vm281_vm0, %v4673_v17, %v511_v60 }
  0xd7   :  { %v570_v22 = vsel %vm300_vm1, %v553_v18, %v523_v61 }
  0xd8   :  { %1074 = vmatmul.mubr.bf16.gmra.mrb[28].mxu1 %v5181_v62 }
  0xd9   :  { %3854 = vmatprep.mubr.msk.bf16.mxu1 %vm281_vm0, %v5189_v0  ;;  %v535_v1 = vpop.permute.xlu0 %534  ;;  %v513_v3 = vpop.permute.xlu1 %512 }
  0xda   :  { %v5225_v25 = vsel %vm313_vm2, %v570_v22, %v535_v1  ;;  %v556_v27 = vsel %vm281_vm0, %v5219_v19, %v513_v3 }
  0xdd   :  { %v525_v5 = vpop.permute.xlu0 %524  ;;  %v537_v6 = vpop.permute.xlu1 %536 }
  0xde   :  { %v572_v31 = vsel %vm300_vm1, %v556_v27, %v525_v5 }
  0xdf   :  { %v5244_v36 = vsel %vm313_vm2, %v572_v31, %v537_v6 }
  0xe0   :  { %1084 = vmatmul.mubr.bf16.gmra.mrb[32].mxu1 %v5195_v7 }
  0xe1   :  { %3855 = vmatprep.mubr.msk.bf16.mxu1 %vm281_vm0, %v5203_v10  ;;  %v515_v11 = vpop.permute.xlu0 %514  ;;  %v527_v12 = vpop.permute.xlu1 %526 }
  0xe2   :  { %v559_v37 = vsel %vm281_vm0, %v5233_v28, %v515_v11  ;;  %v4680_v11 = vld [vmem:[%s6781_s0 + $0x18] sm:$0xff]  }
  0xe3   :  { %v574_v43 = vsel %vm300_vm1, %v559_v37, %v527_v12 }
  0xe5   :  { %v539_v9 = vpop.permute.xlu0 %538  ;;  %v517_v15 = vpop.permute.xlu1 %516 }
  0xe6   :  { %v5263_v51 = vsel %vm313_vm2, %v574_v43, %v539_v9  ;;  %v562_v58 = vsel %vm281_vm0, %v5252_v38, %v517_v15 }
  0xe8   :  { %1094 = vmatmul.mubr.bf16.gmra.mrb[36].mxu1 %v5209_v16 }
  0xe9   :  { %3856 = vmatprep.mubr.msk.bf16.mxu1 %vm281_vm0, %v5219_v19  ;;  %v529_v20 = vpop.permute.xlu0 %528  ;;  %v541_v21 = vpop.permute.xlu1 %540 }
  0xea   :  { %v576_v1 = vsel %vm300_vm1, %v562_v58, %v529_v20 }
  0xeb   :  { %v5289_v8 = vsel %vm313_vm2, %v576_v1, %v541_v21  ;;  %v5311_v21 = vld [vmem:[%s6781_s0 + $0xd8] sm:$0xff]  }
  0xed   :  { %v519_v23 = vpop.permute.xlu0 %518  ;;  %v531_v26 = vpop.permute.xlu1 %530 }
  0xee   :  { %v565_v12 = vsel %vm281_vm0, %v5280_v59, %v519_v23 }
  0xef   :  { %v578_v18 = vsel %vm300_vm1, %v565_v12, %v531_v26  ;;  %v4682_v26 = vld [vmem:[%s6781_s0 + $0x20] sm:$0xff]  }
  0xf0   :  { %1104 = vmatmul.mubr.bf16.gmra.mrb[40].mxu1 %v5225_v25 }
  0xf1   :  { %3857 = vmatprep.mubr.msk.bf16.mxu1 %vm281_vm0, %v5233_v28  ;;  %v543_v29 = vpop.permute.xlu0 %542  ;;  %v521_v30 = vpop.permute.xlu1 %520 }
  0xf2   :  { %v5315_v27 = vsel %vm313_vm2, %v578_v18, %v543_v29  ;;  %v568_v31 = vsel %vm281_vm0, %v5301_v13, %v521_v30  ;;  %v4683_v30 = vld [vmem:[%s6781_s0 + $0x28] sm:$0xff]  }
  0xf5   :  { %v533_v32 = vpop.permute.xlu0 %532  ;;  %v5238_v33 = vpop.permute.xlu1 %544 }
  0xf8   :  { %1114 = vmatmul.mubr.bf16.gmra.mrb[44].mxu1 %v5244_v36 }
  0xf9   :  { %3858 = vmatprep.mubr.msk.bf16.mxu1 %vm281_vm0, %v5252_v38  ;;  %v181_v39 = vpop.permute.xlu0 %180  ;;  %v223_v41 = vpop.permute.xlu1 %222 }
  0xfa   :  { %v284_v40 = vsel %vm281_vm0, %v4391_v34, %v181_v39  ;;  %v580_v39 = vsel %vm300_vm1, %v568_v31, %v533_v32  ;;  %v4690_v31 = vld [vmem:[%s6781_s0 + $0x98] sm:$0xff]  }
  0xfb   :  { %v302_v42 = vsel %vm300_vm1, %v284_v40, %v223_v41  ;;  %v5332_v43 = vsel %vm313_vm2, %v580_v39, %v5238_v33 }
  0xfd   :  { %v265_v48 = vpop.permute.xlu0 %264  ;;  %v183_v50 = vpop.permute.xlu1 %182 }
  0xfe   :  { %v5260_v49 = vsel %vm313_vm2, %v302_v42, %v265_v48  ;;  %v287_v54 = vsel %vm281_vm0, %v4677_v52, %v183_v50 }
  0xff   :  { %924 = vmatmul.mubr.bf16.vlgmr.msra.gmra.mrb[0].mxu0 %v5260_v49 }
 0x100   :  { %1124 = vmatmul.mubr.bf16.gmra.mrb[48].mxu1 %v5263_v51  ;;  %3839 = vmatprep.mubr.msk.bf16.mxu0 %vm281_vm0, %v4678_v57 }
 0x101   :  { %3859 = vmatprep.mubr.msk.bf16.mxu1 %vm281_vm0, %v5280_v59  ;;  %v225_v60 = vpop.permute.xlu0 %224  ;;  %v267_v63 = vpop.permute.xlu1 %266 }
 0x102   :  { %v304_v61 = vsel %vm300_vm1, %v287_v54, %v225_v60  ;;  %v4684_v60 = vld [vmem:[%s6781_s0 + $0x30] sm:$0xff]  }
 0x103   :  { %v318_v3 = vsel %vm313_vm2, %v304_v61, %v267_v63 }
 0x105   :  { %v185_v4 = vpop.permute.xlu0 %184  ;;  %v227_v6 = vpop.permute.xlu1 %226 }
 0x106   :  { %v290_v5 = vsel %vm281_vm0, %v4678_v57, %v185_v4 }
 0x107   :  { %934 = vmatmul.mubr.bf16.gmra.mrb[4].mxu0 %v318_v3  ;;  %v306_v9 = vsel %vm300_vm1, %v290_v5, %v227_v6  ;;  %v4685_v5 = vld [vmem:[%s6781_s0 + $0x70] sm:$0xff]   ;;  %v4686_v6 = vld [vmem:[%s6781_s0 + $0x78] sm:$0xff]  }
 0x108   :  { %1134 = vmatmul.mubr.bf16.gmra.mrb[52].mxu1 %v5289_v8  ;;  %3840 = vmatprep.mubr.msk.bf16.mxu0 %vm281_vm0, %v4680_v11 }
 0x109   :  { %3860 = vmatprep.mubr.msk.bf16.mxu1 %vm281_vm0, %v5301_v13  ;;  %v269_v15 = vpop.permute.xlu0 %268  ;;  %v187_v17 = vpop.permute.xlu1 %186 }
 0x10a   :  { %v321_v20 = vsel %vm313_vm2, %v306_v9, %v269_v15  ;;  %v293_v23 = vsel %vm281_vm0, %v4680_v11, %v187_v17 }
 0x10d   :  { %v229_v22 = vpop.permute.xlu0 %228  ;;  %v271_v37 = vpop.permute.xlu1 %270 }
 0x10e   :  { %v308_v34 = vsel %vm300_vm1, %v293_v23, %v229_v22 }
 0x10f   :  { %944 = vmatmul.mubr.bf16.gmra.mrb[8].mxu0 %v321_v20  ;;  %v324_v40 = vsel %vm313_vm2, %v308_v34, %v271_v37 }
 0x110   :  { %1144 = vmatmul.mubr.bf16.gmra.mrb[56].mxu1 %v5315_v27  ;;  %3841 = vmatprep.mubr.msk.bf16.mxu0 %vm281_vm0, %v4682_v26 }
 0x111   :  { %3861 = vmatprep.mubr.msk.bf16.mxu1 %vm281_vm0, %v5311_v21  ;;  %v189_v29 = vpop.permute.xlu0 %188  ;;  %v231_v41 = vpop.permute.xlu1 %230 }
 0x112   :  { %v296_v42 = vsel %vm281_vm0, %v4682_v26, %v189_v29 }
 0x113   :  { %v310_v32 = vsel %vm300_vm1, %v296_v42, %v231_v41 }
 0x115   :  { %v273_v48 = vpop.permute.xlu0 %272  ;;  %v191_v50 = vpop.permute.xlu1 %190 }
 0x116   :  { %v327_v54 = vsel %vm313_vm2, %v310_v32, %v273_v48  ;;  %v299_v33 = vsel %vm281_vm0, %v4683_v30, %v191_v50 }
 0x117   :  { %954 = vmatmul.mubr.bf16.gmra.mrb[12].mxu0 %v324_v40 }
 0x118   :  { %1154 = vmatmul.mubr.bf16.gmra.mrb[60].mxu1 %v5332_v43  ;;  %3842 = vmatprep.mubr.msk.bf16.mxu0 %vm281_vm0, %v4683_v30 }
 0x119   :  { %3862 = vmatprep.mubr.msk.bf16.mxu1 %vm281_vm0, %v4677_v52  ;;  %v233_v58 = vpop.permute.xlu0 %232  ;;  %v275_v61 = vpop.permute.xlu1 %274 }
 0x11a   :  { %v312_v52 = vsel %vm300_vm1, %v299_v33, %v233_v58 }
 0x11b   :  { %v330_v1 = vsel %vm313_vm2, %v312_v52, %v275_v61  ;;  %v4395_v52 = vld [vmem:[%s6784_s3 + $0x4] ss:$8 sps:$4 sm:$0xff]   ;;  %v4398_v61 = vld [vmem:[%s6784_s3 + $0x14] ss:$8 sps:$4 sm:$0xff]  }
 0x11c   :  { %2673 = vmatprep.subr.bf16.mxu0 %v4395_v52 }
 0x11d   :  { %v333_v63 = vpop.permute.xlu0 %332  ;;  %v345_v4 = vpop.permute.xlu1 %344 }
 0x11f   :  { %964 = vmatmul.mubr.bf16.gmra.mrb[16].mxu0 %v327_v54 }
 0x120   :  { %1197 = vmatmul.mubr.bf16.vlgmr.msra.gmra.mrb[64].mxu1 %v5260_v49  ;;  %3843 = vmatprep.mubr.msk.bf16.mxu0 %vm281_vm0, %v4684_v60  ;;  %v380_v49 = vsel %vm281_vm0, %v4685_v5, %v333_v63 }
 0x121   :  { %3863 = vmatprep.mubr.msk.bf16.mxu1 %vm281_vm0, %v4678_v57  ;;  %v397_v57 = vsel %vm300_vm1, %v380_v49, %v345_v4  ;;  %v362_v12 = vpop.permute.xlu0 %361  ;;  %v335_v9 = vpop.permute.xlu1 %334  ;;  %v4401_v4 = vld [vmem:[%s6784_s3 + $0x24] ss:$8 sps:$4 sm:$0xff]  }
 0x122   :  { %v409_v15 = vsel %vm313_vm2, %v397_v57, %v362_v12  ;;  %v383_v17 = vsel %vm281_vm0, %v4686_v6, %v335_v9  ;;  %v4402_v12 = vld [vmem:[%s6784_s3 + $0x30] ss:$8 sps:$4 sm:$0xff]   ;;  %v4407_v9 = vld [vmem:[%s6784_s3 + $0x44] ss:$8 sps:$4 sm:$0xff]  }
 0x125   :  { %v347_v18 = vpop.permute.xlu0 %346  ;;  %v364_v22 = vpop.permute.xlu1 %363 }
 0x127   :  { %974 = vmatmul.mubr.bf16.gmra.mrb[20].mxu0 %v330_v1 }
 0x128   :  { %1207 = vmatmul.mubr.bf16.gmra.mrb[68].mxu1 %v318_v3  ;;  %3844 = vmatprep.mubr.msk.bf16.mxu0 %vm281_vm0, %v4686_v6  ;;  %v4687_v3 = vld [vmem:[%s6781_s0 + $0x80] sm:$0xff]  }
 0x129   :  { %3864 = vmatprep.mubr.msk.bf16.mxu1 %vm281_vm0, %v4680_v11  ;;  %v399_v11 = vsel %vm300_vm1, %v383_v17, %v347_v18  ;;  %v4410_v18 = vld [vmem:[%s6784_s3 + $0x54] ss:$8 sps:$4 sm:$0xff]  }
 0x12a   :  { %v412_v23 = vsel %vm313_vm2, %v399_v11, %v364_v22  ;;  %v4408_v11 = vld [vmem:[%s6784_s3 + $0x50] ss:$8 sps:$4 sm:$0xff]   ;;  %v4413_v22 = vld [vmem:[%s6784_s3 + $0x64] ss:$8 sps:$4 sm:$0xff]  }
 0x12f   :  { %984 = vmatmul.mubr.bf16.gmra.mrb[24].mxu0 %v409_v15 }
 0x130   :  { %1217 = vmatmul.mubr.bf16.gmra.mrb[72].mxu1 %v321_v20  ;;  %3845 = vmatprep.mubr.msk.bf16.mxu0 %vm281_vm0, %v4687_v3  ;;  %v4688_v20 = vld [vmem:[%s6781_s0 + $0x88] sm:$0xff]  }
 0x131   :  { %3865 = vmatprep.mubr.msk.bf16.mxu1 %vm281_vm0, %v4682_v26  ;;  %v4689_v26 = vld [vmem:[%s6781_s0 + $0x90] sm:$0xff]  }
 0x137   :  { %994 = vmatmul.mubr.bf16.gmra.mrb[28].mxu0 %v412_v23 }
 0x138   :  { %1227 = vmatmul.mubr.bf16.gmra.mrb[76].mxu1 %v324_v40 }
 0x139   :  { %3866 = vmatprep.mubr.msk.bf16.mxu1 %vm281_vm0, %v4683_v30 }
 0x140   :  { %1237 = vmatmul.mubr.bf16.gmra.mrb[80].mxu1 %v327_v54 }
 0x141   :  { %3867 = vmatprep.mubr.msk.bf16.mxu1 %vm281_vm0, %v4684_v60  ;;  %v4393_v60 = vld [vmem:[%s6784_s3] ss:$8 sps:$4 sm:$0xff]  }
 0x142   :  { %2674 = vmatpush1.bf16.msra.mxu0 %v4393_v60  ;;  %v4419_v60 = vld [vmem:[%s6784_s3 + $0x84] ss:$8 sps:$4 sm:$0xff]  }
 0x143   :  { %2675 = vmatprep.subr.bf16.mxu0 %v4398_v61 }
 0x148   :  { %1247 = vmatmul.mubr.bf16.gmra.mrb[84].mxu1 %v330_v1  ;;  %v4396_v1 = vld [vmem:[%s6784_s3 + $0x10] ss:$8 sps:$4 sm:$0xff]  }
 0x149   :  { %3868 = vmatprep.mubr.msk.bf16.mxu1 %vm281_vm0, %v4686_v6  ;;  %2676 = vmatpush1.bf16.msra.mxu0 %v4396_v1  ;;  %v4404_v6 = vld [vmem:[%s6784_s3 + $0x34] ss:$8 sps:$4 sm:$0xff]  }
 0x14a   :  { %2677 = vmatprep.subr.bf16.mxu0 %v4401_v4  ;;  %v4422_v1 = vld [vmem:[%s6784_s3 + $0x94] ss:$8 sps:$4 sm:$0xff]   ;;  %v4420_v4 = vld [vmem:[%s6784_s3 + $0x90] ss:$8 sps:$4 sm:$0xff]  }
 0x150   :  { %1257 = vmatmul.mubr.bf16.gmra.mrb[88].mxu1 %v409_v15 }
 0x151   :  { %3869 = vmatprep.mubr.msk.bf16.mxu1 %vm281_vm0, %v4687_v3 }
 0x158   :  { %1267 = vmatmul.mubr.bf16.gmra.mrb[92].mxu1 %v412_v23 }
 0x159   :  { %3870 = vmatprep.mubr.msk.bf16.mxu1 %vm281_vm0, %v4688_v20 }
 0x160   :  { %1277 = vmatmul.mubr.bf16.gmra.mrb[96].mxu1 %v5084_v55 }
 0x161   :  { %3871 = vmatprep.mubr.msk.bf16.mxu1 %vm281_vm0, %v4689_v26  ;;  %v4416_v26 = vld [vmem:[%s6784_s3 + $0x74] ss:$8 sps:$4 sm:$0xff]  }
 0x168   :  { %1287 = vmatmul.mubr.bf16.gmra.mrb[100].mxu1 %v5101_v2  ;;  %v4691_v2 = vld [vmem:[%s6781_s0 + $0x40] sm:$0xff]  }
 0x169   :  { %3872 = vmatprep.mubr.msk.bf16.mxu1 %vm281_vm0, %v4690_v31 }
 0x170   :  { %1297 = vmatmul.mubr.bf16.gmra.mrb[104].mxu1 %v5118_v14 }
 0x171   :  { %3873 = vmatprep.mubr.msk.bf16.mxu1 %vm281_vm0, %v5045_v45 }
 0x173   :  { %v5391_v55 = vpop.f32.mrb[0].mxu1 }
 0x174   :  { %v5393_v34 = vpop.f32.mrb[1].mxu1 }
 0x175   :  { %v5395_v37 = vpop.f32.mrb[2].mxu1 }
 0x176   :  { %v5397_v29 = vpop.f32.mrb[3].mxu1 }
 0x178   :  { %1307 = vmatmul.mubr.bf16.gmra.mrb[108].mxu1 %v5135_v24 }
 0x179   :  { %3874 = vmatprep.mubr.msk.bf16.mxu1 %vm281_vm0, %v4691_v2  ;;  %v4414_v2 = vld [vmem:[%s6784_s3 + $0x70] ss:$8 sps:$4 sm:$0xff]  }
 0x17b   :  { %v5404_v14 = vpop.f32.mrb[4].mxu1 }
 0x17c   :  { %v5406_v39 = vpop.f32.mrb[5].mxu1 }
 0x17d   :  { %v5408_v45 = vpop.f32.mrb[6].mxu1 }
 0x17e   :  { %v5410_v40 = vpop.f32.mrb[7].mxu1 }
 0x17f   :  { %6847 = vst [vmem:[#allocation8_spill] sm:$0xff] %v5410_v40 }
 0x180   :  { %1317 = vmatmul.mubr.bf16.gmra.mrb[112].mxu1 %v5144_v35 }
 0x181   :  { %3875 = vmatprep.mubr.msk.bf16.mxu1 %vm281_vm0, %v5012_v44 }
 0x183   :  { %v5415_v24 = vpop.f32.mrb[8].mxu1 }
 0x184   :  { %6848 = vst [vmem:[#allocation9_spill] sm:$0xff] %v5415_v24  ;;  %v5417_v41 = vpop.f32.mrb[9].mxu1 }
 0x185   :  { %v5419_v42 = vpop.f32.mrb[10].mxu1 }
 0x186   :  { %v5421_v30 = vpop.f32.mrb[11].mxu1 }
 0x187   :  { %6849 = vst [vmem:[#allocation10_spill] sm:$0xff] %v5421_v30 }
 0x188   :  { %1327 = vmatmul.mubr.bf16.gmra.mrb[116].mxu1 %v5153_v46 }
 0x189   :  { %3876 = vmatprep.mubr.msk.bf16.mxu1 %vm281_vm0, %v5161_v47 }
 0x18b   :  { %v5426_v32 = vpop.f32.mrb[12].mxu1 }
 0x18c   :  { %6850 = vst [vmem:[#allocation11_spill] sm:$0xff] %v5426_v32  ;;  %v5428_v48 = vpop.f32.mrb[13].mxu1 }
 0x18d   :  { %6851 = vst [vmem:[#allocation12_spill] sm:$0xff] %v5428_v48  ;;  %v5430_v35 = vpop.f32.mrb[14].mxu1 }
 0x18e   :  { %6852 = vst [vmem:[#allocation13_spill] sm:$0xff] %v5430_v35  ;;  %v5432_v44 = vpop.f32.mrb[15].mxu1 }
 0x18f   :  { %6853 = vst [vmem:[#allocation14_spill] sm:$0xff] %v5432_v44 }
 0x190   :  { %1337 = vmatmul.mubr.bf16.gmra.mrb[120].mxu1 %v5167_v53 }
 0x191   :  { %3877 = vmatprep.mubr.msk.bf16.mxu1 %vm281_vm0, %v5175_v56 }
 0x193   :  { %v5437_v50 = vpop.f32.mrb[16].mxu1 }
 0x194   :  { %v5439_v54 = vpop.f32.mrb[17].mxu1 }
 0x195   :  { %v5441_v46 = vpop.f32.mrb[18].mxu1 }
 0x196   :  { %v5443_v47 = vpop.f32.mrb[19].mxu1 }
 0x198   :  { %1347 = vmatmul.mubr.bf16.gmra.mrb[124].mxu1 %v5181_v62 }
 0x199   :  { %3878 = vmatprep.mubr.msk.bf16.mxu1 %vm281_vm0, %v5189_v0 }
 0x19b   :  { %v5448_v58 = vpop.f32.mrb[20].mxu1 }
 0x19c   :  { %v5450_v33 = vpop.f32.mrb[21].mxu1 }
 0x19d   :  { %v5452_v53 = vpop.f32.mrb[22].mxu1 }
 0x19e   :  { %v5454_v56 = vpop.f32.mrb[23].mxu1 }
 0x1a0   :  { %1357 = vmatmul.mubr.bf16.gmra.mrb[128].mxu1 %v5195_v7 }
 0x1a1   :  { %3879 = vmatprep.mubr.msk.bf16.mxu1 %vm281_vm0, %v5203_v10  ;;  %v4399_v10 = vld [vmem:[%s6784_s3 + $0x20] ss:$8 sps:$4 sm:$0xff]  }
 0x1a2   :  { %2678 = vmatpush1.bf16.msra.mxu0 %v4399_v10 }
 0x1a3   :  { %v5465_v62 = vpop.f32.mrb[24].mxu1  ;;  %2679 = vmatprep.subr.bf16.mxu0 %v4404_v6  ;;  %v4425_v6 = vld [vmem:[%s6784_s3 + $0xa4] ss:$8 sps:$4 sm:$0xff]  }
 0x1a4   :  { %6854 = vst [vmem:[#allocation15_spill] sm:$0xff] %v5465_v62  ;;  %v5467_v0 = vpop.f32.mrb[25].mxu1 }
 0x1a5   :  { %6855 = vst [vmem:[#allocation16_spill] sm:$0xff] %v5467_v0  ;;  %v5472_v63 = vpop.f32.mrb[26].mxu1 }
 0x1a6   :  { %6856 = vst [vmem:[#allocation17_spill] sm:$0xff] %v5472_v63  ;;  %v5477_v7 = vpop.f32.mrb[27].mxu1  ;;  %2680 = vmatpush1.bf16.msra.mxu0 %v4402_v12 }
 0x1a7   :  { %6857 = vst [vmem:[#allocation18_spill] sm:$0xff] %v5477_v7  ;;  %2681 = vmatprep.subr.bf16.mxu0 %v4407_v9  ;;  %v4428_v9 = vld [vmem:[%s6784_s3 + $0xb4] ss:$8 sps:$4 sm:$0xff]  }
 0x1a8   :  { %1367 = vmatmul.mubr.bf16.gmra.mrb[132].mxu1 %v5209_v16 }
 0x1a9   :  { %3880 = vmatprep.mubr.msk.bf16.mxu1 %vm281_vm0, %v5219_v19  ;;  %v4405_v19 = vld [vmem:[%s6784_s3 + $0x40] ss:$8 sps:$4 sm:$0xff]  }
 0x1aa   :  { %2682 = vmatpush1.bf16.msra.mxu0 %v4405_v19 }
 0x1ab   :  { %v5488_v5 = vpop.f32.mrb[28].mxu1  ;;  %2683 = vmatprep.subr.bf16.mxu0 %v4410_v18 }
 0x1ac   :  { %6858 = vst [vmem:[#allocation19_spill] sm:$0xff] %v5488_v5  ;;  %v5490_v49 = vpop.f32.mrb[29].mxu1 }
 0x1ad   :  { %6859 = vst [vmem:[#allocation20_spill] sm:$0xff] %v5490_v49  ;;  %v5495_v57 = vpop.f32.mrb[30].mxu1 }
 0x1ae   :  { %6860 = vst [vmem:[#allocation21_spill] sm:$0xff] %v5495_v57  ;;  %v5500_v16 = vpop.f32.mrb[31].mxu1  ;;  %2684 = vmatpush1.bf16.msra.mxu0 %v4408_v11  ;;  %v4426_v11 = vld [vmem:[%s6784_s3 + $0xb0] ss:$8 sps:$4 sm:$0xff]  }
 0x1af   :  { %6861 = vst [vmem:[#allocation22_spill] sm:$0xff] %v5500_v16  ;;  %2685 = vmatprep.subr.bf16.mxu0 %v4413_v22 }
 0x1b0   :  { %1377 = vmatmul.mubr.bf16.gmra.mrb[136].mxu1 %v5225_v25 }
 0x1b1   :  { %3881 = vmatprep.mubr.msk.bf16.mxu1 %vm281_vm0, %v5233_v28  ;;  %v4411_v28 = vld [vmem:[%s6784_s3 + $0x60] ss:$8 sps:$4 sm:$0xff]  }
 0x1b2   :  { %2686 = vmatpush1.bf16.msra.mxu0 %v4411_v28  ;;  %v4431_v28 = vld [vmem:[%s6784_s3 + $0xc4] ss:$8 sps:$4 sm:$0xff]  }
 0x1b3   :  { %v5511_v15 = vpop.f32.mrb[32].mxu1  ;;  %2687 = vmatprep.subr.bf16.mxu0 %v4416_v26 }
 0x1b4   :  { %6862 = vst [vmem:[#allocation23_spill] sm:$0xff] %v5511_v15  ;;  %v5513_v17 = vpop.f32.mrb[33].mxu1 }
 0x1b5   :  { %6863 = vst [vmem:[#allocation24_spill] sm:$0xff] %v5513_v17  ;;  %v5518_v3 = vpop.f32.mrb[34].mxu1 }
 0x1b6   :  { %6864 = vst [vmem:[#allocation25_spill] sm:$0xff] %v5518_v3  ;;  %v5523_v25 = vpop.f32.mrb[35].mxu1  ;;  %2688 = vmatpush1.bf16.msra.mxu0 %v4414_v2 }
 0x1b7   :  { %6865 = vst [vmem:[#allocation26_spill] sm:$0xff] %v5523_v25  ;;  %2689 = vmatprep.subr.bf16.mxu0 %v4419_v60 }
 0x1b8   :  { %1387 = vmatmul.mubr.bf16.gmra.mrb[140].mxu1 %v5244_v36 }
 0x1b9   :  { %3882 = vmatprep.mubr.msk.bf16.mxu1 %vm281_vm0, %v5252_v38  ;;  %v4417_v38 = vld [vmem:[%s6784_s3 + $0x80] ss:$8 sps:$4 sm:$0xff]  }
 0x1ba   :  { %2690 = vmatpush1.bf16.msra.mxu0 %v4417_v38 }
 0x1bb   :  { %v5534_v23 = vpop.f32.mrb[36].mxu1  ;;  %2691 = vmatprep.subr.bf16.mxu0 %v4422_v1  ;;  %v4434_v1 = vld [vmem:[%s6784_s3 + $0xd4] ss:$8 sps:$4 sm:$0xff]  }
 0x1bc   :  { %6866 = vst [vmem:[#allocation27_spill] sm:$0xff] %v5534_v23  ;;  %v5536_v20 = vpop.f32.mrb[37].mxu1 }
 0x1bd   :  { %6867 = vst [vmem:[#allocation28_spill] sm:$0xff] %v5536_v20  ;;  %v5541_v31 = vpop.f32.mrb[38].mxu1 }
 0x1be   :  { %6868 = vst [vmem:[#allocation29_spill] sm:$0xff] %v5541_v31  ;;  %v5546_v36 = vpop.f32.mrb[39].mxu1  ;;  %2692 = vmatpush1.bf16.msra.mxu0 %v4420_v4 }
 0x1bf   :  { %6869 = vst [vmem:[#allocation30_spill] sm:$0xff] %v5546_v36  ;;  %2693 = vmatprep.subr.bf16.mxu0 %v4425_v6  ;;  %v4437_v6 = vld [vmem:[%s6784_s3 + $0xe4] ss:$8 sps:$4 sm:$0xff]  }
 0x1c0   :  { %1397 = vmatmul.mubr.bf16.gmra.mrb[144].mxu1 %v5263_v51 }
 0x1c1   :  { %3883 = vmatprep.mubr.msk.bf16.mxu1 %vm281_vm0, %v5280_v59  ;;  %v4423_v59 = vld [vmem:[%s6784_s3 + $0xa0] ss:$8 sps:$4 sm:$0xff]  }
 0x1c2   :  { %2694 = vmatpush1.bf16.msra.mxu0 %v4423_v59  ;;  %v4432_v59 = vld [vmem:[%s6784_s3 + $0xd0] ss:$8 sps:$4 sm:$0xff]  }
 0x1c3   :  { %v5557_v52 = vpop.f32.mrb[40].mxu1  ;;  %2695 = vmatprep.subr.bf16.mxu0 %v4428_v9  ;;  %v4435_v9 = vld [vmem:[%s6784_s3 + $0xe0] ss:$8 sps:$4 sm:$0xff]  }
 0x1c4   :  { %6870 = vst [vmem:[#allocation31_spill] sm:$0xff] %v5557_v52  ;;  %v5559_v61 = vpop.f32.mrb[41].mxu1 }
 0x1c5   :  { %6871 = vst [vmem:[#allocation32_spill] sm:$0xff] %v5559_v61  ;;  %v5564_v10 = vpop.f32.mrb[42].mxu1 }
 0x1c6   :  { %6872 = vst [vmem:[#allocation33_spill] sm:$0xff] %v5564_v10  ;;  %v5569_v51 = vpop.f32.mrb[43].mxu1  ;;  %2696 = vmatpush1.bf16.msra.mxu0 %v4426_v11 }
 0x1c7   :  { %6873 = vst [vmem:[#allocation34_spill] sm:$0xff] %v5569_v51  ;;  %2697 = vmatprep.subr.bf16.mxu0 %v4431_v28 }
 0x1c8   :  { %1407 = vmatmul.mubr.bf16.gmra.mrb[148].mxu1 %v5289_v8 }
 0x1c9   :  { %3884 = vmatprep.mubr.msk.bf16.mxu1 %vm281_vm0, %v5301_v13  ;;  %v4429_v13 = vld [vmem:[%s6784_s3 + $0xc0] ss:$8 sps:$4 sm:$0xff]  }
 0x1ca   :  { %2698 = vmatpush1.bf16.msra.mxu0 %v4429_v13 }
 0x1cb   :  { %v5580_v12 = vpop.f32.mrb[44].mxu1  ;;  %2699 = vmatprep.subr.bf16.mxu0 %v4434_v1 }
 0x1cc   :  { %6874 = vst [vmem:[#allocation35_spill] sm:$0xff] %v5580_v12  ;;  %v5582_v19 = vpop.f32.mrb[45].mxu1 }
 0x1cd   :  { %6875 = vst [vmem:[#allocation36_spill] sm:$0xff] %v5582_v19  ;;  %v5587_v18 = vpop.f32.mrb[46].mxu1 }
 0x1ce   :  { %6876 = vst [vmem:[#allocation37_spill] sm:$0xff] %v5587_v18  ;;  %v5592_v8 = vpop.f32.mrb[47].mxu1  ;;  %2700 = vmatpush1.bf16.msra.mxu0 %v4432_v59 }
 0x1cf   :  { %6877 = vst [vmem:[#allocation38_spill] sm:$0xff] %v5592_v8  ;;  %2701 = vmatprep.subr.bf16.mxu0 %v4437_v6  ;;  %v4438_v6 = vld [vmem:[%s6784_s3 + $0xf0] ss:$8 sps:$4 sm:$0xff]  }
 0x1d0   :  { %1417 = vmatmul.mubr.bf16.gmra.mrb[152].mxu1 %v5315_v27 }
 0x1d1   :  { %3885 = vmatprep.mubr.msk.bf16.mxu1 %vm281_vm0, %v5311_v21 }
 0x1d2   :  { %v5603_v22 = vpop.f32.mrb[0].mxu0  ;;  %2702 = vmatpush1.bf16.msra.mxu0 %v4435_v9 }
 0x1d3   :  { %v5605_v26 = vpop.f32.mrb[48].mxu1  ;;  %v5607_v2 = vpop.f32.mrb[1].mxu0 }
 0x1d4   :  { %6878 = vst [vmem:[#allocation39_spill] sm:$0xff] %v5605_v26  ;;  %v5609_v38 = vpop.f32.mrb[49].mxu1  ;;  %v5611_v60 = vpop.f32.mrb[2].mxu0 }
 0x1d5   :  { %6879 = vst [vmem:[#allocation40_spill] sm:$0xff] %v5609_v38  ;;  %v5616_v27 = vpop.f32.mrb[50].mxu1  ;;  %v5618_v4 = vpop.f32.mrb[3].mxu0 }
 0x1d6   :  { %6880 = vst [vmem:[#allocation41_spill] sm:$0xff] %v5616_v27  ;;  %v5620_v21 = vpop.f32.mrb[51].mxu1 }
 0x1d7   :  { %6881 = vst [vmem:[#allocation42_spill] sm:$0xff] %v5620_v21 }
 0x1d8   :  { %1427 = vmatmul.mubr.bf16.gmra.mrb[156].mxu1 %v5332_v43  ;;  %v4440_v43 = vld [vmem:[%s6784_s3 + $0xf4] ss:$8 sps:$4 sm:$0xff]  }
 0x1d9   :  { %2703 = vmatprep.subr.bf16.mxu0 %v4440_v43 }
 0x1da   :  { %v5632_v11 = vpop.f32.mrb[4].mxu0  ;;  %2704 = vmatpush1.bf16.msra.mxu0 %v4438_v6 }
 0x1db   :  { %v5634_v13 = vpop.f32.mrb[52].mxu1  ;;  %v5636_v28 = vpop.f32.mrb[5].mxu0 }
 0x1dc   :  { %6882 = vst [vmem:[#allocation43_spill] sm:$0xff] %v5634_v13  ;;  %v5638_v21 = vpop.f32.mrb[53].mxu1  ;;  %v5640_v1 = vpop.f32.mrb[6].mxu0 }
 0x1dd   :  { %6883 = vst [vmem:[#allocation44_spill] sm:$0xff] %v5638_v21  ;;  %6884 = vst [vmem:[#allocation45_spill] sm:$0xff] %v5640_v1  ;;  %v5645_v59 = vpop.f32.mrb[54].mxu1  ;;  %v5647_v27 = vpop.f32.mrb[7].mxu0 }
 0x1de   :  { %6885 = vst [vmem:[#allocation46_spill] sm:$0xff] %v5645_v59  ;;  %6886 = vst [vmem:[#allocation47_spill] sm:$0xff] %v5647_v27  ;;  %v5652_v13 = vpop.f32.mrb[55].mxu1 }
 0x1df   :  { %6887 = vst [vmem:[#allocation48_spill] sm:$0xff] %v5652_v13 }
 0x1e2   :  { %v5654_v21 = vpop.f32.mrb[8].mxu0 }
 0x1e3   :  { %6888 = vst [vmem:[#allocation49_spill] sm:$0xff] %v5654_v21  ;;  %v5656_v38 = vpop.f32.mrb[56].mxu1  ;;  %v5658_v9 = vpop.f32.mrb[9].mxu0 }
 0x1e4   :  { %6889 = vst [vmem:[#allocation50_spill] sm:$0xff] %v5656_v38  ;;  %6890 = vst [vmem:[#allocation51_spill] sm:$0xff] %v5658_v9  ;;  %v5660_v26 = vpop.f32.mrb[57].mxu1  ;;  %v5662_v8 = vpop.f32.mrb[10].mxu0 }
 0x1e5   :  { %6891 = vst [vmem:[#allocation52_spill] sm:$0xff] %v5660_v26  ;;  %6892 = vst [vmem:[#allocation53_spill] sm:$0xff] %v5662_v8  ;;  %v5664_v59 = vpop.f32.mrb[58].mxu1  ;;  %v5666_v18 = vpop.f32.mrb[11].mxu0 }
 0x1e6   :  { %6893 = vst [vmem:[#allocation54_spill] sm:$0xff] %v5664_v59  ;;  %6894 = vst [vmem:[#allocation55_spill] sm:$0xff] %v5666_v18  ;;  %v5668_v19 = vpop.f32.mrb[59].mxu1 }
 0x1e7   :  { %6895 = vst [vmem:[#allocation56_spill] sm:$0xff] %v5668_v19  ;;  %v4443_v19 = vld [vmem:[%s6784_s3 + $0x104] ss:$8 sps:$4 sm:$0xff]  }
 0x1e8   :  { %2786 = vmatprep.subr.bf16.mxu0 %v4443_v19 }
 0x1ea   :  { %v5670_v12 = vpop.f32.mrb[12].mxu0 }
 0x1eb   :  { %6896 = vst [vmem:[#allocation57_spill] sm:$0xff] %v5670_v12  ;;  %v5672_v43 = vpop.f32.mrb[60].mxu1  ;;  %v5674_v6 = vpop.f32.mrb[13].mxu0 }
 0x1ec   :  { %6897 = vst [vmem:[#allocation58_spill] sm:$0xff] %v5672_v43  ;;  %v5676_v13 = vpop.f32.mrb[61].mxu1  ;;  %v5678_v38 = vpop.f32.mrb[14].mxu0 }
 0x1ed   :  { %6898 = vst [vmem:[#allocation59_spill] sm:$0xff] %v5676_v13  ;;  %v5680_v51 = vpop.f32.mrb[62].mxu1  ;;  %v5682_v26 = vpop.f32.mrb[15].mxu0 }
 0x1ee   :  { %6899 = vst [vmem:[#allocation60_spill] sm:$0xff] %v5680_v51  ;;  %v5684_v10 = vpop.f32.mrb[63].mxu1 }
 0x1ef   :  { %6900 = vst [vmem:[#allocation61_spill] sm:$0xff] %v5684_v10 }
 0x1f2   :  { %v5689_v59 = vpop.f32.mrb[16].mxu0 }
 0x1f3   :  { %v5691_v43 = vpop.f32.mrb[64].mxu1  ;;  %v5693_v61 = vpop.f32.mrb[17].mxu0 }
 0x1f4   :  { %v5697_v52 = vpop.f32.mrb[65].mxu1  ;;  %v5699_v51 = vpop.f32.mrb[18].mxu0  ;;  %v6943_v18 = vmax.f32 %v5603_v22, %v5691_v43 }
 0x1f5   :  { %v5703_v36 = vpop.f32.mrb[66].mxu1  ;;  %v5705_v31 = vpop.f32.mrb[19].mxu0 }
 0x1f6   :  { %v5709_v20 = vpop.f32.mrb[67].mxu1 }
 0x1fa   :  { %v5713_v13 = vpop.f32.mrb[20].mxu0 }
 0x1fb   :  { %v5715_v25 = vpop.f32.mrb[68].mxu1  ;;  %v5717_v3 = vpop.f32.mrb[21].mxu0 }
 0x1fc   :  { %v5721_v17 = vpop.f32.mrb[69].mxu1  ;;  %v5723_v15 = vpop.f32.mrb[22].mxu0 }
 0x1fd   :  { %v5727_v16 = vpop.f32.mrb[70].mxu1  ;;  %v5729_v57 = vpop.f32.mrb[23].mxu0  ;;  %v6948_v43 = vmax.f32 %v5636_v28, %v5721_v17  ;;  %v6952_v28 = vld [vmem:[#allocation47_spill] sm:$0xff] }
 0x1fe   :  { %6901 = vst [vmem:[#allocation62_spill] sm:$0xff] %v5727_v16  ;;  %v5733_v49 = vpop.f32.mrb[71].mxu1 }
 0x1ff   :  { %6902 = vst [vmem:[#allocation63_spill] sm:$0xff] %v5733_v49 }
 0x202   :  { %v5737_v10 = vpop.f32.mrb[24].mxu0 }
 0x203   :  { %v5739_v7 = vpop.f32.mrb[72].mxu1  ;;  %v5741_v63 = vpop.f32.mrb[25].mxu0 }
 0x204   :  { %6903 = vst [vmem:[#allocation64_spill] sm:$0xff] %v5739_v7  ;;  %v5745_v0 = vpop.f32.mrb[73].mxu1  ;;  %v5747_v62 = vpop.f32.mrb[26].mxu0 }
 0x205   :  { %6904 = vst [vmem:[#allocation65_spill] sm:$0xff] %v5745_v0  ;;  %v5751_v16 = vpop.f32.mrb[74].mxu1  ;;  %v5753_v1 = vpop.f32.mrb[27].mxu0 }
 0x206   :  { %6905 = vst [vmem:[#allocation66_spill] sm:$0xff] %v5751_v16  ;;  %v5757_v49 = vpop.f32.mrb[75].mxu1 }
 0x207   :  { %6906 = vst [vmem:[#allocation67_spill] sm:$0xff] %v5757_v49 }
 0x20a   :  { %v5761_v19 = vpop.f32.mrb[28].mxu0 }
 0x20b   :  { %v5763_v7 = vpop.f32.mrb[76].mxu1  ;;  %v5765_v21 = vpop.f32.mrb[29].mxu0 }
 0x20c   :  { %6907 = vst [vmem:[#allocation68_spill] sm:$0xff] %v5763_v7  ;;  %v5769_v0 = vpop.f32.mrb[77].mxu1  ;;  %v5771_v9 = vpop.f32.mrb[30].mxu0  ;;  %v1581_v7 = vld [vmem:[%s6783_s2] sm:$0x3] }
 0x20d   :  { %6908 = vst [vmem:[#allocation69_spill] sm:$0xff] %v5769_v0  ;;  %v5775_v16 = vpop.f32.mrb[78].mxu1  ;;  %v5777_v8 = vpop.f32.mrb[31].mxu0 }
 0x20e   :  { %6909 = vst [vmem:[#allocation70_spill] sm:$0xff] %v5775_v16  ;;  %v5781_v49 = vpop.f32.mrb[79].mxu1 }
 0x20f   :  { %6910 = vst [vmem:[#allocation71_spill] sm:$0xff] %v5781_v49 }
 0x213   :  { %v5785_v23 = vpop.f32.mrb[80].mxu1 }
 0x214   :  { %6911 = vst [vmem:[#allocation72_spill] sm:$0xff] %v5785_v23  ;;  %v5789_v12 = vpop.f32.mrb[81].mxu1 }
 0x215   :  { %6912 = vst [vmem:[#allocation73_spill] sm:$0xff] %v5789_v12  ;;  %v5793_v0 = vpop.f32.mrb[82].mxu1 }
 0x216   :  { %6913 = vst [vmem:[#allocation74_spill] sm:$0xff] %v5793_v0  ;;  %v5797_v16 = vpop.f32.mrb[83].mxu1 }
 0x217   :  { %6914 = vst [vmem:[#allocation75_spill] sm:$0xff] %v5797_v16 }
 0x21b   :  { %v5801_v49 = vpop.f32.mrb[84].mxu1 }
 0x21c   :  { %6915 = vst [vmem:[#allocation76_spill] sm:$0xff] %v5801_v49  ;;  %v5805_v23 = vpop.f32.mrb[85].mxu1 }
 0x21d   :  { %6916 = vst [vmem:[#allocation77_spill] sm:$0xff] %v5805_v23  ;;  %v5809_v12 = vpop.f32.mrb[86].mxu1 }
 0x21e   :  { %6917 = vst [vmem:[#allocation78_spill] sm:$0xff] %v5809_v12  ;;  %v5813_v0 = vpop.f32.mrb[87].mxu1 }
 0x21f   :  { %6918 = vst [vmem:[#allocation79_spill] sm:$0xff] %v5813_v0 }
 0x223   :  { %v5817_v16 = vpop.f32.mrb[88].mxu1 }
 0x224   :  { %6919 = vst [vmem:[#allocation80_spill] sm:$0xff] %v5817_v16  ;;  %v5821_v49 = vpop.f32.mrb[89].mxu1 }
 0x225   :  { %6920 = vst [vmem:[#allocation81_spill] sm:$0xff] %v5821_v49  ;;  %v5825_v23 = vpop.f32.mrb[90].mxu1 }
 0x226   :  { %6921 = vst [vmem:[#allocation82_spill] sm:$0xff] %v5825_v23  ;;  %v5829_v12 = vpop.f32.mrb[91].mxu1 }
 0x227   :  { %6922 = vst [vmem:[#allocation83_spill] sm:$0xff] %v5829_v12 }
 0x22b   :  { %v5833_v0 = vpop.f32.mrb[92].mxu1 }
 0x22c   :  { %6923 = vst [vmem:[#allocation84_spill] sm:$0xff] %v5833_v0  ;;  %v5837_v16 = vpop.f32.mrb[93].mxu1 }
 0x22d   :  { %6924 = vst [vmem:[#allocation85_spill] sm:$0xff] %v5837_v16  ;;  %v5841_v49 = vpop.f32.mrb[94].mxu1 }
 0x22e   :  { %6925 = vst [vmem:[#allocation86_spill] sm:$0xff] %v5841_v49  ;;  %v5845_v23 = vpop.f32.mrb[95].mxu1 }
 0x22f   :  { %6926 = vst [vmem:[#allocation87_spill] sm:$0xff] %v5845_v23 }
 0x233   :  { %v5849_v12 = vpop.f32.mrb[96].mxu1 }
 0x234   :  { %6927 = vst [vmem:[#allocation88_spill] sm:$0xff] %v5849_v12  ;;  %v5853_v0 = vpop.f32.mrb[97].mxu1 }
 0x235   :  { %6928 = vst [vmem:[#allocation89_spill] sm:$0xff] %v5853_v0  ;;  %v5857_v16 = vpop.f32.mrb[98].mxu1 }
 0x236   :  { %6929 = vst [vmem:[#allocation90_spill] sm:$0xff] %v5857_v16  ;;  %v5861_v49 = vpop.f32.mrb[99].mxu1 }
 0x237   :  { %6930 = vst [vmem:[#allocation91_spill] sm:$0xff] %v5861_v49 }
 0x23b   :  { %v5865_v23 = vpop.f32.mrb[100].mxu1 }
 0x23c   :  { %6931 = vst [vmem:[#allocation92_spill] sm:$0xff] %v5865_v23  ;;  %v5869_v12 = vpop.f32.mrb[101].mxu1 }
 0x23d   :  { %6932 = vst [vmem:[#allocation93_spill] sm:$0xff] %v5869_v12  ;;  %v5873_v0 = vpop.f32.mrb[102].mxu1 }
 0x23e   :  { %6933 = vst [vmem:[#allocation94_spill] sm:$0xff] %v5873_v0  ;;  %v5877_v16 = vpop.f32.mrb[103].mxu1 }
 0x23f   :  { %6934 = vst [vmem:[#allocation95_spill] sm:$0xff] %v5877_v16  ;;  %v1583_v16 = vlaneseq }
 0x241   :  { %v1584_v24 = vshrl.u32 %v1583_v16, 7 }
 0x243   :  { %v5881_v49 = vpop.f32.mrb[104].mxu1 }
 0x244   :  { %6935 = vst [vmem:[#allocation96_spill] sm:$0xff] %v5881_v49  ;;  %v5885_v23 = vpop.f32.mrb[105].mxu1 }
 0x245   :  { %6936 = vst [vmem:[#allocation97_spill] sm:$0xff] %v5885_v23  ;;  %v5889_v12 = vpop.f32.mrb[106].mxu1 }
 0x246   :  { %6937 = vst [vmem:[#allocation98_spill] sm:$0xff] %v5889_v12  ;;  %v5893_v0 = vpop.f32.mrb[107].mxu1 }
 0x247   :  { %6938 = vst [vmem:[#allocation99_spill] sm:$0xff] %v5893_v0  ;;  %v1585_v0 = vsub.s32 0, %v1584_v24 }
 0x249   :  { %v5917_v5 = vrot.slane %v1581_v7, %v1585_v0 }
 0x24b   :  { %v5897_v40 = vpop.f32.mrb[108].mxu1 }
 0x24c   :  { %6939 = vst [vmem:[#allocation100_spill] sm:$0xff] %v5897_v40  ;;  %v5901_v49 = vpop.f32.mrb[109].mxu1  ;;  %v1589_v40 = vsub.s32 1, %v1584_v24  ;;  %v6944_v24 = vmax.f32 %v5607_v2, %v5697_v52 }
 0x24d   :  { %6940 = vst [vmem:[#allocation101_spill] sm:$0xff] %v5901_v49  ;;  %v5905_v23 = vpop.f32.mrb[110].mxu1 }
 0x24e   :  { %6941 = vst [vmem:[#allocation102_spill] sm:$0xff] %v5905_v23  ;;  %v5909_v12 = vpop.f32.mrb[111].mxu1  ;;  %v5920_v27 = vrot.slane %v1581_v7, %v1589_v40  ;;  %v6945_v40 = vmax.f32 %v5611_v60, %v5703_v36 }
 0x24f   :  { %6942 = vst [vmem:[#allocation103_spill] sm:$0xff] %v5909_v12 }
 0x253   :  { %v1318_v16 = vpop.f32.mrb[112].mxu1 }
 0x254   :  { %v1485_v32 = vmax.f32 %v5437_v50, %v1318_v16  ;;  %v1320_v49 = vpop.f32.mrb[113].mxu1 }
 0x255   :  { %v1486_v48 = vmax.f32 %v5439_v54, %v1320_v49  ;;  %v1322_v23 = vpop.f32.mrb[114].mxu1 }
 0x256   :  { %v1533_v12 = vmax.f32 %v6943_v18, %v1485_v32  ;;  %v1487_v44 = vmax.f32 %v5441_v46, %v1322_v23  ;;  %v1324_v35 = vpop.f32.mrb[115].mxu1  ;;  %v6946_v32 = vmax.f32 %v5618_v4, %v5709_v20  ;;  %v6947_v20 = vmax.f32 %v5632_v11, %v5715_v25 }
 0x257   :  { %v1534_v30 = vmax.f32 %v6944_v24, %v1486_v48  ;;  %v1488_v50 = vmax.f32 %v5443_v47, %v1324_v35 }
 0x258   :  { %v1593_v0 = vadd.f32 %v5917_v5, %v1533_v12  ;;  %v1535_v54 = vmax.f32 %v6945_v40, %v1487_v44  ;;  %v6950_v40 = vld [vmem:[#allocation62_spill] sm:$0xff] }
 0x259   :  { %v1594_v7 = vadd.f32 %v5920_v27, %v1534_v30  ;;  %v1536_v49 = vmax.f32 %v6946_v32, %v1488_v50 }
 0x25a   :  { %v1595_v46 = vadd.f32 %v5917_v5, %v1535_v54  ;;  %v1641_v48 = vmax.f32 %v1593_v0, 0.0  ;;  %v6949_v0 = vld [vmem:[#allocation45_spill] sm:$0xff]  ;;  %v6953_v54 = vld [vmem:[#allocation63_spill] sm:$0xff] }
 0x25b   :  { %v1596_v23 = vadd.f32 %v5920_v27, %v1536_v49  ;;  %v1328_v52 = vpop.f32.mrb[116].mxu1  ;;  %v1642_v12 = vmax.f32 %v1594_v7, 0.0  ;;  %v6951_v25 = vmax.f32 %v6949_v0, %v6950_v40  ;;  %v6962_v0 = vld [vmem:[#allocation65_spill] sm:$0xff] }
 0x25c   :  { %v1643_v18 = vmax.f32 %v1595_v46, 0.0  ;;  %v1489_v35 = vmax.f32 %v5448_v58, %v1328_v52  ;;  %v1330_v47 = vpop.f32.mrb[117].mxu1 }
 0x25d   :  { %v1644_v22 = vmax.f32 %v1596_v23, 0.0  ;;  %v1490_v44 = vmax.f32 %v5450_v33, %v1330_v47  ;;  %v1332_v36 = vpop.f32.mrb[118].mxu1  ;;  %v4441_v33 = vld [vmem:[%s6784_s3 + $0x100] ss:$8 sps:$4 sm:$0xff]   ;;  %v4444_v23 = vld [vmem:[%s6784_s3 + $0x110] ss:$8 sps:$4 sm:$0xff]  }
 0x25e   :  { %v1689_v30 = vpack.c.bf16 %v1643_v18, %v1641_v48  ;;  %v1537_v2 = vmax.f32 %v6947_v20, %v1489_v35  ;;  %v1491_v60 = vmax.f32 %v5452_v53, %v1332_v36  ;;  %v1334_v4 = vpop.f32.mrb[119].mxu1  ;;  %v4446_v53 = vld [vmem:[%s6784_s3 + $0x114] ss:$8 sps:$4 sm:$0xff]   ;;  %v6956_v36 = vld [vmem:[#allocation16_spill] sm:$0xff] }
 0x25f   :  { %v1538_v16 = vmax.f32 %v6948_v43, %v1490_v44  ;;  %v1492_v58 = vmax.f32 %v5454_v56, %v1334_v4  ;;  %v1690_v24 = vpack.c.bf16 %v1644_v22, %v1642_v12  ;;  %v6954_v56 = vmax.f32 %v6952_v28, %v6953_v54  ;;  %v6955_v18 = vld [vmem:[#allocation15_spill] sm:$0xff]  ;;  %v4449_v12 = vld [vmem:[%s6784_s3 + $0x124] ss:$8 sps:$4 sm:$0xff]   ;;  %v4447_v28 = vld [vmem:[%s6784_s3 + $0x120] ss:$8 sps:$4 sm:$0xff]  }
 0x260   :  { %v1597_v50 = vadd.f32 %v5917_v5, %v1537_v2  ;;  %v1539_v11 = vmax.f32 %v6951_v25, %v1491_v60  ;;  %v6957_v2 = vld [vmem:[#allocation49_spill] sm:$0xff]  ;;  %v6958_v60 = vld [vmem:[#allocation64_spill] sm:$0xff] }
 0x261   :  { %v1598_v17 = vadd.f32 %v5920_v27, %v1538_v16  ;;  %v1540_v7 = vmax.f32 %v6954_v56, %v1492_v58  ;;  %2705 = vmatprep.mubr.bf16.mxu0 %v1690_v24  ;;  %v6959_v4 = vmax.f32 %v6957_v2, %v6958_v60  ;;  %v6960_v16 = vld [vmem:[#allocation17_spill] sm:$0xff] }
 0x262   :  { %v1599_v32 = vadd.f32 %v5917_v5, %v1539_v11  ;;  %2706 = vmatmul.mubr.bf16.vlgmr.msra.gmra.mrb[32].mxu0 %v1689_v30  ;;  %v1645_v52 = vmax.f32 %v1597_v50, 0.0  ;;  %v6961_v50 = vld [vmem:[#allocation51_spill] sm:$0xff]  ;;  %v6964_v11 = vld [vmem:[#allocation18_spill] sm:$0xff]  ;;  %v6965_v56 = vld [vmem:[#allocation53_spill] sm:$0xff] }
 0x263   :  { %v1600_v49 = vadd.f32 %v5920_v27, %v1540_v7  ;;  %v1338_v46 = vpop.f32.mrb[120].mxu1  ;;  %2787 = vmatpush1.bf16.msra.mxu0 %v4441_v33  ;;  %v1646_v22 = vmax.f32 %v1598_v17, 0.0  ;;  %v6963_v40 = vmax.f32 %v6961_v50, %v6962_v0  ;;  %v6966_v7 = vld [vmem:[#allocation66_spill] sm:$0xff] }
 0x264   :  { %v1647_v48 = vmax.f32 %v1599_v32, 0.0  ;;  %v1493_v35 = vmax.f32 %v6955_v18, %v1338_v46  ;;  %v1340_v47 = vpop.f32.mrb[121].mxu1  ;;  %2788 = vmatprep.subr.bf16.mxu0 %v4446_v53  ;;  %v6967_v32 = vmax.f32 %v6965_v56, %v6966_v7  ;;  %v4452_v46 = vld [vmem:[%s6784_s3 + $0x134] ss:$8 sps:$4 sm:$0xff]  }
 0x265   :  { %v1648_v44 = vmax.f32 %v1600_v49, 0.0  ;;  %v1494_v30 = vmax.f32 %v6956_v36, %v1340_v47  ;;  %v1342_v20 = vpop.f32.mrb[122].mxu1  ;;  %v6969_v18 = vld [vmem:[#allocation67_spill] sm:$0xff] }
 0x266   :  { %v1541_v43 = vmax.f32 %v6959_v4, %v1493_v35  ;;  %v1495_v58 = vmax.f32 %v6960_v16, %v1342_v20  ;;  %v1344_v24 = vpop.f32.mrb[123].mxu1  ;;  %v5978_v33 = vpack.c.bf16 %v1647_v48, %v1645_v52  ;;  %v6968_v48 = vld [vmem:[#allocation55_spill] sm:$0xff]  ;;  %v4455_v4 = vld [vmem:[%s6784_s3 + $0x144] ss:$8 sps:$4 sm:$0xff]  }
 0x267   :  { %v1542_v25 = vmax.f32 %v6963_v40, %v1494_v30  ;;  %v1496_v53 = vmax.f32 %v6964_v11, %v1344_v24  ;;  %v5984_v17 = vpack.c.bf16 %v1648_v44, %v1646_v22  ;;  %2789 = vmatpush1.bf16.msra.mxu0 %v4444_v23  ;;  %v6970_v23 = vmax.f32 %v6968_v48, %v6969_v18  ;;  %v6971_v20 = vld [vmem:[#allocation19_spill] sm:$0xff]  ;;  %v6973_v40 = vld [vmem:[#allocation57_spill] sm:$0xff] }
 0x268   :  { %v1601_v54 = vadd.f32 %v5917_v5, %v1541_v43  ;;  %v1543_v49 = vmax.f32 %v6967_v32, %v1495_v58  ;;  %2790 = vmatprep.subr.bf16.mxu0 %v4449_v12  ;;  %v4450_v12 = vld [vmem:[%s6784_s3 + $0x130] ss:$8 sps:$4 sm:$0xff]   ;;  %v6972_v58 = vld [vmem:[#allocation20_spill] sm:$0xff]  ;;  %v6977_v32 = vld [vmem:[#allocation69_spill] sm:$0xff] }
 0x269   :  { %v1602_v52 = vadd.f32 %v5920_v27, %v1542_v25  ;;  %v1544_v35 = vmax.f32 %v6970_v23, %v1496_v53  ;;  %2715 = vmatprep.mubr.bf16.mxu0 %v5984_v17  ;;  %v6974_v25 = vld [vmem:[#allocation68_spill] sm:$0xff] }
 0x26a   :  { %v1603_v47 = vadd.f32 %v5917_v5, %v1543_v49  ;;  %2716 = vmatmul.mubr.bf16.gmra.mrb[36].mxu0 %v5978_v33  ;;  %v1649_v36 = vmax.f32 %v1601_v54, 0.0  ;;  %v6975_v11 = vmax.f32 %v6973_v40, %v6974_v25  ;;  %v6978_v49 = vmax.f32 %v5674_v6, %v6977_v32  ;;  %v4453_v18 = vld [vmem:[%s6784_s3 + $0x140] ss:$8 sps:$4 sm:$0xff]  }
 0x26b   :  { %v1604_v22 = vadd.f32 %v5920_v27, %v1544_v35  ;;  %v1348_v44 = vpop.f32.mrb[124].mxu1  ;;  %2791 = vmatpush1.bf16.msra.mxu0 %v4447_v28  ;;  %v1650_v43 = vmax.f32 %v1602_v52, 0.0  ;;  %v6976_v28 = vld [vmem:[#allocation21_spill] sm:$0xff]  ;;  %v6979_v52 = vld [vmem:[#allocation22_spill] sm:$0xff]  ;;  %v6985_v25 = vld [vmem:[#allocation24_spill] sm:$0xff] }
 0x26c   :  { %v1651_v30 = vmax.f32 %v1603_v47, 0.0  ;;  %v1497_v2 = vmax.f32 %v6971_v20, %v1348_v44  ;;  %v1350_v60 = vpop.f32.mrb[125].mxu1  ;;  %2792 = vmatprep.subr.bf16.mxu0 %v4452_v46  ;;  %v6980_v35 = vld [vmem:[#allocation70_spill] sm:$0xff] }
 0x26d   :  { %v1652_v16 = vmax.f32 %v1604_v22, 0.0  ;;  %v1498_v24 = vmax.f32 %v6972_v58, %v1350_v60  ;;  %v1352_v50 = vpop.f32.mrb[126].mxu1  ;;  %v6981_v47 = vmax.f32 %v5678_v38, %v6980_v35  ;;  %v4458_v44 = vld [vmem:[%s6784_s3 + $0x154] ss:$8 sps:$4 sm:$0xff]   ;;  %v4456_v60 = vld [vmem:[%s6784_s3 + $0x150] ss:$8 sps:$4 sm:$0xff]  }
 0x26e   :  { %v6012_v0 = vpack.c.bf16 %v1651_v30, %v1649_v36  ;;  %v1545_v53 = vmax.f32 %v6975_v11, %v1497_v2  ;;  %v1499_v54 = vmax.f32 %v6976_v28, %v1352_v50  ;;  %v1354_v56 = vpop.f32.mrb[127].mxu1  ;;  %v6982_v36 = vld [vmem:[#allocation71_spill] sm:$0xff] }
 0x26f   :  { %v6018_v7 = vpack.c.bf16 %v1652_v16, %v1650_v43  ;;  %v1546_v46 = vmax.f32 %v6978_v49, %v1498_v24  ;;  %v1500_v48 = vmax.f32 %v6979_v52, %v1354_v56  ;;  %2793 = vmatpush1.bf16.msra.mxu0 %v4450_v12  ;;  %v6983_v12 = vmax.f32 %v5682_v26, %v6982_v36  ;;  %v6984_v16 = vld [vmem:[#allocation23_spill] sm:$0xff]  ;;  %v4461_v24 = vld [vmem:[%s6784_s3 + $0x164] ss:$8 sps:$4 sm:$0xff]  }
 0x270   :  { %v1605_v23 = vadd.f32 %v5917_v5, %v1545_v53  ;;  %v1547_v22 = vmax.f32 %v6981_v47, %v1499_v54  ;;  %2794 = vmatprep.subr.bf16.mxu0 %v4455_v4  ;;  %v6986_v54 = vld [vmem:[#allocation72_spill] sm:$0xff]  ;;  %v6988_v49 = vld [vmem:[#allocation25_spill] sm:$0xff]  ;;  %v6991_v47 = vld [vmem:[#allocation26_spill] sm:$0xff] }
 0x271   :  { %v1606_v6 = vadd.f32 %v5920_v27, %v1546_v46  ;;  %v1548_v30 = vmax.f32 %v6983_v12, %v1500_v48  ;;  %2725 = vmatprep.mubr.bf16.mxu0 %v6018_v7  ;;  %v6987_v56 = vmax.f32 %v5689_v59, %v6986_v54  ;;  %v6992_v59 = vld [vmem:[#allocation74_spill] sm:$0xff] }
 0x272   :  { %v1607_v20 = vadd.f32 %v5917_v5, %v1547_v22  ;;  %2726 = vmatmul.mubr.bf16.gmra.mrb[40].mxu0 %v6012_v0  ;;  %v1653_v4 = vmax.f32 %v1605_v23, 0.0  ;;  %v6993_v36 = vmax.f32 %v5699_v51, %v6992_v59 }
 0x273   :  { %v1608_v38 = vadd.f32 %v5920_v27, %v1548_v30  ;;  %v1358_v2 = vpop.f32.mrb[128].mxu1  ;;  %2795 = vmatpush1.bf16.msra.mxu0 %v4453_v18  ;;  %v1654_v50 = vmax.f32 %v1606_v6, 0.0  ;;  %v6989_v18 = vld [vmem:[#allocation73_spill] sm:$0xff]  ;;  %v4464_v30 = vld [vmem:[%s6784_s3 + $0x174] ss:$8 sps:$4 sm:$0xff]  }
 0x274   :  { %v1655_v43 = vmax.f32 %v1607_v20, 0.0  ;;  %v1501_v58 = vmax.f32 %v6984_v16, %v1358_v2  ;;  %v1360_v26 = vpop.f32.mrb[129].mxu1  ;;  %2796 = vmatprep.subr.bf16.mxu0 %v4458_v44  ;;  %v6990_v23 = vmax.f32 %v5693_v61, %v6989_v18  ;;  %v4459_v44 = vld [vmem:[%s6784_s3 + $0x160] ss:$8 sps:$4 sm:$0xff]   ;;  %v6994_v20 = vld [vmem:[#allocation75_spill] sm:$0xff] }
 0x275   :  { %v1656_v40 = vmax.f32 %v1608_v38, 0.0  ;;  %v1502_v11 = vmax.f32 %v6985_v25, %v1360_v26  ;;  %v1362_v53 = vpop.f32.mrb[130].mxu1  ;;  %v6995_v38 = vmax.f32 %v5705_v31, %v6994_v20  ;;  %v6996_v26 = vld [vmem:[#allocation27_spill] sm:$0xff] }
 0x276   :  { %v6050_v28 = vpack.c.bf16 %v1655_v43, %v1653_v4  ;;  %v1549_v32 = vmax.f32 %v6987_v56, %v1501_v58  ;;  %v1503_v46 = vmax.f32 %v6988_v49, %v1362_v53  ;;  %v1364_v52 = vpop.f32.mrb[131].mxu1  ;;  %v4462_v43 = vld [vmem:[%s6784_s3 + $0x170] ss:$8 sps:$4 sm:$0xff]   ;;  %v4470_v20 = vld [vmem:[%s6784_s3 + $0x194] ss:$8 sps:$4 sm:$0xff]  }
 0x277   :  { %v6056_v48 = vpack.c.bf16 %v1656_v40, %v1654_v50  ;;  %v1550_v35 = vmax.f32 %v6990_v23, %v1502_v11  ;;  %v1504_v22 = vmax.f32 %v6991_v47, %v1364_v52  ;;  %2797 = vmatpush1.bf16.msra.mxu0 %v4456_v60  ;;  %v4467_v50 = vld [vmem:[%s6784_s3 + $0x184] ss:$8 sps:$4 sm:$0xff]  }
 0x278   :  { %v1609_v6 = vadd.f32 %v5917_v5, %v1549_v32  ;;  %v1551_v12 = vmax.f32 %v6993_v36, %v1503_v46  ;;  %2798 = vmatprep.subr.bf16.mxu0 %v4461_v24  ;;  %v6997_v11 = vld [vmem:[#allocation28_spill] sm:$0xff]  ;;  %v7000_v52 = vld [vmem:[#allocation29_spill] sm:$0xff] }
 0x279   :  { %v1610_v61 = vadd.f32 %v5920_v27, %v1550_v35  ;;  %v1552_v2 = vmax.f32 %v6995_v38, %v1504_v22  ;;  %2735 = vmatprep.mubr.bf16.mxu0 %v6056_v48  ;;  %v6998_v32 = vld [vmem:[#allocation76_spill] sm:$0xff]  ;;  %v7001_v47 = vld [vmem:[#allocation77_spill] sm:$0xff]  ;;  %v7006_v38 = vld [vmem:[#allocation79_spill] sm:$0xff] }
 0x27a   :  { %v1611_v60 = vadd.f32 %v5917_v5, %v1551_v12  ;;  %2736 = vmatmul.mubr.bf16.gmra.mrb[44].mxu0 %v6050_v28  ;;  %v1657_v16 = vmax.f32 %v1609_v6, 0.0  ;;  %v6999_v49 = vmax.f32 %v5713_v13, %v6998_v32  ;;  %v7002_v22 = vmax.f32 %v5717_v3, %v7001_v47  ;;  %v7003_v6 = vld [vmem:[#allocation30_spill] sm:$0xff]  ;;  %v4465_v36 = vld [vmem:[%s6784_s3 + $0x180] ss:$8 sps:$4 sm:$0xff]  }
 0x27b   :  { %v1612_v51 = vadd.f32 %v5920_v27, %v1552_v2  ;;  %v1368_v4 = vpop.f32.mrb[132].mxu1  ;;  %2799 = vmatpush1.bf16.msra.mxu0 %v4459_v44  ;;  %v1658_v40 = vmax.f32 %v1610_v61, 0.0  ;;  %v7004_v13 = vld [vmem:[#allocation78_spill] sm:$0xff]  ;;  %v7007_v2 = vmax.f32 %v5729_v57, %v7006_v38  ;;  %v4473_v57 = vld [vmem:[%s6784_s3 + $0x1a4] ss:$8 sps:$4 sm:$0xff]  }
 0x27c   :  { %v1659_v58 = vmax.f32 %v1611_v60, 0.0  ;;  %v1505_v24 = vmax.f32 %v6996_v26, %v1368_v4  ;;  %v1370_v31 = vpop.f32.mrb[133].mxu1  ;;  %2800 = vmatprep.subr.bf16.mxu0 %v4464_v30  ;;  %v7005_v30 = vmax.f32 %v5723_v15, %v7004_v13  ;;  %v4468_v15 = vld [vmem:[%s6784_s3 + $0x190] ss:$8 sps:$4 sm:$0xff]   ;;  %v7013_v47 = vld [vmem:[#allocation81_spill] sm:$0xff] }
 0x27d   :  { %v1660_v25 = vmax.f32 %v1612_v51, 0.0  ;;  %v1506_v53 = vmax.f32 %v6997_v11, %v1370_v31  ;;  %v1372_v54 = vpop.f32.mrb[134].mxu1  ;;  %v7008_v26 = vld [vmem:[#allocation31_spill] sm:$0xff]  ;;  %v7016_v13 = vld [vmem:[#allocation82_spill] sm:$0xff] }
 0x27e   :  { %v6088_v56 = vpack.c.bf16 %v1659_v58, %v1657_v16  ;;  %v1553_v46 = vmax.f32 %v6999_v49, %v1505_v24  ;;  %v1507_v18 = vmax.f32 %v7000_v52, %v1372_v54  ;;  %v1374_v23 = vpop.f32.mrb[135].mxu1  ;;  %v7010_v54 = vld [vmem:[#allocation80_spill] sm:$0xff] }
 0x27f   :  { %v6094_v35 = vpack.c.bf16 %v1660_v25, %v1658_v40  ;;  %v1554_v44 = vmax.f32 %v7002_v22, %v1506_v53  ;;  %v1508_v59 = vmax.f32 %v7003_v6, %v1374_v23  ;;  %2801 = vmatpush1.bf16.msra.mxu0 %v4462_v43  ;;  %v7009_v25 = vld [vmem:[#allocation32_spill] sm:$0xff]  ;;  %v7011_v32 = vmax.f32 %v5737_v10, %v7010_v54  ;;  %v7015_v6 = vld [vmem:[#allocation34_spill] sm:$0xff]  ;;  %v7024_v54 = vld [vmem:[#allocation37_spill] sm:$0xff] }
 0x280   :  { %v1613_v12 = vadd.f32 %v5917_v5, %v1553_v46  ;;  %v1555_v61 = vmax.f32 %v7005_v30, %v1507_v18  ;;  %2802 = vmatprep.subr.bf16.mxu0 %v4467_v50  ;;  %v7012_v46 = vld [vmem:[#allocation33_spill] sm:$0xff]  ;;  %v7014_v22 = vmax.f32 %v5741_v63, %v7013_v47  ;;  %v7017_v30 = vmax.f32 %v5747_v62, %v7016_v13  ;;  %v4476_v63 = vld [vmem:[%s6784_s3 + $0x1b4] ss:$8 sps:$4 sm:$0xff]   ;;  %v4474_v62 = vld [vmem:[%s6784_s3 + $0x1b0] ss:$8 sps:$4 sm:$0xff]  }
 0x281   :  { %v1614_v3 = vadd.f32 %v5920_v27, %v1554_v44  ;;  %v1556_v60 = vmax.f32 %v7007_v2, %v1508_v59 }
 0x282   :  { %v1615_v51 = vadd.f32 %v5917_v5, %v1555_v61  ;;  %v1661_v16 = vmax.f32 %v1613_v12, 0.0 }
 0x283   :  { %v1616_v4 = vadd.f32 %v5920_v27, %v1556_v60  ;;  %v1378_v43 = vpop.f32.mrb[136].mxu1  ;;  %2803 = vmatpush1.bf16.msra.mxu0 %v4465_v36  ;;  %v1662_v50 = vmax.f32 %v1614_v3, 0.0  ;;  %v4471_v36 = vld [vmem:[%s6784_s3 + $0x1a0] ss:$8 sps:$4 sm:$0xff]   ;;  %v7018_v3 = vld [vmem:[#allocation83_spill] sm:$0xff] }
 0x284   :  { %v1663_v58 = vmax.f32 %v1615_v51, 0.0  ;;  %v1509_v24 = vmax.f32 %v7008_v26, %v1378_v43  ;;  %v1380_v31 = vpop.f32.mrb[137].mxu1  ;;  %2804 = vmatprep.subr.bf16.mxu0 %v4470_v20  ;;  %v7019_v38 = vmax.f32 %v5753_v1, %v7018_v3  ;;  %v4479_v1 = vld [vmem:[%s6784_s3 + $0x1c4] ss:$8 sps:$4 sm:$0xff]  }
 0x285   :  { %v1664_v40 = vmax.f32 %v1616_v4, 0.0  ;;  %v1510_v11 = vmax.f32 %v7009_v25, %v1380_v31  ;;  %v1382_v53 = vpop.f32.mrb[138].mxu1  ;;  %v7022_v25 = vld [vmem:[#allocation84_spill] sm:$0xff] }
 0x286   :  { %v1557_v49 = vmax.f32 %v7011_v32, %v1509_v24  ;;  %v1511_v52 = vmax.f32 %v7012_v46, %v1382_v53  ;;  %v1384_v18 = vpop.f32.mrb[139].mxu1  ;;  %v6128_v23 = vpack.c.bf16 %v1663_v58, %v1661_v16  ;;  %v7020_v16 = vld [vmem:[#allocation35_spill] sm:$0xff] }
 0x287   :  { %v1558_v44 = vmax.f32 %v7014_v22, %v1510_v11  ;;  %v1512_v59 = vmax.f32 %v7015_v6, %v1384_v18  ;;  %2805 = vmatpush1.bf16.msra.mxu0 %v4468_v15  ;;  %v6137_v12 = vpack.c.bf16 %v1664_v40, %v1662_v50  ;;  %v7023_v11 = vmax.f32 %v5761_v19, %v7022_v25  ;;  %v7027_v22 = vld [vmem:[#allocation38_spill] sm:$0xff] }
 0x288   :  { %v1617_v10 = vadd.f32 %v5917_v5, %v1557_v49  ;;  %v1559_v61 = vmax.f32 %v7017_v30, %v1511_v52  ;;  %2806 = vmatprep.subr.bf16.mxu0 %v4473_v57  ;;  %v7021_v57 = vld [vmem:[#allocation36_spill] sm:$0xff]  ;;  %v7025_v52 = vld [vmem:[#allocation85_spill] sm:$0xff] }
 0x289   :  { %v1618_v20 = vadd.f32 %v5920_v27, %v1558_v44  ;;  %v1560_v2 = vmax.f32 %v7019_v38, %v1512_v59  ;;  %v7026_v18 = vmax.f32 %v5765_v21, %v7025_v52  ;;  %v4477_v59 = vld [vmem:[%s6784_s3 + $0x1c0] ss:$8 sps:$4 sm:$0xff]   ;;  %v4482_v21 = vld [vmem:[%s6784_s3 + $0x1d4] ss:$8 sps:$4 sm:$0xff]  }
 0x28a   :  { %v1619_v60 = vadd.f32 %v5917_v5, %v1559_v61  ;;  %v1665_v43 = vmax.f32 %v1617_v10, 0.0  ;;  %v7030_v61 = vld [vmem:[#allocation87_spill] sm:$0xff]  ;;  %v7039_v52 = vld [vmem:[#allocation42_spill] sm:$0xff] }
 0x28b   :  { %v1620_v51 = vadd.f32 %v5920_v27, %v1560_v2  ;;  %v1388_v4 = vpop.f32.mrb[140].mxu1  ;;  %2807 = vmatpush1.bf16.msra.mxu0 %v4471_v36  ;;  %v1666_v24 = vmax.f32 %v1618_v20, 0.0  ;;  %v7028_v36 = vld [vmem:[#allocation86_spill] sm:$0xff] }
 0x28c   :  { %v1667_v15 = vmax.f32 %v1619_v60, 0.0  ;;  %v1513_v58 = vmax.f32 %v7020_v16, %v1388_v4  ;;  %v1390_v26 = vpop.f32.mrb[141].mxu1  ;;  %2808 = vmatprep.subr.bf16.mxu0 %v4476_v63  ;;  %v7029_v10 = vmax.f32 %v5771_v9, %v7028_v36  ;;  %v7031_v63 = vmax.f32 %v5777_v8, %v7030_v61  ;;  %v4480_v2 = vld [vmem:[%s6784_s3 + $0x1d0] ss:$8 sps:$4 sm:$0xff]  }
 0x28d   :  { %v1668_v31 = vmax.f32 %v1620_v51, 0.0  ;;  %v1514_v50 = vmax.f32 %v7021_v57, %v1390_v26  ;;  %v1392_v40 = vpop.f32.mrb[142].mxu1  ;;  %v7032_v4 = vld [vmem:[#allocation39_spill] sm:$0xff] }
 0x28e   :  { %v1561_v53 = vmax.f32 %v7023_v11, %v1513_v58  ;;  %v1515_v32 = vmax.f32 %v7024_v54, %v1392_v40  ;;  %v1394_v49 = vpop.f32.mrb[143].mxu1  ;;  %v6164_v46 = vpack.c.bf16 %v1667_v15, %v1665_v43  ;;  %v4485_v43 = vld [vmem:[%s6784_s3 + $0x1e4] ss:$8 sps:$4 sm:$0xff]   ;;  %v7042_v36 = vld [vmem:[#allocation91_spill] sm:$0xff] }
 0x28f   :  { %v1562_v47 = vmax.f32 %v7026_v18, %v1514_v50  ;;  %v1516_v44 = vmax.f32 %v7027_v22, %v1394_v49  ;;  %v6170_v6 = vpack.c.bf16 %v1668_v31, %v1666_v24  ;;  %2809 = vmatpush1.bf16.msra.mxu0 %v4474_v62  ;;  %v7033_v58 = vld [vmem:[#allocation40_spill] sm:$0xff]  ;;  %v7036_v40 = vld [vmem:[#allocation41_spill] sm:$0xff]  ;;  %v4486_v61 = vld [vmem:[%s6784_s3 + $0x1f0] ss:$8 sps:$4 sm:$0xff]  }
 0x290   :  { %v1621_v19 = vadd.f32 %v5917_v5, %v1561_v53  ;;  %v1563_v13 = vmax.f32 %v7029_v10, %v1515_v32  ;;  %2810 = vmatprep.subr.bf16.mxu0 %v4479_v1  ;;  %v7034_v31 = vld [vmem:[#allocation88_spill] sm:$0xff]  ;;  %v7037_v54 = vld [vmem:[#allocation89_spill] sm:$0xff]  ;;  %v7043_v10 = vmax.f32 %v5397_v29, %v7042_v36 }
 0x291   :  { %v1622_v30 = vadd.f32 %v5920_v27, %v1562_v47  ;;  %v1564_v20 = vmax.f32 %v7031_v63, %v1516_v44  ;;  %2745 = vmatprep.mubr.bf16.mxu0 %v6170_v6  ;;  %v7035_v57 = vmax.f32 %v5391_v55, %v7034_v31  ;;  %v7038_v32 = vmax.f32 %v5393_v34, %v7037_v54  ;;  %v4483_v47 = vld [vmem:[%s6784_s3 + $0x1e0] ss:$8 sps:$4 sm:$0xff]   ;;  %v7040_v55 = vld [vmem:[#allocation90_spill] sm:$0xff] }
 0x292   :  { %v1623_v3 = vadd.f32 %v5917_v5, %v1563_v13  ;;  %2746 = vmatmul.mubr.bf16.gmra.mrb[48].mxu0 %v6164_v46  ;;  %v1669_v60 = vmax.f32 %v1621_v19, 0.0  ;;  %v7041_v44 = vmax.f32 %v5395_v37, %v7040_v55  ;;  %v4488_v19 = vld [vmem:[%s6784_s3 + $0x1f4] ss:$8 sps:$4 sm:$0xff]  }
 0x293   :  { %v1624_v9 = vadd.f32 %v5920_v27, %v1564_v20  ;;  %v1398_v38 = vpop.f32.mrb[144].mxu1  ;;  %2811 = vmatpush1.bf16.msra.mxu0 %v4477_v59  ;;  %v1670_v15 = vmax.f32 %v1622_v30, 0.0 }
 0x294   :  { %v1671_v51 = vmax.f32 %v1623_v3, 0.0  ;;  %v1517_v62 = vmax.f32 %v7032_v4, %v1398_v38  ;;  %v1400_v8 = vpop.f32.mrb[145].mxu1  ;;  %2812 = vmatprep.subr.bf16.mxu0 %v4482_v21  ;;  %v7044_v3 = vld [vmem:[#allocation43_spill] sm:$0xff]  ;;  %v4491_v38 = vld [vmem:[%s6784_s3 + $0x204] ss:$8 sps:$4 sm:$0xff]  }
 0x295   :  { %v1672_v16 = vmax.f32 %v1624_v9, 0.0  ;;  %v1518_v26 = vmax.f32 %v7033_v58, %v1400_v8  ;;  %v1402_v1 = vpop.f32.mrb[146].mxu1  ;;  %v7048_v58 = vld [vmem:[#allocation46_spill] sm:$0xff] }
 0x296   :  { %v6198_v24 = vpack.c.bf16 %v1671_v51, %v1669_v60  ;;  %v1565_v50 = vmax.f32 %v7035_v57, %v1517_v62  ;;  %v1519_v25 = vmax.f32 %v7036_v40, %v1402_v1  ;;  %v1404_v11 = vpop.f32.mrb[147].mxu1  ;;  %v7045_v51 = vld [vmem:[#allocation44_spill] sm:$0xff]  ;;  %v7049_v57 = vld [vmem:[#allocation93_spill] sm:$0xff] }
 0x297   :  { %v6204_v53 = vpack.c.bf16 %v1672_v16, %v1670_v15  ;;  %v1566_v49 = vmax.f32 %v7038_v32, %v1518_v26  ;;  %v1520_v18 = vmax.f32 %v7039_v52, %v1404_v11  ;;  %2813 = vmatpush1.bf16.msra.mxu0 %v4480_v2  ;;  %v7052_v32 = vld [vmem:[#allocation94_spill] sm:$0xff] }
 0x298   :  { %v1625_v22 = vadd.f32 %v5917_v5, %v1565_v50  ;;  %v1567_v59 = vmax.f32 %v7041_v44, %v1519_v25  ;;  %2814 = vmatprep.subr.bf16.mxu0 %v4485_v43  ;;  %v7046_v43 = vld [vmem:[#allocation92_spill] sm:$0xff]  ;;  %v7050_v50 = vmax.f32 %v5406_v39, %v7049_v57 }
 0x299   :  { %v1626_v34 = vadd.f32 %v5920_v27, %v1566_v49  ;;  %v1568_v13 = vmax.f32 %v7043_v10, %v1520_v18  ;;  %2755 = vmatprep.mubr.bf16.mxu0 %v6204_v53  ;;  %v7047_v15 = vmax.f32 %v5404_v14, %v7046_v43  ;;  %v7051_v25 = vld [vmem:[#allocation48_spill] sm:$0xff]  ;;  %v7053_v49 = vmax.f32 %v5408_v45, %v7052_v32  ;;  %v7057_v45 = vld [vmem:[#allocation50_spill] sm:$0xff] }
 0x29a   :  { %v1627_v21 = vadd.f32 %v5917_v5, %v1567_v59  ;;  %2756 = vmatmul.mubr.bf16.gmra.mrb[52].mxu0 %v6198_v24  ;;  %v1673_v63 = vmax.f32 %v1625_v22, 0.0  ;;  %v7054_v18 = vld [vmem:[#allocation8_spill] sm:$0xff] }
 0x29b   :  { %v1628_v37 = vadd.f32 %v5920_v27, %v1568_v13  ;;  %v1408_v30 = vpop.f32.mrb[148].mxu1  ;;  %2815 = vmatpush1.bf16.msra.mxu0 %v4483_v47  ;;  %v1674_v2 = vmax.f32 %v1626_v34, 0.0  ;;  %v7055_v47 = vld [vmem:[#allocation95_spill] sm:$0xff] }
 0x29c   :  { %v1675_v20 = vmax.f32 %v1627_v21, 0.0  ;;  %v1521_v9 = vmax.f32 %v7044_v3, %v1408_v30  ;;  %v1410_v29 = vpop.f32.mrb[149].mxu1  ;;  %2816 = vmatprep.subr.bf16.mxu0 %v4488_v19  ;;  %v7056_v22 = vmax.f32 %v7054_v18, %v7055_v47  ;;  %v7060_v3 = vld [vmem:[#allocation96_spill] sm:$0xff] }
 0x29d   :  { %v1676_v60 = vmax.f32 %v1628_v37, 0.0  ;;  %v1522_v4 = vmax.f32 %v7045_v51, %v1410_v29  ;;  %v1412_v62 = vpop.f32.mrb[150].mxu1  ;;  %v7058_v37 = vld [vmem:[#allocation52_spill] sm:$0xff] }
 0x29e   :  { %v6236_v8 = vpack.c.bf16 %v1675_v20, %v1673_v63  ;;  %v1569_v16 = vmax.f32 %v7047_v15, %v1521_v9  ;;  %v1523_v26 = vmax.f32 %v7048_v58, %v1412_v62  ;;  %v1414_v1 = vpop.f32.mrb[151].mxu1  ;;  %v7059_v20 = vld [vmem:[#allocation9_spill] sm:$0xff]  ;;  %v7065_v15 = vld [vmem:[#allocation56_spill] sm:$0xff] }
 0x29f   :  { %v6242_v31 = vpack.c.bf16 %v1676_v60, %v1674_v2  ;;  %v1570_v40 = vmax.f32 %v7050_v50, %v1522_v4  ;;  %v1524_v11 = vmax.f32 %v7051_v25, %v1414_v1  ;;  %2817 = vmatpush1.bf16.msra.mxu0 %v4486_v61  ;;  %v7061_v9 = vmax.f32 %v7059_v20, %v7060_v3  ;;  %v7063_v4 = vld [vmem:[#allocation97_spill] sm:$0xff]  ;;  %v7069_v25 = vld [vmem:[#allocation99_spill] sm:$0xff] }
 0x2a0   :  { %v1629_v54 = vadd.f32 %v5917_v5, %v1569_v16  ;;  %v1571_v52 = vmax.f32 %v7053_v49, %v1523_v26  ;;  %2899 = vmatprep.subr.bf16.mxu0 %v4491_v38  ;;  %v7062_v38 = vld [vmem:[#allocation54_spill] sm:$0xff]  ;;  %v7064_v62 = vmax.f32 %v5417_v41, %v7063_v4  ;;  %v7080_v3 = vld [vmem:[#allocation61_spill] sm:$0xff] }
 0x2a1   :  { %v1630_v14 = vadd.f32 %v5920_v27, %v1570_v40  ;;  %v1572_v55 = vmax.f32 %v7056_v22, %v1524_v11  ;;  %2765 = vmatprep.mubr.bf16.mxu0 %v6242_v31  ;;  %v7066_v26 = vld [vmem:[#allocation98_spill] sm:$0xff] }
 0x2a2   :  { %v1631_v39 = vadd.f32 %v5917_v5, %v1571_v52  ;;  %2766 = vmatmul.mubr.bf16.gmra.mrb[56].mxu0 %v6236_v8  ;;  %v1677_v19 = vmax.f32 %v1629_v54, 0.0  ;;  %v7067_v1 = vmax.f32 %v5419_v42, %v7066_v26  ;;  %v7068_v40 = vld [vmem:[#allocation10_spill] sm:$0xff]  ;;  %v7085_v26 = vld [vmem:[#allocation103_spill] sm:$0xff] }
 0x2a3   :  { %v1632_v44 = vadd.f32 %v5920_v27, %v1572_v55  ;;  %v1418_v59 = vpop.f32.mrb[152].mxu1  ;;  %v1678_v13 = vmax.f32 %v1630_v14, 0.0  ;;  %v7070_v11 = vmax.f32 %v7068_v40, %v7069_v25  ;;  %v7071_v14 = vld [vmem:[#allocation58_spill] sm:$0xff] }
 0x2a4   :  { %v1679_v34 = vmax.f32 %v1631_v39, 0.0  ;;  %v1525_v36 = vmax.f32 %v7057_v45, %v1418_v59  ;;  %v1420_v10 = vpop.f32.mrb[153].mxu1  ;;  %v7072_v39 = vld [vmem:[#allocation59_spill] sm:$0xff]  ;;  %v7082_v4 = vld [vmem:[#allocation102_spill] sm:$0xff] }
 0x2a5   :  { %v1680_v21 = vmax.f32 %v1632_v44, 0.0  ;;  %v1526_v30 = vmax.f32 %v7058_v37, %v1420_v10  ;;  %v1422_v61 = vpop.f32.mrb[154].mxu1  ;;  %v7076_v10 = vld [vmem:[#allocation60_spill] sm:$0xff]  ;;  %v4492_v25 = vld [vmem:[%s6784_s3 + $0x210] ss:$8 sps:$4 sm:$0xff]  }
 0x2a6   :  { %v6262_v63 = vpack.c.bf16 %v1679_v34, %v1677_v19  ;;  %v1573_v29 = vmax.f32 %v7061_v9, %v1525_v36  ;;  %v1527_v2 = vmax.f32 %v7062_v38, %v1422_v61  ;;  %v1424_v60 = vpop.f32.mrb[155].mxu1  ;;  %v7073_v19 = vld [vmem:[#allocation11_spill] sm:$0xff]  ;;  %v7074_v34 = vld [vmem:[#allocation100_spill] sm:$0xff] }
 0x2a7   :  { %v6268_v51 = vpack.c.bf16 %v1680_v21, %v1678_v13  ;;  %v1574_v43 = vmax.f32 %v7064_v62, %v1526_v30  ;;  %v1528_v16 = vmax.f32 %v7065_v15, %v1424_v60  ;;  %v7075_v45 = vmax.f32 %v7073_v19, %v7074_v34  ;;  %v7078_v30 = vld [vmem:[#allocation101_spill] sm:$0xff]  ;;  %v4494_v15 = vld [vmem:[%s6784_s3 + $0x214] ss:$8 sps:$4 sm:$0xff]  }
 0x2a8   :  { %v1633_v58 = vadd.f32 %v5917_v5, %v1573_v29  ;;  %v1575_v57 = vmax.f32 %v7067_v1, %v1527_v2  ;;  %v4489_v29 = vld [vmem:[%s6784_s3 + $0x200] ss:$8 sps:$4 sm:$0xff]   ;;  %v4515_v19 = vld [vmem:[%s6784_s3 + $0x284] ss:$8 sps:$4 sm:$0xff]  }
 0x2a9   :  { %v1634_v50 = vadd.f32 %v5920_v27, %v1574_v43  ;;  %v1576_v54 = vmax.f32 %v7070_v11, %v1528_v16  ;;  %2775 = vmatprep.mubr.bf16.mxu0 %v6268_v51  ;;  %v7081_v60 = vld [vmem:[#allocation13_spill] sm:$0xff] }
 0x2aa   :  { %v1635_v32 = vadd.f32 %v5917_v5, %v1575_v57  ;;  %2776 = vmatmul.mubr.bf16.gmra.mrb[60].mxu0 %v6262_v63  ;;  %v1681_v52 = vmax.f32 %v1633_v58, 0.0  ;;  %v7083_v62 = vmax.f32 %v7081_v60, %v7082_v4  ;;  %v7084_v58 = vld [vmem:[#allocation14_spill] sm:$0xff]  ;;  %v4513_v34 = vld [vmem:[%s6784_s3 + $0x280] ss:$8 sps:$4 sm:$0xff]   ;;  %v4539_v4 = vld [vmem:[%s6784_s3 + $0x304] ss:$8 sps:$4 sm:$0xff]  }
 0x2ab   :  { %v1636_v41 = vadd.f32 %v5920_v27, %v1576_v54  ;;  %v1428_v49 = vpop.f32.mrb[156].mxu1  ;;  %2818 = vmatprep.mubr.bf16.mxu0 %v6170_v6  ;;  %v1682_v22 = vmax.f32 %v1634_v50, 0.0  ;;  %v7077_v6 = vld [vmem:[#allocation12_spill] sm:$0xff]  ;;  %v7086_v1 = vmax.f32 %v7084_v58, %v7085_v26  ;;  %v4534_v60 = vld [vmem:[%s6784_s3 + $0x2f0] ss:$8 sps:$4 sm:$0xff]  }
 0x2ac   :  { %v1683_v42 = vmax.f32 %v1635_v32, 0.0  ;;  %v1529_v18 = vmax.f32 %v7071_v14, %v1428_v49  ;;  %v1430_v47 = vpop.f32.mrb[157].mxu1  ;;  %v7079_v61 = vmax.f32 %v7077_v6, %v7078_v30  ;;  %v4497_v32 = vld [vmem:[%s6784_s3 + $0x224] ss:$8 sps:$4 sm:$0xff]   ;;  %v4522_v6 = vld [vmem:[%s6784_s3 + $0x2b0] ss:$8 sps:$4 sm:$0xff]  }
 0x2ad   :  { %v1684_v55 = vmax.f32 %v1636_v41, 0.0  ;;  %v1530_v44 = vmax.f32 %v7072_v39, %v1430_v47  ;;  %v1432_v59 = vpop.f32.mrb[158].mxu1  ;;  %v4503_v14 = vld [vmem:[%s6784_s3 + $0x244] ss:$8 sps:$4 sm:$0xff]   ;;  %v4506_v47 = vld [vmem:[%s6784_s3 + $0x254] ss:$8 sps:$4 sm:$0xff]  }
 0x2ae   :  { %v1577_v36 = vmax.f32 %v7075_v45, %v1529_v18  ;;  %v1531_v13 = vmax.f32 %v7076_v10, %v1432_v59  ;;  %v1434_v21 = vpop.f32.mrb[159].mxu1  ;;  %v6293_v37 = vpack.c.bf16 %v1683_v42, %v1681_v52  ;;  %v4500_v52 = vld [vmem:[%s6784_s3 + $0x234] ss:$8 sps:$4 sm:$0xff]   ;;  %v4498_v42 = vld [vmem:[%s6784_s3 + $0x230] ss:$8 sps:$4 sm:$0xff]  }
 0x2af   :  { %v1578_v20 = vmax.f32 %v7079_v61, %v1530_v44  ;;  %v1532_v9 = vmax.f32 %v7080_v3, %v1434_v21  ;;  %v6302_v38 = vpack.c.bf16 %v1684_v55, %v1682_v22  ;;  %v4501_v18 = vld [vmem:[%s6784_s3 + $0x240] ss:$8 sps:$4 sm:$0xff]   ;;  %v4504_v22 = vld [vmem:[%s6784_s3 + $0x250] ss:$8 sps:$4 sm:$0xff]   ;;  %v4509_v55 = vld [vmem:[%s6784_s3 + $0x264] ss:$8 sps:$4 sm:$0xff]  }
 0x2b0   :  { %v1637_v2 = vadd.f32 %v5917_v5, %v1577_v36  ;;  %v1579_v43 = vmax.f32 %v7083_v62, %v1531_v13  ;;  %v4507_v39 = vld [vmem:[%s6784_s3 + $0x260] ss:$8 sps:$4 sm:$0xff]   ;;  %v4512_v44 = vld [vmem:[%s6784_s3 + $0x274] ss:$8 sps:$4 sm:$0xff]   ;;  %v4510_v59 = vld [vmem:[%s6784_s3 + $0x270] ss:$8 sps:$4 sm:$0xff]  }
 0x2b1   :  { %v1638_v16 = vadd.f32 %v5920_v27, %v1578_v20  ;;  %v1580_v57 = vmax.f32 %v7086_v1, %v1532_v9  ;;  %v4518_v45 = vld [vmem:[%s6784_s3 + $0x294] ss:$8 sps:$4 sm:$0xff]   ;;  %v4516_v36 = vld [vmem:[%s6784_s3 + $0x290] ss:$8 sps:$4 sm:$0xff]   ;;  %v4521_v10 = vld [vmem:[%s6784_s3 + $0x2a4] ss:$8 sps:$4 sm:$0xff]  }
 0x2b2   :  { %v1639_v50 = vadd.f32 %v5917_v5, %v1579_v43  ;;  %2819 = vmatmul.mubr.bf16.vlgmr.msra.gmra.mrb[32].mxu0 %v6164_v46  ;;  %v1685_v11 = vmax.f32 %v1637_v2, 0.0  ;;  %v4519_v13 = vld [vmem:[%s6784_s3 + $0x2a0] ss:$8 sps:$4 sm:$0xff]   ;;  %v4524_v21 = vld [vmem:[%s6784_s3 + $0x2b4] ss:$8 sps:$4 sm:$0xff]  }
 0x2b3   :  { %v1640_v40 = vadd.f32 %v5920_v27, %v1580_v57  ;;  %2900 = vmatpush1.bf16.msra.mxu0 %v4489_v29  ;;  %2828 = vmatprep.mubr.bf16.mxu0 %v6204_v53  ;;  %v1686_v41 = vmax.f32 %v1638_v16, 0.0  ;;  %v4495_v27 = vld [vmem:[%s6784_s3 + $0x220] ss:$8 sps:$4 sm:$0xff]   ;;  %v4527_v30 = vld [vmem:[%s6784_s3 + $0x2c4] ss:$8 sps:$4 sm:$0xff]  }
 0x2b4   :  { %v1687_v54 = vmax.f32 %v1639_v50, 0.0  ;;  %2901 = vmatprep.subr.bf16.mxu0 %v4494_v15  ;;  %v4525_v61 = vld [vmem:[%s6784_s3 + $0x2c0] ss:$8 sps:$4 sm:$0xff]   ;;  %v4530_v20 = vld [vmem:[%s6784_s3 + $0x2d4] ss:$8 sps:$4 sm:$0xff]  }
 0x2b5   :  { %v1688_v5 = vmax.f32 %v1640_v40, 0.0  ;;  %v4528_v3 = vld [vmem:[%s6784_s3 + $0x2d0] ss:$8 sps:$4 sm:$0xff]   ;;  %v4533_v9 = vld [vmem:[%s6784_s3 + $0x2e4] ss:$8 sps:$4 sm:$0xff]  }
 0x2b6   :  { %v6325_v49 = vpack.c.bf16 %v1687_v54, %v1685_v11  ;;  %v4531_v29 = vld [vmem:[%s6784_s3 + $0x2e0] ss:$8 sps:$4 sm:$0xff]   ;;  %v4536_v2 = vld [vmem:[%s6784_s3 + $0x2f4] ss:$8 sps:$4 sm:$0xff]   ;;  %v4545_v15 = vld [vmem:[%s6784_s3 + $0x324] ss:$8 sps:$4 sm:$0xff]  }
 0x2b7   :  { %2902 = vmatpush1.bf16.msra.mxu0 %v4492_v25  ;;  %v6330_v46 = vpack.c.bf16 %v1688_v5, %v1686_v41  ;;  %v4537_v62 = vld [vmem:[%s6784_s3 + $0x300] ss:$8 sps:$4 sm:$0xff]   ;;  %v4542_v43 = vld [vmem:[%s6784_s3 + $0x314] ss:$8 sps:$4 sm:$0xff]   ;;  %v4546_v58 = vld [vmem:[%s6784_s3 + $0x330] ss:$8 sps:$4 sm:$0xff]  }
 0x2b8   :  { %2903 = vmatprep.subr.bf16.mxu0 %v4497_v32  ;;  %v4543_v16 = vld [vmem:[%s6784_s3 + $0x320] ss:$8 sps:$4 sm:$0xff]   ;;  %v4551_v26 = vld [vmem:[%s6784_s3 + $0x344] ss:$8 sps:$4 sm:$0xff]   ;;  %v4554_v57 = vld [vmem:[%s6784_s3 + $0x354] ss:$8 sps:$4 sm:$0xff]  }
 0x2b9   :  { %v4549_v1 = vld [vmem:[%s6784_s3 + $0x340] ss:$8 sps:$4 sm:$0xff]   ;;  %v4552_v50 = vld [vmem:[%s6784_s3 + $0x350] ss:$8 sps:$4 sm:$0xff]   ;;  %v4557_v40 = vld [vmem:[%s6784_s3 + $0x364] ss:$8 sps:$4 sm:$0xff]  }
 0x2ba   :  { %2829 = vmatmul.mubr.bf16.gmra.mrb[36].mxu0 %v6198_v24  ;;  %v4555_v25 = vld [vmem:[%s6784_s3 + $0x360] ss:$8 sps:$4 sm:$0xff]   ;;  %v4560_v11 = vld [vmem:[%s6784_s3 + $0x374] ss:$8 sps:$4 sm:$0xff]   ;;  %v4558_v54 = vld [vmem:[%s6784_s3 + $0x370] ss:$8 sps:$4 sm:$0xff]  }
 0x2bb   :  { %2904 = vmatpush1.bf16.msra.mxu0 %v4495_v27  ;;  %2838 = vmatprep.mubr.bf16.mxu0 %v6242_v31  ;;  %v4563_v32 = vld [vmem:[%s6784_s3 + $0x384] ss:$8 sps:$4 sm:$0xff]   ;;  %v4561_v41 = vld [vmem:[%s6784_s3 + $0x380] ss:$8 sps:$4 sm:$0xff]   ;;  %v4566_v5 = vld [vmem:[%s6784_s3 + $0x394] ss:$8 sps:$4 sm:$0xff]  }
 0x2bc   :  { %2905 = vmatprep.subr.bf16.mxu0 %v4500_v52  ;;  %v4564_v27 = vld [vmem:[%s6784_s3 + $0x390] ss:$8 sps:$4 sm:$0xff]   ;;  %v4569_v52 = vld [vmem:[%s6784_s3 + $0x3a4] ss:$8 sps:$4 sm:$0xff]  }
 0x2bf   :  { %2906 = vmatpush1.bf16.msra.mxu0 %v4498_v42  ;;  %v4567_v42 = vld [vmem:[%s6784_s3 + $0x3a0] ss:$8 sps:$4 sm:$0xff]  }
 0x2c0   :  { %2907 = vmatprep.subr.bf16.mxu0 %v4503_v14  ;;  %v4572_v14 = vld [vmem:[%s6784_s3 + $0x3b4] ss:$8 sps:$4 sm:$0xff]  }
 0x2c2   :  { %2839 = vmatmul.mubr.bf16.gmra.mrb[40].mxu0 %v6236_v8 }
 0x2c3   :  { %2908 = vmatpush1.bf16.msra.mxu0 %v4501_v18  ;;  %2848 = vmatprep.mubr.bf16.mxu0 %v6268_v51  ;;  %v4570_v18 = vld [vmem:[%s6784_s3 + $0x3b0] ss:$8 sps:$4 sm:$0xff]  }
 0x2c4   :  { %2909 = vmatprep.subr.bf16.mxu0 %v4506_v47  ;;  %v4575_v47 = vld [vmem:[%s6784_s3 + $0x3c4] ss:$8 sps:$4 sm:$0xff]  }
 0x2c7   :  { %2910 = vmatpush1.bf16.msra.mxu0 %v4504_v22  ;;  %v4573_v22 = vld [vmem:[%s6784_s3 + $0x3c0] ss:$8 sps:$4 sm:$0xff]  }
 0x2c8   :  { %2911 = vmatprep.subr.bf16.mxu0 %v4509_v55  ;;  %v4578_v55 = vld [vmem:[%s6784_s3 + $0x3d4] ss:$8 sps:$4 sm:$0xff]  }
 0x2ca   :  { %2849 = vmatmul.mubr.bf16.gmra.mrb[44].mxu0 %v6262_v63 }
 0x2cb   :  { %2912 = vmatpush1.bf16.msra.mxu0 %v4507_v39  ;;  %2858 = vmatprep.mubr.bf16.mxu0 %v5984_v17  ;;  %v4576_v39 = vld [vmem:[%s6784_s3 + $0x3d0] ss:$8 sps:$4 sm:$0xff]  }
 0x2cc   :  { %2913 = vmatprep.subr.bf16.mxu0 %v4512_v44  ;;  %v4581_v44 = vld [vmem:[%s6784_s3 + $0x3e4] ss:$8 sps:$4 sm:$0xff]  }
 0x2cf   :  { %2914 = vmatpush1.bf16.msra.mxu0 %v4510_v59  ;;  %v4579_v59 = vld [vmem:[%s6784_s3 + $0x3e0] ss:$8 sps:$4 sm:$0xff]  }
 0x2d0   :  { %2915 = vmatprep.subr.bf16.mxu0 %v4515_v19  ;;  %v4584_v19 = vld [vmem:[%s6784_s3 + $0x3f4] ss:$8 sps:$4 sm:$0xff]  }
 0x2d2   :  { %2859 = vmatmul.mubr.bf16.gmra.mrb[48].mxu0 %v5978_v33 }
 0x2d3   :  { %2916 = vmatpush1.bf16.msra.mxu0 %v4513_v34  ;;  %2868 = vmatprep.mubr.bf16.mxu0 %v6018_v7  ;;  %v4633_v34 = vld [vmem:[%s6786_s5 + $0x40] sm:$0xff]  }
 0x2d4   :  { %2917 = vmatprep.subr.bf16.mxu0 %v4518_v45  ;;  %v4634_v45 = vld [vmem:[%s6786_s5] sm:$0xff]   ;;  %4086 = vmatprep.subr.bf16.mxu1 %v4633_v34 }
 0x2d5   :  { %4087 = vmatpush3.bf16.msra.mxu1 %v4634_v45 }
 0x2d7   :  { %2918 = vmatpush1.bf16.msra.mxu0 %v4516_v36  ;;  %v4635_v36 = vld [vmem:[%s6786_s5 + $0x48] sm:$0xff]  }
 0x2d8   :  { %2919 = vmatprep.subr.bf16.mxu0 %v4521_v10  ;;  %v4582_v10 = vld [vmem:[%s6784_s3 + $0x3f0] ss:$8 sps:$4 sm:$0xff]   ;;  %4088 = vmatprep.subr.bf16.mxu1 %v4635_v36 }
 0x2da   :  { %2869 = vmatmul.mubr.bf16.gmra.mrb[52].mxu0 %v6012_v0 }
 0x2db   :  { %2920 = vmatpush1.bf16.msra.mxu0 %v4519_v13  ;;  %2878 = vmatprep.mubr.bf16.mxu0 %v6056_v48  ;;  %v4587_v13 = vld [vmem:[%s6784_s3 + $0x404] ss:$8 sps:$4 sm:$0xff]  }
 0x2dc   :  { %2921 = vmatprep.subr.bf16.mxu0 %v4524_v21  ;;  %v4636_v21 = vld [vmem:[%s6786_s5 + $0x8] sm:$0xff]  }
 0x2dd   :  { %4089 = vmatpush3.bf16.msra.mxu1 %v4636_v21 }
 0x2df   :  { %2922 = vmatpush1.bf16.msra.mxu0 %v4522_v6  ;;  %v4585_v6 = vld [vmem:[%s6784_s3 + $0x400] ss:$8 sps:$4 sm:$0xff]  }
 0x2e0   :  { %2923 = vmatprep.subr.bf16.mxu0 %v4527_v30  ;;  %v4590_v30 = vld [vmem:[%s6784_s3 + $0x414] ss:$8 sps:$4 sm:$0xff]  }
 0x2e2   :  { %2879 = vmatmul.mubr.bf16.gmra.mrb[56].mxu0 %v6050_v28 }
 0x2e3   :  { %2924 = vmatpush1.bf16.msra.mxu0 %v4525_v61  ;;  %2888 = vmatprep.mubr.bf16.mxu0 %v6094_v35  ;;  %v4638_v61 = vld [vmem:[%s6786_s5 + $0x10] sm:$0xff]  }
 0x2e4   :  { %2925 = vmatprep.subr.bf16.mxu0 %v4530_v20  ;;  %v4639_v20 = vld [vmem:[%s6786_s5 + $0x58] sm:$0xff]  }
 0x2e7   :  { %2926 = vmatpush1.bf16.msra.mxu0 %v4528_v3  ;;  %v4588_v3 = vld [vmem:[%s6784_s3 + $0x410] ss:$8 sps:$4 sm:$0xff]  }
 0x2e8   :  { %2927 = vmatprep.subr.bf16.mxu0 %v4533_v9  ;;  %v4593_v9 = vld [vmem:[%s6784_s3 + $0x424] ss:$8 sps:$4 sm:$0xff]  }
 0x2ea   :  { %2889 = vmatmul.mubr.bf16.gmra.mrb[60].mxu0 %v6088_v56 }
 0x2eb   :  { %2928 = vmatpush1.bf16.msra.mxu0 %v4531_v29  ;;  %2931 = vmatprep.mubr.bf16.mxu0 %v5984_v17  ;;  %v4540_v17 = vld [vmem:[%s6784_s3 + $0x310] ss:$8 sps:$4 sm:$0xff]   ;;  %v4641_v29 = vld [vmem:[%s6786_s5 + $0x60] sm:$0xff]  }
 0x2ec   :  { %2929 = vmatprep.subr.bf16.mxu0 %v4536_v2  ;;  %v4591_v2 = vld [vmem:[%s6784_s3 + $0x420] ss:$8 sps:$4 sm:$0xff]  }
 0x2ef   :  { %2930 = vmatpush1.bf16.msra.mxu0 %v4534_v60  ;;  %v4596_v60 = vld [vmem:[%s6784_s3 + $0x434] ss:$8 sps:$4 sm:$0xff]  }
 0x2f0   :  { %3012 = vmatprep.subr.bf16.mxu0 %v4539_v4  ;;  %v4642_v4 = vld [vmem:[%s6786_s5 + $0x20] sm:$0xff]  }
 0x2f2   :  { %2932 = vmatmul.mubr.bf16.vlgmr.msra.gmra.mrb[32].mxu0 %v5978_v33  ;;  %v4548_v33 = vld [vmem:[%s6784_s3 + $0x334] ss:$8 sps:$4 sm:$0xff]  }
 0x2f3   :  { %3013 = vmatpush1.bf16.msra.mxu0 %v4537_v62  ;;  %2941 = vmatprep.mubr.bf16.mxu0 %v6018_v7  ;;  %v4643_v62 = vld [vmem:[%s6786_s5 + $0x68] sm:$0xff]  }
 0x2f4   :  { %3014 = vmatprep.subr.bf16.mxu0 %v4542_v43  ;;  %v4594_v43 = vld [vmem:[%s6784_s3 + $0x430] ss:$8 sps:$4 sm:$0xff]  }
 0x2f7   :  { %3015 = vmatpush1.bf16.msra.mxu0 %v4540_v17  ;;  %v4599_v17 = vld [vmem:[%s6784_s3 + $0x444] ss:$8 sps:$4 sm:$0xff]  }
 0x2f8   :  { %3016 = vmatprep.subr.bf16.mxu0 %v4545_v15  ;;  %v4644_v15 = vld [vmem:[%s6786_s5 + $0x28] sm:$0xff]  }
 0x2fa   :  { %2942 = vmatmul.mubr.bf16.gmra.mrb[36].mxu0 %v6012_v0 }
 0x2fb   :  { %3017 = vmatpush1.bf16.msra.mxu0 %v4543_v16  ;;  %2951 = vmatprep.mubr.bf16.mxu0 %v6056_v48  ;;  %v4597_v16 = vld [vmem:[%s6784_s3 + $0x440] ss:$8 sps:$4 sm:$0xff]  }
 0x2fc   :  { %3018 = vmatprep.subr.bf16.mxu0 %v4548_v33  ;;  %v4602_v33 = vld [vmem:[%s6784_s3 + $0x454] ss:$8 sps:$4 sm:$0xff]  }
 0x2ff   :  { %3019 = vmatpush1.bf16.msra.mxu0 %v4546_v58  ;;  %v4600_v58 = vld [vmem:[%s6784_s3 + $0x450] ss:$8 sps:$4 sm:$0xff]  }
 0x300   :  { %3020 = vmatprep.subr.bf16.mxu0 %v4551_v26  ;;  %v4605_v26 = vld [vmem:[%s6784_s3 + $0x464] ss:$8 sps:$4 sm:$0xff]  }
 0x302   :  { %2952 = vmatmul.mubr.bf16.gmra.mrb[40].mxu0 %v6050_v28 }
 0x303   :  { %3021 = vmatpush1.bf16.msra.mxu0 %v4549_v1  ;;  %2961 = vmatprep.mubr.bf16.mxu0 %v6094_v35  ;;  %v4603_v1 = vld [vmem:[%s6784_s3 + $0x460] ss:$8 sps:$4 sm:$0xff]  }
 0x304   :  { %3022 = vmatprep.subr.bf16.mxu0 %v4554_v57  ;;  %v4608_v57 = vld [vmem:[%s6784_s3 + $0x474] ss:$8 sps:$4 sm:$0xff]  }
 0x307   :  { %3023 = vmatpush1.bf16.msra.mxu0 %v4552_v50  ;;  %v4606_v50 = vld [vmem:[%s6784_s3 + $0x470] ss:$8 sps:$4 sm:$0xff]  }
 0x308   :  { %3024 = vmatprep.subr.bf16.mxu0 %v4557_v40  ;;  %v4611_v40 = vld [vmem:[%s6784_s3 + $0x484] ss:$8 sps:$4 sm:$0xff]  }
 0x30a   :  { %2962 = vmatmul.mubr.bf16.gmra.mrb[44].mxu0 %v6088_v56 }
 0x30b   :  { %3025 = vmatpush1.bf16.msra.mxu0 %v4555_v25  ;;  %2971 = vmatprep.mubr.bf16.mxu0 %v6204_v53  ;;  %v4609_v25 = vld [vmem:[%s6784_s3 + $0x480] ss:$8 sps:$4 sm:$0xff]  }
 0x30c   :  { %3026 = vmatprep.subr.bf16.mxu0 %v4560_v11  ;;  %v4614_v11 = vld [vmem:[%s6784_s3 + $0x494] ss:$8 sps:$4 sm:$0xff]  }
 0x30f   :  { %3027 = vmatpush1.bf16.msra.mxu0 %v4558_v54  ;;  %v4612_v54 = vld [vmem:[%s6784_s3 + $0x490] ss:$8 sps:$4 sm:$0xff]  }
 0x310   :  { %3028 = vmatprep.subr.bf16.mxu0 %v4563_v32  ;;  %v4617_v32 = vld [vmem:[%s6784_s3 + $0x4a4] ss:$8 sps:$4 sm:$0xff]  }
 0x312   :  { %2972 = vmatmul.mubr.bf16.gmra.mrb[48].mxu0 %v6198_v24 }
 0x313   :  { %3029 = vmatpush1.bf16.msra.mxu0 %v4561_v41  ;;  %2981 = vmatprep.mubr.bf16.mxu0 %v6242_v31  ;;  %v4615_v41 = vld [vmem:[%s6784_s3 + $0x4a0] ss:$8 sps:$4 sm:$0xff]  }
 0x314   :  { %3030 = vmatprep.subr.bf16.mxu0 %v4566_v5  ;;  %v4620_v5 = vld [vmem:[%s6784_s3 + $0x4b4] ss:$8 sps:$4 sm:$0xff]  }
 0x317   :  { %3031 = vmatpush1.bf16.msra.mxu0 %v4564_v27  ;;  %v4618_v27 = vld [vmem:[%s6784_s3 + $0x4b0] ss:$8 sps:$4 sm:$0xff]  }
 0x318   :  { %3032 = vmatprep.subr.bf16.mxu0 %v4569_v52  ;;  %v4623_v52 = vld [vmem:[%s6784_s3 + $0x4c4] ss:$8 sps:$4 sm:$0xff]  }
 0x31a   :  { %2982 = vmatmul.mubr.bf16.gmra.mrb[52].mxu0 %v6236_v8 }
 0x31b   :  { %3033 = vmatpush1.bf16.msra.mxu0 %v4567_v42  ;;  %2991 = vmatprep.mubr.bf16.mxu0 %v6268_v51  ;;  %v4621_v42 = vld [vmem:[%s6784_s3 + $0x4c0] ss:$8 sps:$4 sm:$0xff]  }
 0x31c   :  { %3034 = vmatprep.subr.bf16.mxu0 %v4572_v14  ;;  %v4626_v14 = vld [vmem:[%s6784_s3 + $0x4d4] ss:$8 sps:$4 sm:$0xff]  }
 0x31f   :  { %3035 = vmatpush1.bf16.msra.mxu0 %v4570_v18  ;;  %v4624_v18 = vld [vmem:[%s6784_s3 + $0x4d0] ss:$8 sps:$4 sm:$0xff]  }
 0x320   :  { %3036 = vmatprep.subr.bf16.mxu0 %v4575_v47  ;;  %v4629_v47 = vld [vmem:[%s6784_s3 + $0x4e4] ss:$8 sps:$4 sm:$0xff]  }
 0x322   :  { %2992 = vmatmul.mubr.bf16.gmra.mrb[56].mxu0 %v6262_v63 }
 0x323   :  { %3037 = vmatpush1.bf16.msra.mxu0 %v4573_v22  ;;  %3001 = vmatprep.mubr.bf16.mxu0 %v6302_v38  ;;  %v4627_v22 = vld [vmem:[%s6784_s3 + $0x4e0] ss:$8 sps:$4 sm:$0xff]  }
 0x324   :  { %3038 = vmatprep.subr.bf16.mxu0 %v4578_v55  ;;  %v4632_v55 = vld [vmem:[%s6784_s3 + $0x4f4] ss:$8 sps:$4 sm:$0xff]  }
 0x327   :  { %3039 = vmatpush1.bf16.msra.mxu0 %v4576_v39  ;;  %v4630_v39 = vld [vmem:[%s6784_s3 + $0x4f0] ss:$8 sps:$4 sm:$0xff]  }
 0x328   :  { %3040 = vmatprep.subr.bf16.mxu0 %v4581_v44 }
 0x32a   :  { %3002 = vmatmul.mubr.bf16.gmra.mrb[60].mxu0 %v6293_v37 }
 0x32b   :  { %3041 = vmatpush1.bf16.msra.mxu0 %v4579_v59  ;;  %3044 = vmatprep.mubr.bf16.mxu0 %v6204_v53  ;;  %v4637_v53 = vld [vmem:[%s6786_s5 + $0x50] sm:$0xff]  }
 0x32c   :  { %3042 = vmatprep.subr.bf16.mxu0 %v4584_v19  ;;  %4090 = vmatprep.subr.bf16.mxu1 %v4637_v53 }
 0x32d   :  { %4091 = vmatpush3.bf16.msra.mxu1 %v4638_v61 }
 0x32e   :  { %4092 = vmatprep.subr.bf16.mxu1 %v4639_v20 }
 0x32f   :  { %3043 = vmatpush1.bf16.msra.mxu0 %v4582_v10 }
 0x330   :  { %3125 = vmatprep.subr.bf16.mxu0 %v4587_v13 }
 0x332   :  { %3045 = vmatmul.mubr.bf16.vlgmr.msra.gmra.mrb[32].mxu0 %v6198_v24  ;;  %v4640_v24 = vld [vmem:[%s6786_s5 + $0x18] sm:$0xff]  }
 0x333   :  { %3126 = vmatpush1.bf16.msra.mxu0 %v4585_v6  ;;  %3054 = vmatprep.mubr.bf16.mxu0 %v6242_v31 }
 0x334   :  { %3127 = vmatprep.subr.bf16.mxu0 %v4590_v30  ;;  %4093 = vmatpush3.bf16.msra.mxu1 %v4640_v24 }
 0x335   :  { %4094 = vmatprep.subr.bf16.mxu1 %v4641_v29  ;;  %v4046_v29 = vld [vmem:[%s6785_s4] ss:$0 sm:$0xff] }
 0x337   :  { %3128 = vmatpush1.bf16.msra.mxu0 %v4588_v3 }
 0x338   :  { %3129 = vmatprep.subr.bf16.mxu0 %v4593_v9  ;;  %4095 = vmatpush3.bf16.msra.mxu1 %v4642_v4 }
 0x339   :  { %4096 = vmatprep.subr.bf16.mxu1 %v4643_v62 }
 0x33a   :  { %3055 = vmatmul.mubr.bf16.gmra.mrb[36].mxu0 %v6236_v8 }
 0x33b   :  { %3130 = vmatpush1.bf16.msra.mxu0 %v4591_v2  ;;  %3064 = vmatprep.mubr.bf16.mxu0 %v6268_v51 }
 0x33c   :  { %3131 = vmatprep.subr.bf16.mxu0 %v4596_v60  ;;  %4097 = vmatpush3.bf16.msra.mxu1 %v4644_v15 }
 0x33f   :  { %3132 = vmatpush1.bf16.msra.mxu0 %v4594_v43 }
 0x340   :  { %3133 = vmatprep.subr.bf16.mxu0 %v4599_v17 }
 0x342   :  { %3065 = vmatmul.mubr.bf16.gmra.mrb[40].mxu0 %v6262_v63 }
 0x343   :  { %3134 = vmatpush1.bf16.msra.mxu0 %v4597_v16  ;;  %3074 = vmatprep.mubr.bf16.mxu0 %v6302_v38 }
 0x344   :  { %3135 = vmatprep.subr.bf16.mxu0 %v4602_v33 }
 0x347   :  { %3136 = vmatpush1.bf16.msra.mxu0 %v4600_v58 }
 0x348   :  { %3137 = vmatprep.subr.bf16.mxu0 %v4605_v26 }
 0x34a   :  { %3075 = vmatmul.mubr.bf16.gmra.mrb[44].mxu0 %v6293_v37 }
 0x34b   :  { %3138 = vmatpush1.bf16.msra.mxu0 %v4603_v1  ;;  %3084 = vmatprep.mubr.bf16.mxu0 %v6018_v7 }
 0x34c   :  { %3139 = vmatprep.subr.bf16.mxu0 %v4608_v57 }
 0x34f   :  { %3140 = vmatpush1.bf16.msra.mxu0 %v4606_v50 }
 0x350   :  { %3141 = vmatprep.subr.bf16.mxu0 %v4611_v40 }
 0x352   :  { %3085 = vmatmul.mubr.bf16.gmra.mrb[48].mxu0 %v6012_v0 }
 0x353   :  { %3142 = vmatpush1.bf16.msra.mxu0 %v4609_v25  ;;  %3094 = vmatprep.mubr.bf16.mxu0 %v6056_v48 }
 0x354   :  { %3143 = vmatprep.subr.bf16.mxu0 %v4614_v11 }
 0x357   :  { %3144 = vmatpush1.bf16.msra.mxu0 %v4612_v54 }
 0x358   :  { %3145 = vmatprep.subr.bf16.mxu0 %v4617_v32 }
 0x35a   :  { %3095 = vmatmul.mubr.bf16.gmra.mrb[52].mxu0 %v6050_v28 }
 0x35b   :  { %3146 = vmatpush1.bf16.msra.mxu0 %v4615_v41  ;;  %3104 = vmatprep.mubr.bf16.mxu0 %v6094_v35 }
 0x35c   :  { %3147 = vmatprep.subr.bf16.mxu0 %v4620_v5 }
 0x35f   :  { %3148 = vmatpush1.bf16.msra.mxu0 %v4618_v27 }
 0x360   :  { %3149 = vmatprep.subr.bf16.mxu0 %v4623_v52 }
 0x362   :  { %3105 = vmatmul.mubr.bf16.gmra.mrb[56].mxu0 %v6088_v56 }
 0x363   :  { %3150 = vmatpush1.bf16.msra.mxu0 %v4621_v42  ;;  %3114 = vmatprep.mubr.bf16.mxu0 %v6137_v12 }
 0x364   :  { %3151 = vmatprep.subr.bf16.mxu0 %v4626_v14 }
 0x367   :  { %3152 = vmatpush1.bf16.msra.mxu0 %v4624_v18 }
 0x368   :  { %3153 = vmatprep.subr.bf16.mxu0 %v4629_v47 }
 0x36a   :  { %3115 = vmatmul.mubr.bf16.gmra.mrb[60].mxu0 %v6128_v23 }
 0x36b   :  { %3154 = vmatpush1.bf16.msra.mxu0 %v4627_v22  ;;  %3157 = vmatprep.mubr.bf16.mxu0 %v6018_v7  ;;  %v4646_v7 = vld [vmem:[%s6786_s5 + $0x30] sm:$0xff]  }
 0x36c   :  { %3155 = vmatprep.subr.bf16.mxu0 %v4632_v55 }
 0x36f   :  { %3156 = vmatpush1.bf16.msra.mxu0 %v4630_v39  ;;  %v4650_v39 = vld [vmem:[%s6786_s5 + $0x80] sm:$0xff]  }
 0x372   :  { %3158 = vmatmul.mubr.bf16.vlgmr.msra.gmra.mrb[32].mxu0 %v6012_v0  ;;  %v4645_v0 = vld [vmem:[%s6786_s5 + $0x70] sm:$0xff]  }
 0x373   :  { %3167 = vmatprep.mubr.bf16.mxu0 %v6056_v48  ;;  %4098 = vmatprep.subr.bf16.mxu1 %v4645_v0  ;;  %v4648_v48 = vld [vmem:[%s6786_s5 + $0x38] sm:$0xff]   ;;  %v4651_v0 = vld [vmem:[%s6786_s5 + $0xc8] sm:$0xff]  }
 0x374   :  { %4099 = vmatpush3.bf16.msra.mxu1 %v4646_v7 }
 0x37a   :  { %3168 = vmatmul.mubr.bf16.gmra.mrb[36].mxu0 %v6050_v28  ;;  %v4647_v28 = vld [vmem:[%s6786_s5 + $0x78] sm:$0xff]  }
 0x37b   :  { %3177 = vmatprep.mubr.bf16.mxu0 %v6094_v35  ;;  %4100 = vmatprep.subr.bf16.mxu1 %v4647_v28 }
 0x37c   :  { %4101 = vmatpush3.bf16.msra.mxu1 %v4648_v48 }
 0x382   :  { %3178 = vmatmul.mubr.bf16.gmra.mrb[40].mxu0 %v6088_v56  ;;  %v4649_v56 = vld [vmem:[%s6786_s5 + $0xc0] sm:$0xff]  }
 0x383   :  { %3187 = vmatprep.mubr.bf16.mxu0 %v6137_v12  ;;  %4108 = vmatprep.subr.bf16.mxu1 %v4649_v56 }
 0x38a   :  { %3188 = vmatmul.mubr.bf16.gmra.mrb[44].mxu0 %v6128_v23 }
 0x38b   :  { %3197 = vmatprep.mubr.bf16.mxu0 %v6242_v31 }
 0x392   :  { %3198 = vmatmul.mubr.bf16.gmra.mrb[48].mxu0 %v6236_v8 }
 0x393   :  { %3207 = vmatprep.mubr.bf16.mxu0 %v6268_v51 }
 0x39a   :  { %3208 = vmatmul.mubr.bf16.gmra.mrb[52].mxu0 %v6262_v63 }
 0x39b   :  { %3217 = vmatprep.mubr.bf16.mxu0 %v6302_v38 }
 0x3a2   :  { %3218 = vmatmul.mubr.bf16.gmra.mrb[56].mxu0 %v6293_v37 }
 0x3a3   :  { %3227 = vmatprep.mubr.bf16.mxu0 %v6330_v46 }
 0x3aa   :  { %3228 = vmatmul.mubr.bf16.gmra.mrb[60].mxu0 %v6325_v49 }
 0x445   :  { %v3159_v35 = vpop.f32.mrb[32].mxu0 }
 0x446   :  { %v3161_v23 = vpop.f32.mrb[33].mxu0 }
 0x447   :  { %v3238_v12 = vmax.f32 %v3159_v35, %v3161_v23  ;;  %v3163_v8 = vpop.f32.mrb[34].mxu0  ;;  %v4652_v35 = vld [vmem:[%s6786_s5 + $0x88] sm:$0xff]  }
 0x448   :  { %v3165_v31 = vpop.f32.mrb[35].mxu0 }
 0x449   :  { %v3239_v63 = vmax.f32 %v3163_v8, %v3165_v31 }
 0x44d   :  { %v3169_v51 = vpop.f32.mrb[36].mxu0 }
 0x44e   :  { %v3171_v37 = vpop.f32.mrb[37].mxu0 }
 0x44f   :  { %v3240_v38 = vmax.f32 %v3169_v51, %v3171_v37  ;;  %v3173_v49 = vpop.f32.mrb[38].mxu0 }
 0x450   :  { %v3175_v46 = vpop.f32.mrb[39].mxu0 }
 0x451   :  { %v3241_v44 = vmax.f32 %v3173_v49, %v3175_v46 }
 0x455   :  { %v3179_v59 = vpop.f32.mrb[40].mxu0 }
 0x456   :  { %v3181_v19 = vpop.f32.mrb[41].mxu0 }
 0x457   :  { %v3242_v34 = vmax.f32 %v3179_v59, %v3181_v19  ;;  %v3183_v45 = vpop.f32.mrb[42].mxu0  ;;  %v4655_v59 = vld [vmem:[%s6786_s5 + $0xd8] sm:$0xff]  }
 0x458   :  { %v3185_v36 = vpop.f32.mrb[43].mxu0 }
 0x459   :  { %v3243_v10 = vmax.f32 %v3183_v45, %v3185_v36  ;;  %v4656_v36 = vld [vmem:[%s6786_s5 + $0x98] sm:$0xff]  }
 0x45d   :  { %v3189_v13 = vpop.f32.mrb[44].mxu0 }
 0x45e   :  { %v3191_v21 = vpop.f32.mrb[45].mxu0 }
 0x45f   :  { %v3244_v53 = vmax.f32 %v3189_v13, %v3191_v21  ;;  %v6714_v6 = vpop.f32.mrb[46].mxu0 }
 0x460   :  { %v6716_v30 = vpop.f32.mrb[47].mxu0 }
 0x461   :  { %v3245_v61 = vmax.f32 %v6714_v6, %v6716_v30  ;;  %v4658_v6 = vld [vmem:[%s6786_s5 + $0xa0] sm:$0xff]   ;;  %v4659_v30 = vld [vmem:[%s6786_s5 + $0xe8] sm:$0xff]  }
 0x465   :  { %v3199_v20 = vpop.f32.mrb[48].mxu0 }
 0x466   :  { %v3201_v3 = vpop.f32.mrb[49].mxu0 }
 0x467   :  { %v3246_v9 = vmax.f32 %v3199_v20, %v3201_v3  ;;  %v3203_v24 = vpop.f32.mrb[50].mxu0  ;;  %v4661_v20 = vld [vmem:[%s6786_s5 + $0xf0] sm:$0xff]  }
 0x468   :  { %v3205_v2 = vpop.f32.mrb[51].mxu0  ;;  %v4662_v3 = vld [vmem:[%s6786_s5 + $0xb0] sm:$0xff]  }
 0x469   :  { %v3254_v60 = vmax.f32 %v3238_v12, %v3246_v9  ;;  %v3247_v4 = vmax.f32 %v3203_v24, %v3205_v2  ;;  %v4653_v12 = vld [vmem:[%s6786_s5 + $0xd0] sm:$0xff]   ;;  %v4663_v9 = vld [vmem:[%s6786_s5 + $0xf8] sm:$0xff]   ;;  %v4748_v2 = vmov 0.0  }
 0x46a   :  { %v4664_v24 = vld [vmem:[%s6786_s5 + $0xb8] sm:$0xff]  }
 0x46b   :  { %v3269_v62 = vadd.f32 %v4046_v29, %v3254_v60  ;;  %v3255_v43 = vmax.f32 %v3239_v63, %v3247_v4  ;;  %v4666_v60 = vld [vmem:[#allocation4 + $0x8] sm:$0xff]   ;;  %v4667_v4 = vld [vmem:[#allocation4 + $0x10] sm:$0xff]  }
 0x46d   :  { %v3270_v17 = vadd.f32 %v4046_v29, %v3255_v43  ;;  %v3209_v15 = vpop.f32.mrb[52].mxu0  ;;  %v3277_v33 = vmax.f32 %v3269_v62, 0.0  ;;  %v4668_v62 = vld [vmem:[#allocation4 + $0x18] sm:$0xff]  }
 0x46e   :  { %v3211_v16 = vpop.f32.mrb[53].mxu0 }
 0x46f   :  { %v3278_v58 = vmax.f32 %v3270_v17, 0.0  ;;  %v3248_v26 = vmax.f32 %v3209_v15, %v3211_v16  ;;  %v3213_v1 = vpop.f32.mrb[54].mxu0 }
 0x470   :  { %v3215_v57 = vpop.f32.mrb[55].mxu0 }
 0x471   :  { %v3285_v50 = vpack.c.bf16 %v3278_v58, %v3277_v33  ;;  %v3256_v40 = vmax.f32 %v3240_v38, %v3248_v26  ;;  %v3249_v25 = vmax.f32 %v3213_v1, %v3215_v57  ;;  %v4047_v26 = vld [vmem:[%s6787_s6] ss:$0 sm:$0xff] }
 0x473   :  { %v3271_v11 = vadd.f32 %v4046_v29, %v3256_v40  ;;  %v3257_v54 = vmax.f32 %v3241_v44, %v3249_v25  ;;  %v4654_v44 = vld [vmem:[%s6786_s5 + $0x90] sm:$0xff]  }
 0x475   :  { %v3272_v32 = vadd.f32 %v4046_v29, %v3257_v54  ;;  %v3219_v41 = vpop.f32.mrb[56].mxu0  ;;  %v3279_v27 = vmax.f32 %v3271_v11, 0.0 }
 0x476   :  { %v3221_v5 = vpop.f32.mrb[57].mxu0 }
 0x477   :  { %v3280_v52 = vmax.f32 %v3272_v32, 0.0  ;;  %v3250_v42 = vmax.f32 %v3219_v41, %v3221_v5  ;;  %v3223_v14 = vpop.f32.mrb[58].mxu0 }
 0x478   :  { %v3225_v18 = vpop.f32.mrb[59].mxu0 }
 0x479   :  { %v3258_v47 = vmax.f32 %v3242_v34, %v3250_v42  ;;  %v3251_v22 = vmax.f32 %v3223_v14, %v3225_v18  ;;  %v3286_v55 = vpack.c.bf16 %v3280_v52, %v3279_v27  ;;  %v4080_v14 = vld [vmem:[%s6789_s8] ss:$0 sm:$0xff] }
 0x47b   :  { %v3273_v7 = vadd.f32 %v4046_v29, %v3258_v47  ;;  %v3259_v28 = vmax.f32 %v3243_v10, %v3251_v22  ;;  %3584 = vmatprep.mubr.bf16.mxu1 %v3286_v55  ;;  %v4657_v10 = vld [vmem:[%s6786_s5 + $0xe0] sm:$0xff]  }
 0x47c   :  { %3585 = vmatmul.mubr.bf16.vlgmr.msra.gmra.mrb[160].mxu1 %v3285_v50 }
 0x47d   :  { %v3274_v48 = vadd.f32 %v4046_v29, %v3259_v28  ;;  %4109 = vmatpush3.bf16.msra.mxu1 %v4650_v39  ;;  %v3229_v56 = vpop.f32.mrb[60].mxu0  ;;  %v3281_v8 = vmax.f32 %v3273_v7, 0.0 }
 0x47e   :  { %v3231_v23 = vpop.f32.mrb[61].mxu0  ;;  %4110 = vmatprep.subr.bf16.mxu1 %v4651_v0 }
 0x47f   :  { %v3282_v31 = vmax.f32 %v3274_v48, 0.0  ;;  %v3252_v63 = vmax.f32 %v3229_v56, %v3231_v23  ;;  %v3233_v51 = vpop.f32.mrb[62].mxu0 }
 0x480   :  { %v3235_v37 = vpop.f32.mrb[63].mxu0 }
 0x481   :  { %v3287_v38 = vpack.c.bf16 %v3282_v31, %v3281_v8  ;;  %v3260_v49 = vmax.f32 %v3244_v53, %v3252_v63  ;;  %v3253_v46 = vmax.f32 %v3233_v51, %v3235_v37  ;;  %4111 = vmatpush3.bf16.msra.mxu1 %v4652_v35 }
 0x482   :  { %4112 = vmatprep.subr.bf16.mxu1 %v4653_v12 }
 0x483   :  { %v3275_v19 = vadd.f32 %v4046_v29, %v3260_v49  ;;  %v3261_v34 = vmax.f32 %v3245_v61, %v3253_v46  ;;  %v4660_v61 = vld [vmem:[%s6786_s5 + $0xa8] sm:$0xff]  }
 0x485   :  { %v3276_v45 = vadd.f32 %v4046_v29, %v3261_v34  ;;  %4113 = vmatpush3.bf16.msra.mxu1 %v4654_v44  ;;  %v3283_v13 = vmax.f32 %v3275_v19, 0.0  ;;  %v4665_v29 = vld [vmem:[#allocation4] sm:$0xff]  }
 0x486   :  { %4114 = vmatprep.subr.bf16.mxu1 %v4655_v59 }
 0x487   :  { %v3284_v21 = vmax.f32 %v3276_v45, 0.0 }
 0x489   :  { %4115 = vmatpush3.bf16.msra.mxu1 %v4656_v36  ;;  %v3288_v53 = vpack.c.bf16 %v3284_v21, %v3283_v13 }
 0x48a   :  { %4116 = vmatprep.subr.bf16.mxu1 %v4657_v10 }
 0x48b   :  { %3625 = vmatprep.mubr.bf16.mxu1 %v3288_v53 }
 0x48d   :  { %4117 = vmatpush3.bf16.msra.mxu1 %v4658_v6 }
 0x48e   :  { %4118 = vmatprep.subr.bf16.mxu1 %v4659_v30 }
 0x491   :  { %4119 = vmatpush3.bf16.msra.mxu1 %v4660_v61 }
 0x492   :  { %4120 = vmatprep.subr.bf16.mxu1 %v4661_v20 }
 0x495   :  { %4121 = vmatpush3.bf16.msra.mxu1 %v4662_v3 }
 0x496   :  { %4122 = vmatprep.subr.bf16.mxu1 %v4663_v9 }
 0x499   :  { %4123 = vmatpush3.bf16.msra.mxu1 %v4664_v24 }
 0x49a   :  { %4135 = vmatprep.subr.bf16.mxu1 %v4748_v2 }
 0x49c   :  { %3626 = vmatmul.mubr.bf16.vlgmr.msra.gmra.mrb[164].mxu1 %v3287_v38 }
 0x49d   :  { %4136 = vmatpush3.bf16.msra.mxu1 %v4665_v29  ;;  %4143 = vmatprep.mubr.msk.bf16.mxu1 %vm4749_vm3, %v4748_v2 }
 0x49e   :  { %4137 = vmatprep.subr.bf16.mxu1 %v4748_v2 }
 0x4a1   :  { %4138 = vmatpush3.bf16.msra.mxu1 %v4666_v60 }
 0x4a2   :  { %4139 = vmatprep.subr.bf16.mxu1 %v4748_v2 }
 0x4a5   :  { %4140 = vmatpush3.bf16.msra.mxu1 %v4667_v4 }
 0x4a6   :  { %4141 = vmatprep.subr.bf16.mxu1 %v4748_v2 }
 0x4a9   :  { %4142 = vmatpush3.bf16.msra.mxu1 %v4668_v62 }
 0x54f   :  { %v4102_v43 = vpop.f32.mrb[160].mxu1 }
 0x550   :  { %v4103_v17 = vpop.f32.mrb[161].mxu1 }
 0x551   :  { %v4104_v15 = vadd.f32 %v4103_v17, %v4102_v43  ;;  %v4105_v16 = vpop.f32.mrb[162].mxu1 }
 0x552   :  { %v4106_v33 = vpop.f32.mrb[163].mxu1 }
 0x553   :  { %v4107_v58 = vadd.f32 %v4106_v33, %v4105_v16  ;;  %v3587_v50 = vadd.f32 %v4104_v15, %v4047_v26 }
 0x555   :  { %v3590_v54 = vadd.f32 %v4107_v58, %v4047_v26 }
 0x56f   :  { %v4124_v1 = vpop.f32.mrb[164].mxu1 }
 0x570   :  { %v4125_v57 = vpop.f32.mrb[165].mxu1 }
 0x571   :  { %v4126_v40 = vadd.f32 %v4125_v57, %v4124_v1  ;;  %v4127_v25 = vpop.f32.mrb[166].mxu1 }
 0x572   :  { %v4128_v11 = vpop.f32.mrb[167].mxu1 }
 0x573   :  { %v3628_v32 = vadd.f32 %v4126_v40, %v3587_v50  ;;  %v4129_v41 = vadd.f32 %v4128_v11, %v4127_v25 }
 0x575   :  { %v3631_v5 = vadd.f32 %v4129_v41, %v3590_v54  ;;  %v3634_v27 = vmax.f32 %v3628_v32, 0.0 }
 0x577   :  { %v3635_v52 = vmax.f32 %v3631_v5, 0.0 }
 0x579   :  { %v3636_v42 = vpack.c.bf16 %v3635_v52, %v3634_v27 }
 0x57b   :  { %4144 = vmatmul.mubr.msk.bf16.vlgmr.msra.gmra.mrb[168].mxu1 %vm300_vm1, %v3636_v42 }
 0x64e   :  { %v3713_v18 = vpop.f32.mrb[168].mxu1 }
 0x64f   :  { %v3714_v47 = vadd.f32 %v4080_v14, %v3713_v18  ;;  %v4145_v22 = vpop.f32.mrb[169].mxu1 }
 0x650   :  { %v3716_v55 = vpop.f32.mrb[170].mxu1 }
 0x651   :  { %3720 = vst [vmem:[%s6790_s9] sm:$0xff] %v3714_v47  ;;  %v3717_v39 = vadd.f32 %v4080_v14, %v3716_v55  ;;  %v4146_v0 = vpop.f32.mrb[171].mxu1 }
 0x653   :  { %3721 = vst [vmem:[%s6790_s9 + $0x8] sm:$0xff] %v3717_v39 }
 0x654   :  { %3726 = vsyncpa [#allocation3], 1 }
 0x655   :  { %3727 = vsyncpa [#allocation5], 1 }

</bundles_post_ra>
